<compile_context>
chip_gen: v7x
topology: tpu7x:2x2x1
jax: 0.10.0
libtpu: 0.0.40
codegen_flags: <defaults>
</compile_context>

<pallas_src>
import functools
import math

import jax
import jax.numpy as jnp
import numpy as np
from jax.experimental import pallas as pl
from jax.experimental.pallas import tpu as pltpu

C = 3   # in_channels == out_channels == 3
K = 3   # kernel_size


def residual_block_kernel(x_ref, w1_ref, b1_ref, w2_ref, b2_ref, out_ref, *, img_w):
    """x_ref/out_ref: (C, H, TL) lane-packed tile; tile boundaries are image-aligned
       (or the tile covers the whole lane axis).  w*_ref: flat (C*C*K*K,) OIHW weights
       in SMEM; b*_ref: (C,) in SMEM."""
    _, H, TL = x_ref.shape

    # Boundary masks built from 1-D patterns (broadcast at the selects).
    col = jax.lax.broadcasted_iota(jnp.int32, (1, TL), 1) % img_w   # within-image column
    row = jax.lax.broadcasted_iota(jnp.int32, (H, 1), 0)
    keep_l = col != 0            # a (w-1) tap is valid here
    keep_r = col != img_w - 1    # a (w+1) tap is valid here
    keep_t = row != 0            # a (h-1) tap is valid here
    keep_b = row != H - 1        # a (h+1) tap is valid here

    def row_taps(v):
        # (up, mid, down): up[h,w] = v[h-1,w], down[h,w] = v[h+1,w], zero outside image.
        up = jnp.where(keep_t, pltpu.roll(v, shift=1, axis=0), 0.0)
        dn = jnp.where(keep_b, pltpu.roll(v, shift=H - 1, axis=0), 0.0)
        return (up, v, dn)

    def lane_shift(v, dw):
        # shifted[h,w] = v[h, w+dw], zero where that crosses an image boundary.
        if dw == -1:
            return jnp.where(keep_l, pltpu.roll(v, shift=1, axis=1), 0.0)
        return jnp.where(keep_r, pltpu.roll(v, shift=TL - 1, axis=1), 0.0)

    def conv3x3_bias_relu(xs, w_ref, b_ref):
        # Shift factoring: row shifts once per (ci, kh); contract over (ci, kh) into
        # 3 column accumulators per output channel; lane shifts once per (co, kw).
        u = [row_taps(xs[ci]) for ci in range(C)]      # u[ci][kh], 6 rolls + 6 selects
        outs = []
        for co in range(C):
            s = [None, None, None]                      # s[kw] = sum_{ci,kh} w * u
            for ci in range(C):
                for kh in range(K):
                    t = u[ci][kh]
                    for kw in range(K):
                        wv = w_ref[((co * C + ci) * K + kh) * K + kw]
                        term = wv * t
                        s[kw] = term if s[kw] is None else s[kw] + term
            # center column needs no shift; bias as a scalar add fused before the ReLU.
            o = s[1] + lane_shift(s[0], -1) + lane_shift(s[2], 1) + b_ref[co]
            outs.append(jnp.maximum(o, 0.0))
        return outs

    # TODO(synk): if a bundle dump shows accumulator spills binding the vst slot on v5e,
    # strip-mine H in 8-row sublane chunks inside this body.
    x = [x_ref[ci].astype(jnp.float32) for ci in range(C)]
    hid = conv3x3_bias_relu(x, w1_ref, b1_ref)
    y = conv3x3_bias_relu(hid, w2_ref, b2_ref)
    for co in range(C):
        # PyTorch forward: relu2(conv2(relu1(conv1(x)))) + x
        out_ref[co] = (y[co] + x[co]).astype(out_ref.dtype)


def _pick_lane_tile(nw_pad, unit, h):
    """Lane tile: multiple of `unit` (image- and 128-aligned), divides nw_pad, within a
       VMEM budget, preferring >=2 (ideally an even number of) grid steps (v7x 2xTC)."""
    # ~48*H*tl bytes of double-buffered in+out blocks + ~14 (H,tl) f32 temps.
    bytes_per_lane = (2 * 2 * C * 4 + 14 * 4) * h
    cap = max(unit, min(2048, (16 * 1024 * 1024) // max(bytes_per_lane, 1)))
    cands = [t for t in range(unit, min(cap, nw_pad) + 1, unit) if nw_pad % t == 0]
    if not cands:
        return nw_pad   # TODO(synk): tile H with a 1-row halo for very large H.
    multi = [t for t in cands if nw_pad // t >= 2]
    even = [t for t in multi if (nw_pad // t) % 2 == 0]
    if even:
        return max(even)
    if multi:
        return max(multi)
    return max(cands)


def simple_residual_block(x, w1, b1, w2, b2):
    """x: (N, C, H, W) float32.  Returns relu(conv2(relu(conv1(x)))) + x."""
    N, Cc, H, W = x.shape
    assert Cc == C
    w1f, w2f = w1.reshape(-1), w2.reshape(-1)
    cparams = pltpu.CompilerParams(dimension_semantics=("parallel",),
                                   vmem_limit_bytes=32 * 1024 * 1024)

    if W % 128 == 0:
        # Already lane-dense per image: no wrapper transposes, one image per grid step.
        # TODO(synk): tile H with a 1-row halo if C*H*W blocks outgrow the VMEM budget.
        return pl.pallas_call(
            functools.partial(residual_block_kernel, img_w=W),
            out_shape=jax.ShapeDtypeStruct((N, Cc, H, W), x.dtype),
            grid_spec=pltpu.PrefetchScalarGridSpec(
                num_scalar_prefetch=0,
                grid=(N,),
                in_specs=[
                    pl.BlockSpec((None, Cc, H, W), lambda n: (n, 0, 0, 0)),
                    pl.BlockSpec(memory_space=pltpu.SMEM),   # w1 (flat)
                    pl.BlockSpec(memory_space=pltpu.SMEM),   # b1
                    pl.BlockSpec(memory_space=pltpu.SMEM),   # w2 (flat)
                    pl.BlockSpec(memory_space=pltpu.SMEM),   # b2
                ],
                out_specs=pl.BlockSpec((None, Cc, H, W), lambda n: (n, 0, 0, 0)),
            ),
            compiler_params=cparams,
        )(x, w1f, b1, w2f, b2)

    # Pack the batch along lanes: (N, C, H, W) -> (C, H, N*W).  Pure layout plumbing.
    nw = N * W
    xt = jnp.transpose(x, (1, 2, 0, 3)).reshape(Cc, H, nw)

    unit = (W * 128) // math.gcd(W, 128)                 # lcm(W, 128)
    nw_unit = ((nw + unit - 1) // unit) * unit
    if nw_unit - nw <= nw // 2:
        # Cheap image-aligned padding -> tiles may be any multiple of `unit`.
        nw_pad = nw_unit
        tl = _pick_lane_tile(nw_pad, unit, H)
    else:
        # Awkward W / tiny batch: pad only to the next 128-lane boundary and run one
        # full-width block (wasted compute bounded by <128 lanes, not garbage images).
        nw_pad = ((nw + 127) // 128) * 128
        tl = nw_pad
    if nw_pad != nw:
        xt = jnp.pad(xt, ((0, 0), (0, 0), (0, nw_pad - nw)))

    out_t = pl.pallas_call(
        functools.partial(residual_block_kernel, img_w=W),
        out_shape=jax.ShapeDtypeStruct((Cc, H, nw_pad), x.dtype),
        grid_spec=pltpu.PrefetchScalarGridSpec(
            num_scalar_prefetch=0,
            grid=(nw_pad // tl,),
            in_specs=[
                pl.BlockSpec((Cc, H, tl), lambda g: (0, 0, g)),
                pl.BlockSpec(memory_space=pltpu.SMEM),   # w1 (flat)
                pl.BlockSpec(memory_space=pltpu.SMEM),   # b1
                pl.BlockSpec(memory_space=pltpu.SMEM),   # w2 (flat)
                pl.BlockSpec(memory_space=pltpu.SMEM),   # b2
            ],
            out_specs=pl.BlockSpec((Cc, H, tl), lambda g: (0, 0, g)),
        ),
        compiler_params=cparams,
    )(xt, w1f, b1, w2f, b2)

    # Unpack and drop lane padding.
    out = out_t[:, :, :nw].reshape(Cc, H, N, W)
    return jnp.transpose(out, (2, 0, 1, 3))


def _ref_forward(x, w1, b1, w2, b2):
    """Pure-JAX reference matching PyTorch semantics."""
    dn = jax.lax.conv_dimension_numbers(x.shape, w1.shape, ("NCHW", "OIHW", "NCHW"))
    h = jax.lax.conv_general_dilated(x, w1, (1, 1), "SAME", dimension_numbers=dn)
    h = jnp.maximum(h + b1[None, :, None, None], 0.0)
    o = jax.lax.conv_general_dilated(h, w2, (1, 1), "SAME", dimension_numbers=dn)
    return jnp.maximum(o + b2[None, :, None, None], 0.0) + x


if __name__ == "__main__":
    key = jax.random.PRNGKey(0)
    k_x, k_w1, k_b1, k_w2, k_b2 = jax.random.split(key, 5)

    # Deterministic init mimicking PyTorch Conv2d default (uniform +/- 1/sqrt(fan_in)).
    fan_in = C * K * K
    bound = 1.0 / np.sqrt(fan_in)
    w1 = jax.random.uniform(k_w1, (C, C, K, K), jnp.float32, -bound, bound)  # OIHW
    b1 = jax.random.uniform(k_b1, (C,), jnp.float32, -bound, bound)
    w2 = jax.random.uniform(k_w2, (C, C, K, K), jnp.float32, -bound, bound)
    b2 = jax.random.uniform(k_b2, (C,), jnp.float32, -bound, bound)

    # (N, H, W): tiny batch single-block path, padded multi-step grid, larger lane tile,
    # and the W % 128 == 0 no-packing path.
    cases = [(2, 16, 16), (13, 16, 16), (32, 16, 16), (2, 8, 128)]
    for (N, H, W) in cases:
        kx = jax.random.fold_in(k_x, N * 100000 + H * 1000 + W)
        x = jax.random.normal(kx, (N, C, H, W), dtype=jnp.float32)
        out = jax.block_until_ready(simple_residual_block(x, w1, b1, w2, b2))
        ref = jax.block_until_ready(_ref_forward(x, w1, b1, w2, b2))
        assert out.shape == x.shape and out.dtype == x.dtype
        assert np.allclose(np.asarray(out), np.asarray(ref), atol=1e-4, rtol=1e-4), (
            f"mismatch vs reference for shape {(N, C, H, W)}"
        )
    print("KERNEL_OK")
</pallas_src>

<mosaic_0001>
module attributes {stable_mosaic.version = 11 : i64} {
  func.func @residual_block_kernel(%arg0: i32, %arg1: memref<3x16x128xf32, #tpu.memory_space<vmem>>, %arg2: memref<81xf32, #tpu.memory_space<smem>>, %arg3: memref<3xf32, #tpu.memory_space<smem>>, %arg4: memref<81xf32, #tpu.memory_space<smem>>, %arg5: memref<3xf32, #tpu.memory_space<smem>>, %arg6: memref<3x16x128xf32, #tpu.memory_space<vmem>>) attributes {dimension_semantics = [#tpu.dimension_semantics<parallel>], iteration_bounds = array<i64: 1>, scalar_prefetch = 0 : i64, scratch_operands = 0 : i64, tpu.core_type = #tpu.core_type<tc>, window_params = [{transform_indices = @transform_0, window_bounds = array<i64: 3, 16, 128>}, {transform_indices = @transform_1, window_bounds = array<i64: 81>}, {transform_indices = @transform_2, window_bounds = array<i64: 3>}, {transform_indices = @transform_3, window_bounds = array<i64: 81>}, {transform_indices = @transform_4, window_bounds = array<i64: 3>}, {transform_indices = @transform_5, window_bounds = array<i64: 3, 16, 128>}]} {
    %0 = tpu.iota {dimensions = array<i32: 1>} : vector<1x128xi32>
    %c16_i32 = arith.constant 16 : i32
    %c0_i32 = arith.constant 0 : i32
    %1 = arith.cmpi eq, %c16_i32, %c0_i32 : i32
    %c1_i32 = arith.constant 1 : i32
    %2 = arith.select %1, %c1_i32, %c16_i32 : i32
    %3 = vector.broadcast %2 : i32 to vector<1x128xi32>
    %4 = arith.remsi %0, %3 : vector<1x128xi32>
    %c0_i32_0 = arith.constant 0 : i32
    %5 = vector.broadcast %c0_i32_0 : i32 to vector<1x128xi32>
    %6 = arith.cmpi ne, %4, %5 : vector<1x128xi32>
    %c0_i32_1 = arith.constant 0 : i32
    %7 = vector.broadcast %c0_i32_1 : i32 to vector<1x128xi32>
    %8 = arith.cmpi slt, %4, %7 : vector<1x128xi32>
    %c0_i32_2 = arith.constant 0 : i32
    %9 = arith.cmpi slt, %2, %c0_i32_2 : i32
    %10 = vector.broadcast %9 : i1 to vector<1x128xi1>
    %11 = vector.broadcast %10 : vector<1x128xi1> to vector<1x128xi1>
    %12 = arith.xori %8, %11 : vector<1x128xi1>
    %13 = arith.andi %12, %6 : vector<1x128xi1>
    %14 = vector.broadcast %2 : i32 to vector<1x128xi32>
    %15 = arith.addi %4, %14 : vector<1x128xi32>
    %16 = arith.select %13, %15, %4 : vector<1x128xi1>, vector<1x128xi32>
    %17 = tpu.iota {dimensions = array<i32: 0>} : vector<16x1xi32>
    %c0_i32_3 = arith.constant 0 : i32
    %18 = vector.broadcast %c0_i32_3 : i32 to vector<1x128xi32>
    %19 = arith.cmpi ne, %16, %18 : vector<1x128xi32>
    %c15_i32 = arith.constant 15 : i32
    %20 = vector.broadcast %c15_i32 : i32 to vector<1x128xi32>
    %21 = arith.cmpi ne, %16, %20 : vector<1x128xi32>
    %c0_i32_4 = arith.constant 0 : i32
    %22 = vector.broadcast %c0_i32_4 : i32 to vector<16x1xi32>
    %23 = arith.cmpi ne, %17, %22 : vector<16x1xi32>
    %c15_i32_5 = arith.constant 15 : i32
    %24 = vector.broadcast %c15_i32_5 : i32 to vector<16x1xi32>
    %25 = arith.cmpi ne, %17, %24 : vector<16x1xi32>
    %c0 = arith.constant 0 : index
    %c0_6 = arith.constant 0 : index
    %c0_7 = arith.constant 0 : index
    %26 = vector.load %arg1[%c0, %c0_6, %c0_7] : memref<3x16x128xf32, #tpu.memory_space<vmem>>, vector<1x16x128xf32>
    %27 = vector.shape_cast %26 : vector<1x16x128xf32> to vector<16x128xf32>
    %c1 = arith.constant 1 : index
    %c0_8 = arith.constant 0 : index
    %c0_9 = arith.constant 0 : index
    %28 = vector.load %arg1[%c1, %c0_8, %c0_9] : memref<3x16x128xf32, #tpu.memory_space<vmem>>, vector<1x16x128xf32>
    %29 = vector.shape_cast %28 : vector<1x16x128xf32> to vector<16x128xf32>
    %c2 = arith.constant 2 : index
    %c0_10 = arith.constant 0 : index
    %c0_11 = arith.constant 0 : index
    %30 = vector.load %arg1[%c2, %c0_10, %c0_11] : memref<3x16x128xf32, #tpu.memory_space<vmem>>, vector<1x16x128xf32>
    %31 = vector.shape_cast %30 : vector<1x16x128xf32> to vector<16x128xf32>
    %c1_i32_12 = arith.constant 1 : i32
    %32 = tpu.dynamic_rotate %27 by %c1_i32_12 dim 0 : vector<16x128xf32>, i32 -> vector<16x128xf32>
    %cst = arith.constant 0.000000e+00 : f32
    %33 = vector.shape_cast %23 : vector<16x1xi1> to vector<16x1xi1>
    %34 = vector.broadcast %33 : vector<16x1xi1> to vector<16x128xi1>
    %35 = vector.broadcast %cst : f32 to vector<16x128xf32>
    %36 = arith.select %34, %32, %35 : vector<16x128xi1>, vector<16x128xf32>
    %c15_i32_13 = arith.constant 15 : i32
    %37 = tpu.dynamic_rotate %27 by %c15_i32_13 dim 0 : vector<16x128xf32>, i32 -> vector<16x128xf32>
    %cst_14 = arith.constant 0.000000e+00 : f32
    %38 = vector.shape_cast %25 : vector<16x1xi1> to vector<16x1xi1>
    %39 = vector.broadcast %38 : vector<16x1xi1> to vector<16x128xi1>
    %40 = vector.broadcast %cst_14 : f32 to vector<16x128xf32>
    %41 = arith.select %39, %37, %40 : vector<16x128xi1>, vector<16x128xf32>
    %c1_i32_15 = arith.constant 1 : i32
    %42 = tpu.dynamic_rotate %29 by %c1_i32_15 dim 0 : vector<16x128xf32>, i32 -> vector<16x128xf32>
    %cst_16 = arith.constant 0.000000e+00 : f32
    %43 = vector.shape_cast %23 : vector<16x1xi1> to vector<16x1xi1>
    %44 = vector.broadcast %43 : vector<16x1xi1> to vector<16x128xi1>
    %45 = vector.broadcast %cst_16 : f32 to vector<16x128xf32>
    %46 = arith.select %44, %42, %45 : vector<16x128xi1>, vector<16x128xf32>
    %c15_i32_17 = arith.constant 15 : i32
    %47 = tpu.dynamic_rotate %29 by %c15_i32_17 dim 0 : vector<16x128xf32>, i32 -> vector<16x128xf32>
    %cst_18 = arith.constant 0.000000e+00 : f32
    %48 = vector.shape_cast %25 : vector<16x1xi1> to vector<16x1xi1>
    %49 = vector.broadcast %48 : vector<16x1xi1> to vector<16x128xi1>
    %50 = vector.broadcast %cst_18 : f32 to vector<16x128xf32>
    %51 = arith.select %49, %47, %50 : vector<16x128xi1>, vector<16x128xf32>
    %c1_i32_19 = arith.constant 1 : i32
    %52 = tpu.dynamic_rotate %31 by %c1_i32_19 dim 0 : vector<16x128xf32>, i32 -> vector<16x128xf32>
    %cst_20 = arith.constant 0.000000e+00 : f32
    %53 = vector.shape_cast %23 : vector<16x1xi1> to vector<16x1xi1>
    %54 = vector.broadcast %53 : vector<16x1xi1> to vector<16x128xi1>
    %55 = vector.broadcast %cst_20 : f32 to vector<16x128xf32>
    %56 = arith.select %54, %52, %55 : vector<16x128xi1>, vector<16x128xf32>
    %c15_i32_21 = arith.constant 15 : i32
    %57 = tpu.dynamic_rotate %31 by %c15_i32_21 dim 0 : vector<16x128xf32>, i32 -> vector<16x128xf32>
    %cst_22 = arith.constant 0.000000e+00 : f32
    %58 = vector.shape_cast %25 : vector<16x1xi1> to vector<16x1xi1>
    %59 = vector.broadcast %58 : vector<16x1xi1> to vector<16x128xi1>
    %60 = vector.broadcast %cst_22 : f32 to vector<16x128xf32>
    %61 = arith.select %59, %57, %60 : vector<16x128xi1>, vector<16x128xf32>
    %c0_23 = arith.constant 0 : index
    %62 = memref.load %arg2[%c0_23] : memref<81xf32, #tpu.memory_space<smem>>
    %63 = vector.broadcast %62 : f32 to vector<16x128xf32>
    %64 = arith.mulf %63, %36 : vector<16x128xf32>
    %c1_24 = arith.constant 1 : index
    %65 = memref.load %arg2[%c1_24] : memref<81xf32, #tpu.memory_space<smem>>
    %66 = vector.broadcast %65 : f32 to vector<16x128xf32>
    %67 = arith.mulf %66, %36 : vector<16x128xf32>
    %c2_25 = arith.constant 2 : index
    %68 = memref.load %arg2[%c2_25] : memref<81xf32, #tpu.memory_space<smem>>
    %69 = vector.broadcast %68 : f32 to vector<16x128xf32>
    %70 = arith.mulf %69, %36 : vector<16x128xf32>
    %c3 = arith.constant 3 : index
    %71 = memref.load %arg2[%c3] : memref<81xf32, #tpu.memory_space<smem>>
    %72 = vector.broadcast %71 : f32 to vector<16x128xf32>
    %73 = arith.mulf %72, %27 : vector<16x128xf32>
    %74 = arith.addf %64, %73 : vector<16x128xf32>
    %c4 = arith.constant 4 : index
    %75 = memref.load %arg2[%c4] : memref<81xf32, #tpu.memory_space<smem>>
    %76 = vector.broadcast %75 : f32 to vector<16x128xf32>
    %77 = arith.mulf %76, %27 : vector<16x128xf32>
    %78 = arith.addf %67, %77 : vector<16x128xf32>
    %c5 = arith.constant 5 : index
    %79 = memref.load %arg2[%c5] : memref<81xf32, #tpu.memory_space<smem>>
    %80 = vector.broadcast %79 : f32 to vector<16x128xf32>
    %81 = arith.mulf %80, %27 : vector<16x128xf32>
    %82 = arith.addf %70, %81 : vector<16x128xf32>
    %c6 = arith.constant 6 : index
    %83 = memref.load %arg2[%c6] : memref<81xf32, #tpu.memory_space<smem>>
    %84 = vector.broadcast %83 : f32 to vector<16x128xf32>
    %85 = arith.mulf %84, %41 : vector<16x128xf32>
    %86 = arith.addf %74, %85 : vector<16x128xf32>
    %c7 = arith.constant 7 : index
    %87 = memref.load %arg2[%c7] : memref<81xf32, #tpu.memory_space<smem>>
    %88 = vector.broadcast %87 : f32 to vector<16x128xf32>
    %89 = arith.mulf %88, %41 : vector<16x128xf32>
    %90 = arith.addf %78, %89 : vector<16x128xf32>
    %c8 = arith.constant 8 : index
    %91 = memref.load %arg2[%c8] : memref<81xf32, #tpu.memory_space<smem>>
    %92 = vector.broadcast %91 : f32 to vector<16x128xf32>
    %93 = arith.mulf %92, %41 : vector<16x128xf32>
    %94 = arith.addf %82, %93 : vector<16x128xf32>
    %c9 = arith.constant 9 : index
    %95 = memref.load %arg2[%c9] : memref<81xf32, #tpu.memory_space<smem>>
    %96 = vector.broadcast %95 : f32 to vector<16x128xf32>
    %97 = arith.mulf %96, %46 : vector<16x128xf32>
    %98 = arith.addf %86, %97 : vector<16x128xf32>
    %c10 = arith.constant 10 : index
    %99 = memref.load %arg2[%c10] : memref<81xf32, #tpu.memory_space<smem>>
    %100 = vector.broadcast %99 : f32 to vector<16x128xf32>
    %101 = arith.mulf %100, %46 : vector<16x128xf32>
    %102 = arith.addf %90, %101 : vector<16x128xf32>
    %c11 = arith.constant 11 : index
    %103 = memref.load %arg2[%c11] : memref<81xf32, #tpu.memory_space<smem>>
    %104 = vector.broadcast %103 : f32 to vector<16x128xf32>
    %105 = arith.mulf %104, %46 : vector<16x128xf32>
    %106 = arith.addf %94, %105 : vector<16x128xf32>
    %c12 = arith.constant 12 : index
    %107 = memref.load %arg2[%c12] : memref<81xf32, #tpu.memory_space<smem>>
    %108 = vector.broadcast %107 : f32 to vector<16x128xf32>
    %109 = arith.mulf %108, %29 : vector<16x128xf32>
    %110 = arith.addf %98, %109 : vector<16x128xf32>
    %c13 = arith.constant 13 : index
    %111 = memref.load %arg2[%c13] : memref<81xf32, #tpu.memory_space<smem>>
    %112 = vector.broadcast %111 : f32 to vector<16x128xf32>
    %113 = arith.mulf %112, %29 : vector<16x128xf32>
    %114 = arith.addf %102, %113 : vector<16x128xf32>
    %c14 = arith.constant 14 : index
    %115 = memref.load %arg2[%c14] : memref<81xf32, #tpu.memory_space<smem>>
    %116 = vector.broadcast %115 : f32 to vector<16x128xf32>
    %117 = arith.mulf %116, %29 : vector<16x128xf32>
    %118 = arith.addf %106, %117 : vector<16x128xf32>
    %c15 = arith.constant 15 : index
    %119 = memref.load %arg2[%c15] : memref<81xf32, #tpu.memory_space<smem>>
    %120 = vector.broadcast %119 : f32 to vector<16x128xf32>
    %121 = arith.mulf %120, %51 : vector<16x128xf32>
    %122 = arith.addf %110, %121 : vector<16x128xf32>
    %c16 = arith.constant 16 : index
    %123 = memref.load %arg2[%c16] : memref<81xf32, #tpu.memory_space<smem>>
    %124 = vector.broadcast %123 : f32 to vector<16x128xf32>
    %125 = arith.mulf %124, %51 : vector<16x128xf32>
    %126 = arith.addf %114, %125 : vector<16x128xf32>
    %c17 = arith.constant 17 : index
    %127 = memref.load %arg2[%c17] : memref<81xf32, #tpu.memory_space<smem>>
    %128 = vector.broadcast %127 : f32 to vector<16x128xf32>
    %129 = arith.mulf %128, %51 : vector<16x128xf32>
    %130 = arith.addf %118, %129 : vector<16x128xf32>
    %c18 = arith.constant 18 : index
    %131 = memref.load %arg2[%c18] : memref<81xf32, #tpu.memory_space<smem>>
    %132 = vector.broadcast %131 : f32 to vector<16x128xf32>
    %133 = arith.mulf %132, %56 : vector<16x128xf32>
    %134 = arith.addf %122, %133 : vector<16x128xf32>
    %c19 = arith.constant 19 : index
    %135 = memref.load %arg2[%c19] : memref<81xf32, #tpu.memory_space<smem>>
    %136 = vector.broadcast %135 : f32 to vector<16x128xf32>
    %137 = arith.mulf %136, %56 : vector<16x128xf32>
    %138 = arith.addf %126, %137 : vector<16x128xf32>
    %c20 = arith.constant 20 : index
    %139 = memref.load %arg2[%c20] : memref<81xf32, #tpu.memory_space<smem>>
    %140 = vector.broadcast %139 : f32 to vector<16x128xf32>
    %141 = arith.mulf %140, %56 : vector<16x128xf32>
    %142 = arith.addf %130, %141 : vector<16x128xf32>
    %c21 = arith.constant 21 : index
    %143 = memref.load %arg2[%c21] : memref<81xf32, #tpu.memory_space<smem>>
    %144 = vector.broadcast %143 : f32 to vector<16x128xf32>
    %145 = arith.mulf %144, %31 : vector<16x128xf32>
    %146 = arith.addf %134, %145 : vector<16x128xf32>
    %c22 = arith.constant 22 : index
    %147 = memref.load %arg2[%c22] : memref<81xf32, #tpu.memory_space<smem>>
    %148 = vector.broadcast %147 : f32 to vector<16x128xf32>
    %149 = arith.mulf %148, %31 : vector<16x128xf32>
    %150 = arith.addf %138, %149 : vector<16x128xf32>
    %c23 = arith.constant 23 : index
    %151 = memref.load %arg2[%c23] : memref<81xf32, #tpu.memory_space<smem>>
    %152 = vector.broadcast %151 : f32 to vector<16x128xf32>
    %153 = arith.mulf %152, %31 : vector<16x128xf32>
    %154 = arith.addf %142, %153 : vector<16x128xf32>
    %c24 = arith.constant 24 : index
    %155 = memref.load %arg2[%c24] : memref<81xf32, #tpu.memory_space<smem>>
    %156 = vector.broadcast %155 : f32 to vector<16x128xf32>
    %157 = arith.mulf %156, %61 : vector<16x128xf32>
    %158 = arith.addf %146, %157 : vector<16x128xf32>
    %c25 = arith.constant 25 : index
    %159 = memref.load %arg2[%c25] : memref<81xf32, #tpu.memory_space<smem>>
    %160 = vector.broadcast %159 : f32 to vector<16x128xf32>
    %161 = arith.mulf %160, %61 : vector<16x128xf32>
    %162 = arith.addf %150, %161 : vector<16x128xf32>
    %c26 = arith.constant 26 : index
    %163 = memref.load %arg2[%c26] : memref<81xf32, #tpu.memory_space<smem>>
    %164 = vector.broadcast %163 : f32 to vector<16x128xf32>
    %165 = arith.mulf %164, %61 : vector<16x128xf32>
    %166 = arith.addf %154, %165 : vector<16x128xf32>
    %c1_i32_26 = arith.constant 1 : i32
    %167 = tpu.dynamic_rotate %158 by %c1_i32_26 dim 1 : vector<16x128xf32>, i32 -> vector<16x128xf32>
    %cst_27 = arith.constant 0.000000e+00 : f32
    %168 = vector.shape_cast %19 : vector<1x128xi1> to vector<1x128xi1>
    %169 = vector.broadcast %168 : vector<1x128xi1> to vector<16x128xi1>
    %170 = vector.broadcast %cst_27 : f32 to vector<16x128xf32>
    %171 = arith.select %169, %167, %170 : vector<16x128xi1>, vector<16x128xf32>
    %172 = arith.addf %162, %171 : vector<16x128xf32>
    %c127_i32 = arith.constant 127 : i32
    %173 = tpu.dynamic_rotate %166 by %c127_i32 dim 1 : vector<16x128xf32>, i32 -> vector<16x128xf32>
    %cst_28 = arith.constant 0.000000e+00 : f32
    %174 = vector.shape_cast %21 : vector<1x128xi1> to vector<1x128xi1>
    %175 = vector.broadcast %174 : vector<1x128xi1> to vector<16x128xi1>
    %176 = vector.broadcast %cst_28 : f32 to vector<16x128xf32>
    %177 = arith.select %175, %173, %176 : vector<16x128xi1>, vector<16x128xf32>
    %178 = arith.addf %172, %177 : vector<16x128xf32>
    %c0_29 = arith.constant 0 : index
    %179 = memref.load %arg3[%c0_29] : memref<3xf32, #tpu.memory_space<smem>>
    %180 = vector.broadcast %179 : f32 to vector<16x128xf32>
    %181 = arith.addf %178, %180 : vector<16x128xf32>
    %cst_30 = arith.constant 0.000000e+00 : f32
    %182 = vector.broadcast %cst_30 : f32 to vector<16x128xf32>
    %183 = arith.maximumf %181, %182 : vector<16x128xf32>
    %c27 = arith.constant 27 : index
    %184 = memref.load %arg2[%c27] : memref<81xf32, #tpu.memory_space<smem>>
    %185 = vector.broadcast %184 : f32 to vector<16x128xf32>
    %186 = arith.mulf %185, %36 : vector<16x128xf32>
    %c28 = arith.constant 28 : index
    %187 = memref.load %arg2[%c28] : memref<81xf32, #tpu.memory_space<smem>>
    %188 = vector.broadcast %187 : f32 to vector<16x128xf32>
    %189 = arith.mulf %188, %36 : vector<16x128xf32>
    %c29 = arith.constant 29 : index
    %190 = memref.load %arg2[%c29] : memref<81xf32, #tpu.memory_space<smem>>
    %191 = vector.broadcast %190 : f32 to vector<16x128xf32>
    %192 = arith.mulf %191, %36 : vector<16x128xf32>
    %c30 = arith.constant 30 : index
    %193 = memref.load %arg2[%c30] : memref<81xf32, #tpu.memory_space<smem>>
    %194 = vector.broadcast %193 : f32 to vector<16x128xf32>
    %195 = arith.mulf %194, %27 : vector<16x128xf32>
    %196 = arith.addf %186, %195 : vector<16x128xf32>
    %c31 = arith.constant 31 : index
    %197 = memref.load %arg2[%c31] : memref<81xf32, #tpu.memory_space<smem>>
    %198 = vector.broadcast %197 : f32 to vector<16x128xf32>
    %199 = arith.mulf %198, %27 : vector<16x128xf32>
    %200 = arith.addf %189, %199 : vector<16x128xf32>
    %c32 = arith.constant 32 : index
    %201 = memref.load %arg2[%c32] : memref<81xf32, #tpu.memory_space<smem>>
    %202 = vector.broadcast %201 : f32 to vector<16x128xf32>
    %203 = arith.mulf %202, %27 : vector<16x128xf32>
    %204 = arith.addf %192, %203 : vector<16x128xf32>
    %c33 = arith.constant 33 : index
    %205 = memref.load %arg2[%c33] : memref<81xf32, #tpu.memory_space<smem>>
    %206 = vector.broadcast %205 : f32 to vector<16x128xf32>
    %207 = arith.mulf %206, %41 : vector<16x128xf32>
    %208 = arith.addf %196, %207 : vector<16x128xf32>
    %c34 = arith.constant 34 : index
    %209 = memref.load %arg2[%c34] : memref<81xf32, #tpu.memory_space<smem>>
    %210 = vector.broadcast %209 : f32 to vector<16x128xf32>
    %211 = arith.mulf %210, %41 : vector<16x128xf32>
    %212 = arith.addf %200, %211 : vector<16x128xf32>
    %c35 = arith.constant 35 : index
    %213 = memref.load %arg2[%c35] : memref<81xf32, #tpu.memory_space<smem>>
    %214 = vector.broadcast %213 : f32 to vector<16x128xf32>
    %215 = arith.mulf %214, %41 : vector<16x128xf32>
    %216 = arith.addf %204, %215 : vector<16x128xf32>
    %c36 = arith.constant 36 : index
    %217 = memref.load %arg2[%c36] : memref<81xf32, #tpu.memory_space<smem>>
    %218 = vector.broadcast %217 : f32 to vector<16x128xf32>
    %219 = arith.mulf %218, %46 : vector<16x128xf32>
    %220 = arith.addf %208, %219 : vector<16x128xf32>
    %c37 = arith.constant 37 : index
    %221 = memref.load %arg2[%c37] : memref<81xf32, #tpu.memory_space<smem>>
    %222 = vector.broadcast %221 : f32 to vector<16x128xf32>
    %223 = arith.mulf %222, %46 : vector<16x128xf32>
    %224 = arith.addf %212, %223 : vector<16x128xf32>
    %c38 = arith.constant 38 : index
    %225 = memref.load %arg2[%c38] : memref<81xf32, #tpu.memory_space<smem>>
    %226 = vector.broadcast %225 : f32 to vector<16x128xf32>
    %227 = arith.mulf %226, %46 : vector<16x128xf32>
    %228 = arith.addf %216, %227 : vector<16x128xf32>
    %c39 = arith.constant 39 : index
    %229 = memref.load %arg2[%c39] : memref<81xf32, #tpu.memory_space<smem>>
    %230 = vector.broadcast %229 : f32 to vector<16x128xf32>
    %231 = arith.mulf %230, %29 : vector<16x128xf32>
    %232 = arith.addf %220, %231 : vector<16x128xf32>
    %c40 = arith.constant 40 : index
    %233 = memref.load %arg2[%c40] : memref<81xf32, #tpu.memory_space<smem>>
    %234 = vector.broadcast %233 : f32 to vector<16x128xf32>
    %235 = arith.mulf %234, %29 : vector<16x128xf32>
    %236 = arith.addf %224, %235 : vector<16x128xf32>
    %c41 = arith.constant 41 : index
    %237 = memref.load %arg2[%c41] : memref<81xf32, #tpu.memory_space<smem>>
    %238 = vector.broadcast %237 : f32 to vector<16x128xf32>
    %239 = arith.mulf %238, %29 : vector<16x128xf32>
    %240 = arith.addf %228, %239 : vector<16x128xf32>
    %c42 = arith.constant 42 : index
    %241 = memref.load %arg2[%c42] : memref<81xf32, #tpu.memory_space<smem>>
    %242 = vector.broadcast %241 : f32 to vector<16x128xf32>
    %243 = arith.mulf %242, %51 : vector<16x128xf32>
    %244 = arith.addf %232, %243 : vector<16x128xf32>
    %c43 = arith.constant 43 : index
    %245 = memref.load %arg2[%c43] : memref<81xf32, #tpu.memory_space<smem>>
    %246 = vector.broadcast %245 : f32 to vector<16x128xf32>
    %247 = arith.mulf %246, %51 : vector<16x128xf32>
    %248 = arith.addf %236, %247 : vector<16x128xf32>
    %c44 = arith.constant 44 : index
    %249 = memref.load %arg2[%c44] : memref<81xf32, #tpu.memory_space<smem>>
    %250 = vector.broadcast %249 : f32 to vector<16x128xf32>
    %251 = arith.mulf %250, %51 : vector<16x128xf32>
    %252 = arith.addf %240, %251 : vector<16x128xf32>
    %c45 = arith.constant 45 : index
    %253 = memref.load %arg2[%c45] : memref<81xf32, #tpu.memory_space<smem>>
    %254 = vector.broadcast %253 : f32 to vector<16x128xf32>
    %255 = arith.mulf %254, %56 : vector<16x128xf32>
    %256 = arith.addf %244, %255 : vector<16x128xf32>
    %c46 = arith.constant 46 : index
    %257 = memref.load %arg2[%c46] : memref<81xf32, #tpu.memory_space<smem>>
    %258 = vector.broadcast %257 : f32 to vector<16x128xf32>
    %259 = arith.mulf %258, %56 : vector<16x128xf32>
    %260 = arith.addf %248, %259 : vector<16x128xf32>
    %c47 = arith.constant 47 : index
    %261 = memref.load %arg2[%c47] : memref<81xf32, #tpu.memory_space<smem>>
    %262 = vector.broadcast %261 : f32 to vector<16x128xf32>
    %263 = arith.mulf %262, %56 : vector<16x128xf32>
    %264 = arith.addf %252, %263 : vector<16x128xf32>
    %c48 = arith.constant 48 : index
    %265 = memref.load %arg2[%c48] : memref<81xf32, #tpu.memory_space<smem>>
    %266 = vector.broadcast %265 : f32 to vector<16x128xf32>
    %267 = arith.mulf %266, %31 : vector<16x128xf32>
    %268 = arith.addf %256, %267 : vector<16x128xf32>
    %c49 = arith.constant 49 : index
    %269 = memref.load %arg2[%c49] : memref<81xf32, #tpu.memory_space<smem>>
    %270 = vector.broadcast %269 : f32 to vector<16x128xf32>
    %271 = arith.mulf %270, %31 : vector<16x128xf32>
    %272 = arith.addf %260, %271 : vector<16x128xf32>
    %c50 = arith.constant 50 : index
    %273 = memref.load %arg2[%c50] : memref<81xf32, #tpu.memory_space<smem>>
    %274 = vector.broadcast %273 : f32 to vector<16x128xf32>
    %275 = arith.mulf %274, %31 : vector<16x128xf32>
    %276 = arith.addf %264, %275 : vector<16x128xf32>
    %c51 = arith.constant 51 : index
    %277 = memref.load %arg2[%c51] : memref<81xf32, #tpu.memory_space<smem>>
    %278 = vector.broadcast %277 : f32 to vector<16x128xf32>
    %279 = arith.mulf %278, %61 : vector<16x128xf32>
    %280 = arith.addf %268, %279 : vector<16x128xf32>
    %c52 = arith.constant 52 : index
    %281 = memref.load %arg2[%c52] : memref<81xf32, #tpu.memory_space<smem>>
    %282 = vector.broadcast %281 : f32 to vector<16x128xf32>
    %283 = arith.mulf %282, %61 : vector<16x128xf32>
    %284 = arith.addf %272, %283 : vector<16x128xf32>
    %c53 = arith.constant 53 : index
    %285 = memref.load %arg2[%c53] : memref<81xf32, #tpu.memory_space<smem>>
    %286 = vector.broadcast %285 : f32 to vector<16x128xf32>
    %287 = arith.mulf %286, %61 : vector<16x128xf32>
    %288 = arith.addf %276, %287 : vector<16x128xf32>
    %c1_i32_31 = arith.constant 1 : i32
    %289 = tpu.dynamic_rotate %280 by %c1_i32_31 dim 1 : vector<16x128xf32>, i32 -> vector<16x128xf32>
    %cst_32 = arith.constant 0.000000e+00 : f32
    %290 = vector.shape_cast %19 : vector<1x128xi1> to vector<1x128xi1>
    %291 = vector.broadcast %290 : vector<1x128xi1> to vector<16x128xi1>
    %292 = vector.broadcast %cst_32 : f32 to vector<16x128xf32>
    %293 = arith.select %291, %289, %292 : vector<16x128xi1>, vector<16x128xf32>
    %294 = arith.addf %284, %293 : vector<16x128xf32>
    %c127_i32_33 = arith.constant 127 : i32
    %295 = tpu.dynamic_rotate %288 by %c127_i32_33 dim 1 : vector<16x128xf32>, i32 -> vector<16x128xf32>
    %cst_34 = arith.constant 0.000000e+00 : f32
    %296 = vector.shape_cast %21 : vector<1x128xi1> to vector<1x128xi1>
    %297 = vector.broadcast %296 : vector<1x128xi1> to vector<16x128xi1>
    %298 = vector.broadcast %cst_34 : f32 to vector<16x128xf32>
    %299 = arith.select %297, %295, %298 : vector<16x128xi1>, vector<16x128xf32>
    %300 = arith.addf %294, %299 : vector<16x128xf32>
    %c1_35 = arith.constant 1 : index
    %301 = memref.load %arg3[%c1_35] : memref<3xf32, #tpu.memory_space<smem>>
    %302 = vector.broadcast %301 : f32 to vector<16x128xf32>
    %303 = arith.addf %300, %302 : vector<16x128xf32>
    %cst_36 = arith.constant 0.000000e+00 : f32
    %304 = vector.broadcast %cst_36 : f32 to vector<16x128xf32>
    %305 = arith.maximumf %303, %304 : vector<16x128xf32>
    %c54 = arith.constant 54 : index
    %306 = memref.load %arg2[%c54] : memref<81xf32, #tpu.memory_space<smem>>
    %307 = vector.broadcast %306 : f32 to vector<16x128xf32>
    %308 = arith.mulf %307, %36 : vector<16x128xf32>
    %c55 = arith.constant 55 : index
    %309 = memref.load %arg2[%c55] : memref<81xf32, #tpu.memory_space<smem>>
    %310 = vector.broadcast %309 : f32 to vector<16x128xf32>
    %311 = arith.mulf %310, %36 : vector<16x128xf32>
    %c56 = arith.constant 56 : index
    %312 = memref.load %arg2[%c56] : memref<81xf32, #tpu.memory_space<smem>>
    %313 = vector.broadcast %312 : f32 to vector<16x128xf32>
    %314 = arith.mulf %313, %36 : vector<16x128xf32>
    %c57 = arith.constant 57 : index
    %315 = memref.load %arg2[%c57] : memref<81xf32, #tpu.memory_space<smem>>
    %316 = vector.broadcast %315 : f32 to vector<16x128xf32>
    %317 = arith.mulf %316, %27 : vector<16x128xf32>
    %318 = arith.addf %308, %317 : vector<16x128xf32>
    %c58 = arith.constant 58 : index
    %319 = memref.load %arg2[%c58] : memref<81xf32, #tpu.memory_space<smem>>
    %320 = vector.broadcast %319 : f32 to vector<16x128xf32>
    %321 = arith.mulf %320, %27 : vector<16x128xf32>
    %322 = arith.addf %311, %321 : vector<16x128xf32>
    %c59 = arith.constant 59 : index
    %323 = memref.load %arg2[%c59] : memref<81xf32, #tpu.memory_space<smem>>
    %324 = vector.broadcast %323 : f32 to vector<16x128xf32>
    %325 = arith.mulf %324, %27 : vector<16x128xf32>
    %326 = arith.addf %314, %325 : vector<16x128xf32>
    %c60 = arith.constant 60 : index
    %327 = memref.load %arg2[%c60] : memref<81xf32, #tpu.memory_space<smem>>
    %328 = vector.broadcast %327 : f32 to vector<16x128xf32>
    %329 = arith.mulf %328, %41 : vector<16x128xf32>
    %330 = arith.addf %318, %329 : vector<16x128xf32>
    %c61 = arith.constant 61 : index
    %331 = memref.load %arg2[%c61] : memref<81xf32, #tpu.memory_space<smem>>
    %332 = vector.broadcast %331 : f32 to vector<16x128xf32>
    %333 = arith.mulf %332, %41 : vector<16x128xf32>
    %334 = arith.addf %322, %333 : vector<16x128xf32>
    %c62 = arith.constant 62 : index
    %335 = memref.load %arg2[%c62] : memref<81xf32, #tpu.memory_space<smem>>
    %336 = vector.broadcast %335 : f32 to vector<16x128xf32>
    %337 = arith.mulf %336, %41 : vector<16x128xf32>
    %338 = arith.addf %326, %337 : vector<16x128xf32>
    %c63 = arith.constant 63 : index
    %339 = memref.load %arg2[%c63] : memref<81xf32, #tpu.memory_space<smem>>
    %340 = vector.broadcast %339 : f32 to vector<16x128xf32>
    %341 = arith.mulf %340, %46 : vector<16x128xf32>
    %342 = arith.addf %330, %341 : vector<16x128xf32>
    %c64 = arith.constant 64 : index
    %343 = memref.load %arg2[%c64] : memref<81xf32, #tpu.memory_space<smem>>
    %344 = vector.broadcast %343 : f32 to vector<16x128xf32>
    %345 = arith.mulf %344, %46 : vector<16x128xf32>
    %346 = arith.addf %334, %345 : vector<16x128xf32>
    %c65 = arith.constant 65 : index
    %347 = memref.load %arg2[%c65] : memref<81xf32, #tpu.memory_space<smem>>
    %348 = vector.broadcast %347 : f32 to vector<16x128xf32>
    %349 = arith.mulf %348, %46 : vector<16x128xf32>
    %350 = arith.addf %338, %349 : vector<16x128xf32>
    %c66 = arith.constant 66 : index
    %351 = memref.load %arg2[%c66] : memref<81xf32, #tpu.memory_space<smem>>
    %352 = vector.broadcast %351 : f32 to vector<16x128xf32>
    %353 = arith.mulf %352, %29 : vector<16x128xf32>
    %354 = arith.addf %342, %353 : vector<16x128xf32>
    %c67 = arith.constant 67 : index
    %355 = memref.load %arg2[%c67] : memref<81xf32, #tpu.memory_space<smem>>
    %356 = vector.broadcast %355 : f32 to vector<16x128xf32>
    %357 = arith.mulf %356, %29 : vector<16x128xf32>
    %358 = arith.addf %346, %357 : vector<16x128xf32>
    %c68 = arith.constant 68 : index
    %359 = memref.load %arg2[%c68] : memref<81xf32, #tpu.memory_space<smem>>
    %360 = vector.broadcast %359 : f32 to vector<16x128xf32>
    %361 = arith.mulf %360, %29 : vector<16x128xf32>
    %362 = arith.addf %350, %361 : vector<16x128xf32>
    %c69 = arith.constant 69 : index
    %363 = memref.load %arg2[%c69] : memref<81xf32, #tpu.memory_space<smem>>
    %364 = vector.broadcast %363 : f32 to vector<16x128xf32>
    %365 = arith.mulf %364, %51 : vector<16x128xf32>
    %366 = arith.addf %354, %365 : vector<16x128xf32>
    %c70 = arith.constant 70 : index
    %367 = memref.load %arg2[%c70] : memref<81xf32, #tpu.memory_space<smem>>
    %368 = vector.broadcast %367 : f32 to vector<16x128xf32>
    %369 = arith.mulf %368, %51 : vector<16x128xf32>
    %370 = arith.addf %358, %369 : vector<16x128xf32>
    %c71 = arith.constant 71 : index
    %371 = memref.load %arg2[%c71] : memref<81xf32, #tpu.memory_space<smem>>
    %372 = vector.broadcast %371 : f32 to vector<16x128xf32>
    %373 = arith.mulf %372, %51 : vector<16x128xf32>
    %374 = arith.addf %362, %373 : vector<16x128xf32>
    %c72 = arith.constant 72 : index
    %375 = memref.load %arg2[%c72] : memref<81xf32, #tpu.memory_space<smem>>
    %376 = vector.broadcast %375 : f32 to vector<16x128xf32>
    %377 = arith.mulf %376, %56 : vector<16x128xf32>
    %378 = arith.addf %366, %377 : vector<16x128xf32>
    %c73 = arith.constant 73 : index
    %379 = memref.load %arg2[%c73] : memref<81xf32, #tpu.memory_space<smem>>
    %380 = vector.broadcast %379 : f32 to vector<16x128xf32>
    %381 = arith.mulf %380, %56 : vector<16x128xf32>
    %382 = arith.addf %370, %381 : vector<16x128xf32>
    %c74 = arith.constant 74 : index
    %383 = memref.load %arg2[%c74] : memref<81xf32, #tpu.memory_space<smem>>
    %384 = vector.broadcast %383 : f32 to vector<16x128xf32>
    %385 = arith.mulf %384, %56 : vector<16x128xf32>
    %386 = arith.addf %374, %385 : vector<16x128xf32>
    %c75 = arith.constant 75 : index
    %387 = memref.load %arg2[%c75] : memref<81xf32, #tpu.memory_space<smem>>
    %388 = vector.broadcast %387 : f32 to vector<16x128xf32>
    %389 = arith.mulf %388, %31 : vector<16x128xf32>
    %390 = arith.addf %378, %389 : vector<16x128xf32>
    %c76 = arith.constant 76 : index
    %391 = memref.load %arg2[%c76] : memref<81xf32, #tpu.memory_space<smem>>
    %392 = vector.broadcast %391 : f32 to vector<16x128xf32>
    %393 = arith.mulf %392, %31 : vector<16x128xf32>
    %394 = arith.addf %382, %393 : vector<16x128xf32>
    %c77 = arith.constant 77 : index
    %395 = memref.load %arg2[%c77] : memref<81xf32, #tpu.memory_space<smem>>
    %396 = vector.broadcast %395 : f32 to vector<16x128xf32>
    %397 = arith.mulf %396, %31 : vector<16x128xf32>
    %398 = arith.addf %386, %397 : vector<16x128xf32>
    %c78 = arith.constant 78 : index
    %399 = memref.load %arg2[%c78] : memref<81xf32, #tpu.memory_space<smem>>
    %400 = vector.broadcast %399 : f32 to vector<16x128xf32>
    %401 = arith.mulf %400, %61 : vector<16x128xf32>
    %402 = arith.addf %390, %401 : vector<16x128xf32>
    %c79 = arith.constant 79 : index
    %403 = memref.load %arg2[%c79] : memref<81xf32, #tpu.memory_space<smem>>
    %404 = vector.broadcast %403 : f32 to vector<16x128xf32>
    %405 = arith.mulf %404, %61 : vector<16x128xf32>
    %406 = arith.addf %394, %405 : vector<16x128xf32>
    %c80 = arith.constant 80 : index
    %407 = memref.load %arg2[%c80] : memref<81xf32, #tpu.memory_space<smem>>
    %408 = vector.broadcast %407 : f32 to vector<16x128xf32>
    %409 = arith.mulf %408, %61 : vector<16x128xf32>
    %410 = arith.addf %398, %409 : vector<16x128xf32>
    %c1_i32_37 = arith.constant 1 : i32
    %411 = tpu.dynamic_rotate %402 by %c1_i32_37 dim 1 : vector<16x128xf32>, i32 -> vector<16x128xf32>
    %cst_38 = arith.constant 0.000000e+00 : f32
    %412 = vector.shape_cast %19 : vector<1x128xi1> to vector<1x128xi1>
    %413 = vector.broadcast %412 : vector<1x128xi1> to vector<16x128xi1>
    %414 = vector.broadcast %cst_38 : f32 to vector<16x128xf32>
    %415 = arith.select %413, %411, %414 : vector<16x128xi1>, vector<16x128xf32>
    %416 = arith.addf %406, %415 : vector<16x128xf32>
    %c127_i32_39 = arith.constant 127 : i32
    %417 = tpu.dynamic_rotate %410 by %c127_i32_39 dim 1 : vector<16x128xf32>, i32 -> vector<16x128xf32>
    %cst_40 = arith.constant 0.000000e+00 : f32
    %418 = vector.shape_cast %21 : vector<1x128xi1> to vector<1x128xi1>
    %419 = vector.broadcast %418 : vector<1x128xi1> to vector<16x128xi1>
    %420 = vector.broadcast %cst_40 : f32 to vector<16x128xf32>
    %421 = arith.select %419, %417, %420 : vector<16x128xi1>, vector<16x128xf32>
    %422 = arith.addf %416, %421 : vector<16x128xf32>
    %c2_41 = arith.constant 2 : index
    %423 = memref.load %arg3[%c2_41] : memref<3xf32, #tpu.memory_space<smem>>
    %424 = vector.broadcast %423 : f32 to vector<16x128xf32>
    %425 = arith.addf %422, %424 : vector<16x128xf32>
    %cst_42 = arith.constant 0.000000e+00 : f32
    %426 = vector.broadcast %cst_42 : f32 to vector<16x128xf32>
    %427 = arith.maximumf %425, %426 : vector<16x128xf32>
    %c1_i32_43 = arith.constant 1 : i32
    %428 = tpu.dynamic_rotate %183 by %c1_i32_43 dim 0 : vector<16x128xf32>, i32 -> vector<16x128xf32>
    %cst_44 = arith.constant 0.000000e+00 : f32
    %429 = vector.shape_cast %23 : vector<16x1xi1> to vector<16x1xi1>
    %430 = vector.broadcast %429 : vector<16x1xi1> to vector<16x128xi1>
    %431 = vector.broadcast %cst_44 : f32 to vector<16x128xf32>
    %432 = arith.select %430, %428, %431 : vector<16x128xi1>, vector<16x128xf32>
    %c15_i32_45 = arith.constant 15 : i32
    %433 = tpu.dynamic_rotate %183 by %c15_i32_45 dim 0 : vector<16x128xf32>, i32 -> vector<16x128xf32>
    %cst_46 = arith.constant 0.000000e+00 : f32
    %434 = vector.shape_cast %25 : vector<16x1xi1> to vector<16x1xi1>
    %435 = vector.broadcast %434 : vector<16x1xi1> to vector<16x128xi1>
    %436 = vector.broadcast %cst_46 : f32 to vector<16x128xf32>
    %437 = arith.select %435, %433, %436 : vector<16x128xi1>, vector<16x128xf32>
    %c1_i32_47 = arith.constant 1 : i32
    %438 = tpu.dynamic_rotate %305 by %c1_i32_47 dim 0 : vector<16x128xf32>, i32 -> vector<16x128xf32>
    %cst_48 = arith.constant 0.000000e+00 : f32
    %439 = vector.shape_cast %23 : vector<16x1xi1> to vector<16x1xi1>
    %440 = vector.broadcast %439 : vector<16x1xi1> to vector<16x128xi1>
    %441 = vector.broadcast %cst_48 : f32 to vector<16x128xf32>
    %442 = arith.select %440, %438, %441 : vector<16x128xi1>, vector<16x128xf32>
    %c15_i32_49 = arith.constant 15 : i32
    %443 = tpu.dynamic_rotate %305 by %c15_i32_49 dim 0 : vector<16x128xf32>, i32 -> vector<16x128xf32>
    %cst_50 = arith.constant 0.000000e+00 : f32
    %444 = vector.shape_cast %25 : vector<16x1xi1> to vector<16x1xi1>
    %445 = vector.broadcast %444 : vector<16x1xi1> to vector<16x128xi1>
    %446 = vector.broadcast %cst_50 : f32 to vector<16x128xf32>
    %447 = arith.select %445, %443, %446 : vector<16x128xi1>, vector<16x128xf32>
    %c1_i32_51 = arith.constant 1 : i32
    %448 = tpu.dynamic_rotate %427 by %c1_i32_51 dim 0 : vector<16x128xf32>, i32 -> vector<16x128xf32>
    %cst_52 = arith.constant 0.000000e+00 : f32
    %449 = vector.shape_cast %23 : vector<16x1xi1> to vector<16x1xi1>
    %450 = vector.broadcast %449 : vector<16x1xi1> to vector<16x128xi1>
    %451 = vector.broadcast %cst_52 : f32 to vector<16x128xf32>
    %452 = arith.select %450, %448, %451 : vector<16x128xi1>, vector<16x128xf32>
    %c15_i32_53 = arith.constant 15 : i32
    %453 = tpu.dynamic_rotate %427 by %c15_i32_53 dim 0 : vector<16x128xf32>, i32 -> vector<16x128xf32>
    %cst_54 = arith.constant 0.000000e+00 : f32
    %454 = vector.shape_cast %25 : vector<16x1xi1> to vector<16x1xi1>
    %455 = vector.broadcast %454 : vector<16x1xi1> to vector<16x128xi1>
    %456 = vector.broadcast %cst_54 : f32 to vector<16x128xf32>
    %457 = arith.select %455, %453, %456 : vector<16x128xi1>, vector<16x128xf32>
    %c0_55 = arith.constant 0 : index
    %458 = memref.load %arg4[%c0_55] : memref<81xf32, #tpu.memory_space<smem>>
    %459 = vector.broadcast %458 : f32 to vector<16x128xf32>
    %460 = arith.mulf %459, %432 : vector<16x128xf32>
    %c1_56 = arith.constant 1 : index
    %461 = memref.load %arg4[%c1_56] : memref<81xf32, #tpu.memory_space<smem>>
    %462 = vector.broadcast %461 : f32 to vector<16x128xf32>
    %463 = arith.mulf %462, %432 : vector<16x128xf32>
    %c2_57 = arith.constant 2 : index
    %464 = memref.load %arg4[%c2_57] : memref<81xf32, #tpu.memory_space<smem>>
    %465 = vector.broadcast %464 : f32 to vector<16x128xf32>
    %466 = arith.mulf %465, %432 : vector<16x128xf32>
    %c3_58 = arith.constant 3 : index
    %467 = memref.load %arg4[%c3_58] : memref<81xf32, #tpu.memory_space<smem>>
    %468 = vector.broadcast %467 : f32 to vector<16x128xf32>
    %469 = arith.mulf %468, %183 : vector<16x128xf32>
    %470 = arith.addf %460, %469 : vector<16x128xf32>
    %c4_59 = arith.constant 4 : index
    %471 = memref.load %arg4[%c4_59] : memref<81xf32, #tpu.memory_space<smem>>
    %472 = vector.broadcast %471 : f32 to vector<16x128xf32>
    %473 = arith.mulf %472, %183 : vector<16x128xf32>
    %474 = arith.addf %463, %473 : vector<16x128xf32>
    %c5_60 = arith.constant 5 : index
    %475 = memref.load %arg4[%c5_60] : memref<81xf32, #tpu.memory_space<smem>>
    %476 = vector.broadcast %475 : f32 to vector<16x128xf32>
    %477 = arith.mulf %476, %183 : vector<16x128xf32>
    %478 = arith.addf %466, %477 : vector<16x128xf32>
    %c6_61 = arith.constant 6 : index
    %479 = memref.load %arg4[%c6_61] : memref<81xf32, #tpu.memory_space<smem>>
    %480 = vector.broadcast %479 : f32 to vector<16x128xf32>
    %481 = arith.mulf %480, %437 : vector<16x128xf32>
    %482 = arith.addf %470, %481 : vector<16x128xf32>
    %c7_62 = arith.constant 7 : index
    %483 = memref.load %arg4[%c7_62] : memref<81xf32, #tpu.memory_space<smem>>
    %484 = vector.broadcast %483 : f32 to vector<16x128xf32>
    %485 = arith.mulf %484, %437 : vector<16x128xf32>
    %486 = arith.addf %474, %485 : vector<16x128xf32>
    %c8_63 = arith.constant 8 : index
    %487 = memref.load %arg4[%c8_63] : memref<81xf32, #tpu.memory_space<smem>>
    %488 = vector.broadcast %487 : f32 to vector<16x128xf32>
    %489 = arith.mulf %488, %437 : vector<16x128xf32>
    %490 = arith.addf %478, %489 : vector<16x128xf32>
    %c9_64 = arith.constant 9 : index
    %491 = memref.load %arg4[%c9_64] : memref<81xf32, #tpu.memory_space<smem>>
    %492 = vector.broadcast %491 : f32 to vector<16x128xf32>
    %493 = arith.mulf %492, %442 : vector<16x128xf32>
    %494 = arith.addf %482, %493 : vector<16x128xf32>
    %c10_65 = arith.constant 10 : index
    %495 = memref.load %arg4[%c10_65] : memref<81xf32, #tpu.memory_space<smem>>
    %496 = vector.broadcast %495 : f32 to vector<16x128xf32>
    %497 = arith.mulf %496, %442 : vector<16x128xf32>
    %498 = arith.addf %486, %497 : vector<16x128xf32>
    %c11_66 = arith.constant 11 : index
    %499 = memref.load %arg4[%c11_66] : memref<81xf32, #tpu.memory_space<smem>>
    %500 = vector.broadcast %499 : f32 to vector<16x128xf32>
    %501 = arith.mulf %500, %442 : vector<16x128xf32>
    %502 = arith.addf %490, %501 : vector<16x128xf32>
    %c12_67 = arith.constant 12 : index
    %503 = memref.load %arg4[%c12_67] : memref<81xf32, #tpu.memory_space<smem>>
    %504 = vector.broadcast %503 : f32 to vector<16x128xf32>
    %505 = arith.mulf %504, %305 : vector<16x128xf32>
    %506 = arith.addf %494, %505 : vector<16x128xf32>
    %c13_68 = arith.constant 13 : index
    %507 = memref.load %arg4[%c13_68] : memref<81xf32, #tpu.memory_space<smem>>
    %508 = vector.broadcast %507 : f32 to vector<16x128xf32>
    %509 = arith.mulf %508, %305 : vector<16x128xf32>
    %510 = arith.addf %498, %509 : vector<16x128xf32>
    %c14_69 = arith.constant 14 : index
    %511 = memref.load %arg4[%c14_69] : memref<81xf32, #tpu.memory_space<smem>>
    %512 = vector.broadcast %511 : f32 to vector<16x128xf32>
    %513 = arith.mulf %512, %305 : vector<16x128xf32>
    %514 = arith.addf %502, %513 : vector<16x128xf32>
    %c15_70 = arith.constant 15 : index
    %515 = memref.load %arg4[%c15_70] : memref<81xf32, #tpu.memory_space<smem>>
    %516 = vector.broadcast %515 : f32 to vector<16x128xf32>
    %517 = arith.mulf %516, %447 : vector<16x128xf32>
    %518 = arith.addf %506, %517 : vector<16x128xf32>
    %c16_71 = arith.constant 16 : index
    %519 = memref.load %arg4[%c16_71] : memref<81xf32, #tpu.memory_space<smem>>
    %520 = vector.broadcast %519 : f32 to vector<16x128xf32>
    %521 = arith.mulf %520, %447 : vector<16x128xf32>
    %522 = arith.addf %510, %521 : vector<16x128xf32>
    %c17_72 = arith.constant 17 : index
    %523 = memref.load %arg4[%c17_72] : memref<81xf32, #tpu.memory_space<smem>>
    %524 = vector.broadcast %523 : f32 to vector<16x128xf32>
    %525 = arith.mulf %524, %447 : vector<16x128xf32>
    %526 = arith.addf %514, %525 : vector<16x128xf32>
    %c18_73 = arith.constant 18 : index
    %527 = memref.load %arg4[%c18_73] : memref<81xf32, #tpu.memory_space<smem>>
    %528 = vector.broadcast %527 : f32 to vector<16x128xf32>
    %529 = arith.mulf %528, %452 : vector<16x128xf32>
    %530 = arith.addf %518, %529 : vector<16x128xf32>
    %c19_74 = arith.constant 19 : index
    %531 = memref.load %arg4[%c19_74] : memref<81xf32, #tpu.memory_space<smem>>
    %532 = vector.broadcast %531 : f32 to vector<16x128xf32>
    %533 = arith.mulf %532, %452 : vector<16x128xf32>
    %534 = arith.addf %522, %533 : vector<16x128xf32>
    %c20_75 = arith.constant 20 : index
    %535 = memref.load %arg4[%c20_75] : memref<81xf32, #tpu.memory_space<smem>>
    %536 = vector.broadcast %535 : f32 to vector<16x128xf32>
    %537 = arith.mulf %536, %452 : vector<16x128xf32>
    %538 = arith.addf %526, %537 : vector<16x128xf32>
    %c21_76 = arith.constant 21 : index
    %539 = memref.load %arg4[%c21_76] : memref<81xf32, #tpu.memory_space<smem>>
    %540 = vector.broadcast %539 : f32 to vector<16x128xf32>
    %541 = arith.mulf %540, %427 : vector<16x128xf32>
    %542 = arith.addf %530, %541 : vector<16x128xf32>
    %c22_77 = arith.constant 22 : index
    %543 = memref.load %arg4[%c22_77] : memref<81xf32, #tpu.memory_space<smem>>
    %544 = vector.broadcast %543 : f32 to vector<16x128xf32>
    %545 = arith.mulf %544, %427 : vector<16x128xf32>
    %546 = arith.addf %534, %545 : vector<16x128xf32>
    %c23_78 = arith.constant 23 : index
    %547 = memref.load %arg4[%c23_78] : memref<81xf32, #tpu.memory_space<smem>>
    %548 = vector.broadcast %547 : f32 to vector<16x128xf32>
    %549 = arith.mulf %548, %427 : vector<16x128xf32>
    %550 = arith.addf %538, %549 : vector<16x128xf32>
    %c24_79 = arith.constant 24 : index
    %551 = memref.load %arg4[%c24_79] : memref<81xf32, #tpu.memory_space<smem>>
    %552 = vector.broadcast %551 : f32 to vector<16x128xf32>
    %553 = arith.mulf %552, %457 : vector<16x128xf32>
    %554 = arith.addf %542, %553 : vector<16x128xf32>
    %c25_80 = arith.constant 25 : index
    %555 = memref.load %arg4[%c25_80] : memref<81xf32, #tpu.memory_space<smem>>
    %556 = vector.broadcast %555 : f32 to vector<16x128xf32>
    %557 = arith.mulf %556, %457 : vector<16x128xf32>
    %558 = arith.addf %546, %557 : vector<16x128xf32>
    %c26_81 = arith.constant 26 : index
    %559 = memref.load %arg4[%c26_81] : memref<81xf32, #tpu.memory_space<smem>>
    %560 = vector.broadcast %559 : f32 to vector<16x128xf32>
    %561 = arith.mulf %560, %457 : vector<16x128xf32>
    %562 = arith.addf %550, %561 : vector<16x128xf32>
    %c1_i32_82 = arith.constant 1 : i32
    %563 = tpu.dynamic_rotate %554 by %c1_i32_82 dim 1 : vector<16x128xf32>, i32 -> vector<16x128xf32>
    %cst_83 = arith.constant 0.000000e+00 : f32
    %564 = vector.shape_cast %19 : vector<1x128xi1> to vector<1x128xi1>
    %565 = vector.broadcast %564 : vector<1x128xi1> to vector<16x128xi1>
    %566 = vector.broadcast %cst_83 : f32 to vector<16x128xf32>
    %567 = arith.select %565, %563, %566 : vector<16x128xi1>, vector<16x128xf32>
    %568 = arith.addf %558, %567 : vector<16x128xf32>
    %c127_i32_84 = arith.constant 127 : i32
    %569 = tpu.dynamic_rotate %562 by %c127_i32_84 dim 1 : vector<16x128xf32>, i32 -> vector<16x128xf32>
    %cst_85 = arith.constant 0.000000e+00 : f32
    %570 = vector.shape_cast %21 : vector<1x128xi1> to vector<1x128xi1>
    %571 = vector.broadcast %570 : vector<1x128xi1> to vector<16x128xi1>
    %572 = vector.broadcast %cst_85 : f32 to vector<16x128xf32>
    %573 = arith.select %571, %569, %572 : vector<16x128xi1>, vector<16x128xf32>
    %574 = arith.addf %568, %573 : vector<16x128xf32>
    %c0_86 = arith.constant 0 : index
    %575 = memref.load %arg5[%c0_86] : memref<3xf32, #tpu.memory_space<smem>>
    %576 = vector.broadcast %575 : f32 to vector<16x128xf32>
    %577 = arith.addf %574, %576 : vector<16x128xf32>
    %cst_87 = arith.constant 0.000000e+00 : f32
    %578 = vector.broadcast %cst_87 : f32 to vector<16x128xf32>
    %579 = arith.maximumf %577, %578 : vector<16x128xf32>
    %c27_88 = arith.constant 27 : index
    %580 = memref.load %arg4[%c27_88] : memref<81xf32, #tpu.memory_space<smem>>
    %581 = vector.broadcast %580 : f32 to vector<16x128xf32>
    %582 = arith.mulf %581, %432 : vector<16x128xf32>
    %c28_89 = arith.constant 28 : index
    %583 = memref.load %arg4[%c28_89] : memref<81xf32, #tpu.memory_space<smem>>
    %584 = vector.broadcast %583 : f32 to vector<16x128xf32>
    %585 = arith.mulf %584, %432 : vector<16x128xf32>
    %c29_90 = arith.constant 29 : index
    %586 = memref.load %arg4[%c29_90] : memref<81xf32, #tpu.memory_space<smem>>
    %587 = vector.broadcast %586 : f32 to vector<16x128xf32>
    %588 = arith.mulf %587, %432 : vector<16x128xf32>
    %c30_91 = arith.constant 30 : index
    %589 = memref.load %arg4[%c30_91] : memref<81xf32, #tpu.memory_space<smem>>
    %590 = vector.broadcast %589 : f32 to vector<16x128xf32>
    %591 = arith.mulf %590, %183 : vector<16x128xf32>
    %592 = arith.addf %582, %591 : vector<16x128xf32>
    %c31_92 = arith.constant 31 : index
    %593 = memref.load %arg4[%c31_92] : memref<81xf32, #tpu.memory_space<smem>>
    %594 = vector.broadcast %593 : f32 to vector<16x128xf32>
    %595 = arith.mulf %594, %183 : vector<16x128xf32>
    %596 = arith.addf %585, %595 : vector<16x128xf32>
    %c32_93 = arith.constant 32 : index
    %597 = memref.load %arg4[%c32_93] : memref<81xf32, #tpu.memory_space<smem>>
    %598 = vector.broadcast %597 : f32 to vector<16x128xf32>
    %599 = arith.mulf %598, %183 : vector<16x128xf32>
    %600 = arith.addf %588, %599 : vector<16x128xf32>
    %c33_94 = arith.constant 33 : index
    %601 = memref.load %arg4[%c33_94] : memref<81xf32, #tpu.memory_space<smem>>
    %602 = vector.broadcast %601 : f32 to vector<16x128xf32>
    %603 = arith.mulf %602, %437 : vector<16x128xf32>
    %604 = arith.addf %592, %603 : vector<16x128xf32>
    %c34_95 = arith.constant 34 : index
    %605 = memref.load %arg4[%c34_95] : memref<81xf32, #tpu.memory_space<smem>>
    %606 = vector.broadcast %605 : f32 to vector<16x128xf32>
    %607 = arith.mulf %606, %437 : vector<16x128xf32>
    %608 = arith.addf %596, %607 : vector<16x128xf32>
    %c35_96 = arith.constant 35 : index
    %609 = memref.load %arg4[%c35_96] : memref<81xf32, #tpu.memory_space<smem>>
    %610 = vector.broadcast %609 : f32 to vector<16x128xf32>
    %611 = arith.mulf %610, %437 : vector<16x128xf32>
    %612 = arith.addf %600, %611 : vector<16x128xf32>
    %c36_97 = arith.constant 36 : index
    %613 = memref.load %arg4[%c36_97] : memref<81xf32, #tpu.memory_space<smem>>
    %614 = vector.broadcast %613 : f32 to vector<16x128xf32>
    %615 = arith.mulf %614, %442 : vector<16x128xf32>
    %616 = arith.addf %604, %615 : vector<16x128xf32>
    %c37_98 = arith.constant 37 : index
    %617 = memref.load %arg4[%c37_98] : memref<81xf32, #tpu.memory_space<smem>>
    %618 = vector.broadcast %617 : f32 to vector<16x128xf32>
    %619 = arith.mulf %618, %442 : vector<16x128xf32>
    %620 = arith.addf %608, %619 : vector<16x128xf32>
    %c38_99 = arith.constant 38 : index
    %621 = memref.load %arg4[%c38_99] : memref<81xf32, #tpu.memory_space<smem>>
    %622 = vector.broadcast %621 : f32 to vector<16x128xf32>
    %623 = arith.mulf %622, %442 : vector<16x128xf32>
    %624 = arith.addf %612, %623 : vector<16x128xf32>
    %c39_100 = arith.constant 39 : index
    %625 = memref.load %arg4[%c39_100] : memref<81xf32, #tpu.memory_space<smem>>
    %626 = vector.broadcast %625 : f32 to vector<16x128xf32>
    %627 = arith.mulf %626, %305 : vector<16x128xf32>
    %628 = arith.addf %616, %627 : vector<16x128xf32>
    %c40_101 = arith.constant 40 : index
    %629 = memref.load %arg4[%c40_101] : memref<81xf32, #tpu.memory_space<smem>>
    %630 = vector.broadcast %629 : f32 to vector<16x128xf32>
    %631 = arith.mulf %630, %305 : vector<16x128xf32>
    %632 = arith.addf %620, %631 : vector<16x128xf32>
    %c41_102 = arith.constant 41 : index
    %633 = memref.load %arg4[%c41_102] : memref<81xf32, #tpu.memory_space<smem>>
    %634 = vector.broadcast %633 : f32 to vector<16x128xf32>
    %635 = arith.mulf %634, %305 : vector<16x128xf32>
    %636 = arith.addf %624, %635 : vector<16x128xf32>
    %c42_103 = arith.constant 42 : index
    %637 = memref.load %arg4[%c42_103] : memref<81xf32, #tpu.memory_space<smem>>
    %638 = vector.broadcast %637 : f32 to vector<16x128xf32>
    %639 = arith.mulf %638, %447 : vector<16x128xf32>
    %640 = arith.addf %628, %639 : vector<16x128xf32>
    %c43_104 = arith.constant 43 : index
    %641 = memref.load %arg4[%c43_104] : memref<81xf32, #tpu.memory_space<smem>>
    %642 = vector.broadcast %641 : f32 to vector<16x128xf32>
    %643 = arith.mulf %642, %447 : vector<16x128xf32>
    %644 = arith.addf %632, %643 : vector<16x128xf32>
    %c44_105 = arith.constant 44 : index
    %645 = memref.load %arg4[%c44_105] : memref<81xf32, #tpu.memory_space<smem>>
    %646 = vector.broadcast %645 : f32 to vector<16x128xf32>
    %647 = arith.mulf %646, %447 : vector<16x128xf32>
    %648 = arith.addf %636, %647 : vector<16x128xf32>
    %c45_106 = arith.constant 45 : index
    %649 = memref.load %arg4[%c45_106] : memref<81xf32, #tpu.memory_space<smem>>
    %650 = vector.broadcast %649 : f32 to vector<16x128xf32>
    %651 = arith.mulf %650, %452 : vector<16x128xf32>
    %652 = arith.addf %640, %651 : vector<16x128xf32>
    %c46_107 = arith.constant 46 : index
    %653 = memref.load %arg4[%c46_107] : memref<81xf32, #tpu.memory_space<smem>>
    %654 = vector.broadcast %653 : f32 to vector<16x128xf32>
    %655 = arith.mulf %654, %452 : vector<16x128xf32>
    %656 = arith.addf %644, %655 : vector<16x128xf32>
    %c47_108 = arith.constant 47 : index
    %657 = memref.load %arg4[%c47_108] : memref<81xf32, #tpu.memory_space<smem>>
    %658 = vector.broadcast %657 : f32 to vector<16x128xf32>
    %659 = arith.mulf %658, %452 : vector<16x128xf32>
    %660 = arith.addf %648, %659 : vector<16x128xf32>
    %c48_109 = arith.constant 48 : index
    %661 = memref.load %arg4[%c48_109] : memref<81xf32, #tpu.memory_space<smem>>
    %662 = vector.broadcast %661 : f32 to vector<16x128xf32>
    %663 = arith.mulf %662, %427 : vector<16x128xf32>
    %664 = arith.addf %652, %663 : vector<16x128xf32>
    %c49_110 = arith.constant 49 : index
    %665 = memref.load %arg4[%c49_110] : memref<81xf32, #tpu.memory_space<smem>>
    %666 = vector.broadcast %665 : f32 to vector<16x128xf32>
    %667 = arith.mulf %666, %427 : vector<16x128xf32>
    %668 = arith.addf %656, %667 : vector<16x128xf32>
    %c50_111 = arith.constant 50 : index
    %669 = memref.load %arg4[%c50_111] : memref<81xf32, #tpu.memory_space<smem>>
    %670 = vector.broadcast %669 : f32 to vector<16x128xf32>
    %671 = arith.mulf %670, %427 : vector<16x128xf32>
    %672 = arith.addf %660, %671 : vector<16x128xf32>
    %c51_112 = arith.constant 51 : index
    %673 = memref.load %arg4[%c51_112] : memref<81xf32, #tpu.memory_space<smem>>
    %674 = vector.broadcast %673 : f32 to vector<16x128xf32>
    %675 = arith.mulf %674, %457 : vector<16x128xf32>
    %676 = arith.addf %664, %675 : vector<16x128xf32>
    %c52_113 = arith.constant 52 : index
    %677 = memref.load %arg4[%c52_113] : memref<81xf32, #tpu.memory_space<smem>>
    %678 = vector.broadcast %677 : f32 to vector<16x128xf32>
    %679 = arith.mulf %678, %457 : vector<16x128xf32>
    %680 = arith.addf %668, %679 : vector<16x128xf32>
    %c53_114 = arith.constant 53 : index
    %681 = memref.load %arg4[%c53_114] : memref<81xf32, #tpu.memory_space<smem>>
    %682 = vector.broadcast %681 : f32 to vector<16x128xf32>
    %683 = arith.mulf %682, %457 : vector<16x128xf32>
    %684 = arith.addf %672, %683 : vector<16x128xf32>
    %c1_i32_115 = arith.constant 1 : i32
    %685 = tpu.dynamic_rotate %676 by %c1_i32_115 dim 1 : vector<16x128xf32>, i32 -> vector<16x128xf32>
    %cst_116 = arith.constant 0.000000e+00 : f32
    %686 = vector.shape_cast %19 : vector<1x128xi1> to vector<1x128xi1>
    %687 = vector.broadcast %686 : vector<1x128xi1> to vector<16x128xi1>
    %688 = vector.broadcast %cst_116 : f32 to vector<16x128xf32>
    %689 = arith.select %687, %685, %688 : vector<16x128xi1>, vector<16x128xf32>
    %690 = arith.addf %680, %689 : vector<16x128xf32>
    %c127_i32_117 = arith.constant 127 : i32
    %691 = tpu.dynamic_rotate %684 by %c127_i32_117 dim 1 : vector<16x128xf32>, i32 -> vector<16x128xf32>
    %cst_118 = arith.constant 0.000000e+00 : f32
    %692 = vector.shape_cast %21 : vector<1x128xi1> to vector<1x128xi1>
    %693 = vector.broadcast %692 : vector<1x128xi1> to vector<16x128xi1>
    %694 = vector.broadcast %cst_118 : f32 to vector<16x128xf32>
    %695 = arith.select %693, %691, %694 : vector<16x128xi1>, vector<16x128xf32>
    %696 = arith.addf %690, %695 : vector<16x128xf32>
    %c1_119 = arith.constant 1 : index
    %697 = memref.load %arg5[%c1_119] : memref<3xf32, #tpu.memory_space<smem>>
    %698 = vector.broadcast %697 : f32 to vector<16x128xf32>
    %699 = arith.addf %696, %698 : vector<16x128xf32>
    %cst_120 = arith.constant 0.000000e+00 : f32
    %700 = vector.broadcast %cst_120 : f32 to vector<16x128xf32>
    %701 = arith.maximumf %699, %700 : vector<16x128xf32>
    %c54_121 = arith.constant 54 : index
    %702 = memref.load %arg4[%c54_121] : memref<81xf32, #tpu.memory_space<smem>>
    %703 = vector.broadcast %702 : f32 to vector<16x128xf32>
    %704 = arith.mulf %703, %432 : vector<16x128xf32>
    %c55_122 = arith.constant 55 : index
    %705 = memref.load %arg4[%c55_122] : memref<81xf32, #tpu.memory_space<smem>>
    %706 = vector.broadcast %705 : f32 to vector<16x128xf32>
    %707 = arith.mulf %706, %432 : vector<16x128xf32>
    %c56_123 = arith.constant 56 : index
    %708 = memref.load %arg4[%c56_123] : memref<81xf32, #tpu.memory_space<smem>>
    %709 = vector.broadcast %708 : f32 to vector<16x128xf32>
    %710 = arith.mulf %709, %432 : vector<16x128xf32>
    %c57_124 = arith.constant 57 : index
    %711 = memref.load %arg4[%c57_124] : memref<81xf32, #tpu.memory_space<smem>>
    %712 = vector.broadcast %711 : f32 to vector<16x128xf32>
    %713 = arith.mulf %712, %183 : vector<16x128xf32>
    %714 = arith.addf %704, %713 : vector<16x128xf32>
    %c58_125 = arith.constant 58 : index
    %715 = memref.load %arg4[%c58_125] : memref<81xf32, #tpu.memory_space<smem>>
    %716 = vector.broadcast %715 : f32 to vector<16x128xf32>
    %717 = arith.mulf %716, %183 : vector<16x128xf32>
    %718 = arith.addf %707, %717 : vector<16x128xf32>
    %c59_126 = arith.constant 59 : index
    %719 = memref.load %arg4[%c59_126] : memref<81xf32, #tpu.memory_space<smem>>
    %720 = vector.broadcast %719 : f32 to vector<16x128xf32>
    %721 = arith.mulf %720, %183 : vector<16x128xf32>
    %722 = arith.addf %710, %721 : vector<16x128xf32>
    %c60_127 = arith.constant 60 : index
    %723 = memref.load %arg4[%c60_127] : memref<81xf32, #tpu.memory_space<smem>>
    %724 = vector.broadcast %723 : f32 to vector<16x128xf32>
    %725 = arith.mulf %724, %437 : vector<16x128xf32>
    %726 = arith.addf %714, %725 : vector<16x128xf32>
    %c61_128 = arith.constant 61 : index
    %727 = memref.load %arg4[%c61_128] : memref<81xf32, #tpu.memory_space<smem>>
    %728 = vector.broadcast %727 : f32 to vector<16x128xf32>
    %729 = arith.mulf %728, %437 : vector<16x128xf32>
    %730 = arith.addf %718, %729 : vector<16x128xf32>
    %c62_129 = arith.constant 62 : index
    %731 = memref.load %arg4[%c62_129] : memref<81xf32, #tpu.memory_space<smem>>
    %732 = vector.broadcast %731 : f32 to vector<16x128xf32>
    %733 = arith.mulf %732, %437 : vector<16x128xf32>
    %734 = arith.addf %722, %733 : vector<16x128xf32>
    %c63_130 = arith.constant 63 : index
    %735 = memref.load %arg4[%c63_130] : memref<81xf32, #tpu.memory_space<smem>>
    %736 = vector.broadcast %735 : f32 to vector<16x128xf32>
    %737 = arith.mulf %736, %442 : vector<16x128xf32>
    %738 = arith.addf %726, %737 : vector<16x128xf32>
    %c64_131 = arith.constant 64 : index
    %739 = memref.load %arg4[%c64_131] : memref<81xf32, #tpu.memory_space<smem>>
    %740 = vector.broadcast %739 : f32 to vector<16x128xf32>
    %741 = arith.mulf %740, %442 : vector<16x128xf32>
    %742 = arith.addf %730, %741 : vector<16x128xf32>
    %c65_132 = arith.constant 65 : index
    %743 = memref.load %arg4[%c65_132] : memref<81xf32, #tpu.memory_space<smem>>
    %744 = vector.broadcast %743 : f32 to vector<16x128xf32>
    %745 = arith.mulf %744, %442 : vector<16x128xf32>
    %746 = arith.addf %734, %745 : vector<16x128xf32>
    %c66_133 = arith.constant 66 : index
    %747 = memref.load %arg4[%c66_133] : memref<81xf32, #tpu.memory_space<smem>>
    %748 = vector.broadcast %747 : f32 to vector<16x128xf32>
    %749 = arith.mulf %748, %305 : vector<16x128xf32>
    %750 = arith.addf %738, %749 : vector<16x128xf32>
    %c67_134 = arith.constant 67 : index
    %751 = memref.load %arg4[%c67_134] : memref<81xf32, #tpu.memory_space<smem>>
    %752 = vector.broadcast %751 : f32 to vector<16x128xf32>
    %753 = arith.mulf %752, %305 : vector<16x128xf32>
    %754 = arith.addf %742, %753 : vector<16x128xf32>
    %c68_135 = arith.constant 68 : index
    %755 = memref.load %arg4[%c68_135] : memref<81xf32, #tpu.memory_space<smem>>
    %756 = vector.broadcast %755 : f32 to vector<16x128xf32>
    %757 = arith.mulf %756, %305 : vector<16x128xf32>
    %758 = arith.addf %746, %757 : vector<16x128xf32>
    %c69_136 = arith.constant 69 : index
    %759 = memref.load %arg4[%c69_136] : memref<81xf32, #tpu.memory_space<smem>>
    %760 = vector.broadcast %759 : f32 to vector<16x128xf32>
    %761 = arith.mulf %760, %447 : vector<16x128xf32>
    %762 = arith.addf %750, %761 : vector<16x128xf32>
    %c70_137 = arith.constant 70 : index
    %763 = memref.load %arg4[%c70_137] : memref<81xf32, #tpu.memory_space<smem>>
    %764 = vector.broadcast %763 : f32 to vector<16x128xf32>
    %765 = arith.mulf %764, %447 : vector<16x128xf32>
    %766 = arith.addf %754, %765 : vector<16x128xf32>
    %c71_138 = arith.constant 71 : index
    %767 = memref.load %arg4[%c71_138] : memref<81xf32, #tpu.memory_space<smem>>
    %768 = vector.broadcast %767 : f32 to vector<16x128xf32>
    %769 = arith.mulf %768, %447 : vector<16x128xf32>
    %770 = arith.addf %758, %769 : vector<16x128xf32>
    %c72_139 = arith.constant 72 : index
    %771 = memref.load %arg4[%c72_139] : memref<81xf32, #tpu.memory_space<smem>>
    %772 = vector.broadcast %771 : f32 to vector<16x128xf32>
    %773 = arith.mulf %772, %452 : vector<16x128xf32>
    %774 = arith.addf %762, %773 : vector<16x128xf32>
    %c73_140 = arith.constant 73 : index
    %775 = memref.load %arg4[%c73_140] : memref<81xf32, #tpu.memory_space<smem>>
    %776 = vector.broadcast %775 : f32 to vector<16x128xf32>
    %777 = arith.mulf %776, %452 : vector<16x128xf32>
    %778 = arith.addf %766, %777 : vector<16x128xf32>
    %c74_141 = arith.constant 74 : index
    %779 = memref.load %arg4[%c74_141] : memref<81xf32, #tpu.memory_space<smem>>
    %780 = vector.broadcast %779 : f32 to vector<16x128xf32>
    %781 = arith.mulf %780, %452 : vector<16x128xf32>
    %782 = arith.addf %770, %781 : vector<16x128xf32>
    %c75_142 = arith.constant 75 : index
    %783 = memref.load %arg4[%c75_142] : memref<81xf32, #tpu.memory_space<smem>>
    %784 = vector.broadcast %783 : f32 to vector<16x128xf32>
    %785 = arith.mulf %784, %427 : vector<16x128xf32>
    %786 = arith.addf %774, %785 : vector<16x128xf32>
    %c76_143 = arith.constant 76 : index
    %787 = memref.load %arg4[%c76_143] : memref<81xf32, #tpu.memory_space<smem>>
    %788 = vector.broadcast %787 : f32 to vector<16x128xf32>
    %789 = arith.mulf %788, %427 : vector<16x128xf32>
    %790 = arith.addf %778, %789 : vector<16x128xf32>
    %c77_144 = arith.constant 77 : index
    %791 = memref.load %arg4[%c77_144] : memref<81xf32, #tpu.memory_space<smem>>
    %792 = vector.broadcast %791 : f32 to vector<16x128xf32>
    %793 = arith.mulf %792, %427 : vector<16x128xf32>
    %794 = arith.addf %782, %793 : vector<16x128xf32>
    %c78_145 = arith.constant 78 : index
    %795 = memref.load %arg4[%c78_145] : memref<81xf32, #tpu.memory_space<smem>>
    %796 = vector.broadcast %795 : f32 to vector<16x128xf32>
    %797 = arith.mulf %796, %457 : vector<16x128xf32>
    %798 = arith.addf %786, %797 : vector<16x128xf32>
    %c79_146 = arith.constant 79 : index
    %799 = memref.load %arg4[%c79_146] : memref<81xf32, #tpu.memory_space<smem>>
    %800 = vector.broadcast %799 : f32 to vector<16x128xf32>
    %801 = arith.mulf %800, %457 : vector<16x128xf32>
    %802 = arith.addf %790, %801 : vector<16x128xf32>
    %c80_147 = arith.constant 80 : index
    %803 = memref.load %arg4[%c80_147] : memref<81xf32, #tpu.memory_space<smem>>
    %804 = vector.broadcast %803 : f32 to vector<16x128xf32>
    %805 = arith.mulf %804, %457 : vector<16x128xf32>
    %806 = arith.addf %794, %805 : vector<16x128xf32>
    %c1_i32_148 = arith.constant 1 : i32
    %807 = tpu.dynamic_rotate %798 by %c1_i32_148 dim 1 : vector<16x128xf32>, i32 -> vector<16x128xf32>
    %cst_149 = arith.constant 0.000000e+00 : f32
    %808 = vector.shape_cast %19 : vector<1x128xi1> to vector<1x128xi1>
    %809 = vector.broadcast %808 : vector<1x128xi1> to vector<16x128xi1>
    %810 = vector.broadcast %cst_149 : f32 to vector<16x128xf32>
    %811 = arith.select %809, %807, %810 : vector<16x128xi1>, vector<16x128xf32>
    %812 = arith.addf %802, %811 : vector<16x128xf32>
    %c127_i32_150 = arith.constant 127 : i32
    %813 = tpu.dynamic_rotate %806 by %c127_i32_150 dim 1 : vector<16x128xf32>, i32 -> vector<16x128xf32>
    %cst_151 = arith.constant 0.000000e+00 : f32
    %814 = vector.shape_cast %21 : vector<1x128xi1> to vector<1x128xi1>
    %815 = vector.broadcast %814 : vector<1x128xi1> to vector<16x128xi1>
    %816 = vector.broadcast %cst_151 : f32 to vector<16x128xf32>
    %817 = arith.select %815, %813, %816 : vector<16x128xi1>, vector<16x128xf32>
    %818 = arith.addf %812, %817 : vector<16x128xf32>
    %c2_152 = arith.constant 2 : index
    %819 = memref.load %arg5[%c2_152] : memref<3xf32, #tpu.memory_space<smem>>
    %820 = vector.broadcast %819 : f32 to vector<16x128xf32>
    %821 = arith.addf %818, %820 : vector<16x128xf32>
    %cst_153 = arith.constant 0.000000e+00 : f32
    %822 = vector.broadcast %cst_153 : f32 to vector<16x128xf32>
    %823 = arith.maximumf %821, %822 : vector<16x128xf32>
    %824 = arith.addf %579, %27 : vector<16x128xf32>
    %c0_154 = arith.constant 0 : index
    %c0_155 = arith.constant 0 : index
    %c0_156 = arith.constant 0 : index
    %825 = vector.load %arg6[%c0_154, %c0_155, %c0_156] : memref<3x16x128xf32, #tpu.memory_space<vmem>>, vector<1x16x128xf32>
    %826 = vector.shape_cast %825 : vector<1x16x128xf32> to vector<16x128xf32>
    %827 = vector.shape_cast %824 : vector<16x128xf32> to vector<1x16x128xf32>
    tpu.vector_store %arg6[%c0_154, %c0_155, %c0_156], %827 {strides = array<i32>} : memref<3x16x128xf32, #tpu.memory_space<vmem>>, vector<1x16x128xf32>,
    %828 = arith.addf %701, %29 : vector<16x128xf32>
    %c1_157 = arith.constant 1 : index
    %c0_158 = arith.constant 0 : index
    %c0_159 = arith.constant 0 : index
    %829 = vector.load %arg6[%c1_157, %c0_158, %c0_159] : memref<3x16x128xf32, #tpu.memory_space<vmem>>, vector<1x16x128xf32>
    %830 = vector.shape_cast %829 : vector<1x16x128xf32> to vector<16x128xf32>
    %831 = vector.shape_cast %828 : vector<16x128xf32> to vector<1x16x128xf32>
    tpu.vector_store %arg6[%c1_157, %c0_158, %c0_159], %831 {strides = array<i32>} : memref<3x16x128xf32, #tpu.memory_space<vmem>>, vector<1x16x128xf32>,
    %832 = arith.addf %823, %31 : vector<16x128xf32>
    %c2_160 = arith.constant 2 : index
    %c0_161 = arith.constant 0 : index
    %c0_162 = arith.constant 0 : index
    %833 = vector.load %arg6[%c2_160, %c0_161, %c0_162] : memref<3x16x128xf32, #tpu.memory_space<vmem>>, vector<1x16x128xf32>
    %834 = vector.shape_cast %833 : vector<1x16x128xf32> to vector<16x128xf32>
    %835 = vector.shape_cast %832 : vector<16x128xf32> to vector<1x16x128xf32>
    tpu.vector_store %arg6[%c2_160, %c0_161, %c0_162], %835 {strides = array<i32>} : memref<3x16x128xf32, #tpu.memory_space<vmem>>, vector<1x16x128xf32>,
    return
  }
  func.func @transform_0(%arg0: i32) -> (i32, i32, i32) {
    %c0_i32 = arith.constant 0 : i32
    %c0_i32_0 = arith.constant 0 : i32
    %c0_i32_1 = arith.constant 0 : i32
    return %c0_i32, %c0_i32_0, %arg0 : i32, i32, i32
  }
  func.func @transform_1(%arg0: i32) -> i32 {
    %c0_i32 = arith.constant 0 : i32
    %c0_i32_0 = arith.constant 0 : i32
    return %c0_i32 : i32
  }
  func.func @transform_2(%arg0: i32) -> i32 {
    %c0_i32 = arith.constant 0 : i32
    %c0_i32_0 = arith.constant 0 : i32
    return %c0_i32 : i32
  }
  func.func @transform_3(%arg0: i32) -> i32 {
    %c0_i32 = arith.constant 0 : i32
    %c0_i32_0 = arith.constant 0 : i32
    return %c0_i32 : i32
  }
  func.func @transform_4(%arg0: i32) -> i32 {
    %c0_i32 = arith.constant 0 : i32
    %c0_i32_0 = arith.constant 0 : i32
    return %c0_i32 : i32
  }
  func.func @transform_5(%arg0: i32) -> (i32, i32, i32) {
    %c0_i32 = arith.constant 0 : i32
    %c0_i32_0 = arith.constant 0 : i32
    %c0_i32_1 = arith.constant 0 : i32
    return %c0_i32, %c0_i32_0, %arg0 : i32, i32, i32
  }
}

</mosaic_0001>

<bundles_post_ra>
// kernel: tpu_custom_call.1
= control target key start
LH: loop header
LB: loop body
LE: loop exit
PB: predicated region body
PF: predicated region fallthrough
CT: control target
= control target key end

     0   :  { %s3151_s0 = inlined_call_operand.hbm [shape: f32[3,16,128], index: 0, kind: input, shape index: {}]   ;;  %s3152_s1 = inlined_call_operand.vmem [shape: f32[81], index: 1, kind: input, shape index: {}]   ;;  %s3153_s2 = inlined_call_operand.vmem [shape: f32[3], index: 2, kind: input, shape index: {}]   ;;  %s3154_s3 = inlined_call_operand.vmem [shape: f32[81], index: 3, kind: input, shape index: {}]   ;;  %s3155_s4 = inlined_call_operand.vmem [shape: f32[3], index: 4, kind: input, shape index: {}]   ;;  %s3156_s5 = inlined_call_operand.hbm [shape: f32[3,16,128], index: 5, kind: output, shape index: {}]  }
   0x1   :  { %3287 = sst [smem:[#allocation83_spill]] %s3156_s5 }
   0x2   :  { %10 = vsyncpa [#allocation3], 0 }
   0x3   :  { %11 = vsyncpa [#allocation5], 0 }
   0x4   :  { %12 = vsyncpa [#allocation8], 0 }
   0x5   :  { %13 = vsyncpa [#allocation11], 0  ;;  %s43_s20 = sshll.u32 %s3153_s2, 4  ;;  %s44_s20 = int_to_ptr.vmem [resolvable:$true] %s43_s20 }
   0x6   :  { %14 = vsyncpa [#allocation4], 0  ;;  %s1485_s21 = scalar_lea.vmem %s44_s20, 16  ;;  %p1490_p1 = scmp.lt.s32.totalorder %s44_s20, %s44_s20 }
   0x7   :  { %p1486_p0 = scmp.ne.s32.totalorder %s44_s20, %s1485_s21  ;;  %p1491_p2 = scmp.lt.s32.totalorder %s1485_s21, %s1485_s21 }
   0x9   :  { %p1492_p3 = por %p1491_p2, %p1490_p1 }
   0xb   :  { %p1493_p4 = pnand %p1492_p3, %p1486_p0 }
   0xd   :  { %1496 = shalt.err (!%p1493_p4)
}
   0xe   :  { %s1587_s22 = smov [#allocation7]   ;;  %s1588_s23 = smov [#allocation2]  }
   0xf   :  { %46 = dma.vmem_to_smem %s44_s20, 16, %s1587_s22, [#allocation8]  }
  0x10   :  { %s20_s24 = sshll.u32 %s1588_s23, 4  ;;  %s1497_s27 = scalar_lea.hbm %s3151_s0, 768  ;;  %s21_s24 = int_to_ptr.vmem [resolvable:$true] %s20_s24 }
  0x11   :  { %p1498_p5 = scmp.ne.s32.totalorder %s3151_s0, %s1497_s27  ;;  %p1501_p6 = scmp.lt.u32.totalorder %s1497_s27, %s3151_s0 }
  0x13   :  { %p1503_p7 = pnand %p1501_p6, %p1498_p5 }
  0x15   :  { %1506 = shalt.err (!%p1503_p7)
}
  0x16   :  { %s1507_s6 = scalar_lea.vmem %s21_s24, 768  ;;  %p1512_p9 = scmp.lt.s32.totalorder %s21_s24, %s21_s24 }
  0x17   :  { %p1508_p8 = scmp.ne.s32.totalorder %s21_s24, %s1507_s6  ;;  %p1513_p10 = scmp.lt.s32.totalorder %s1507_s6, %s1507_s6 }
  0x19   :  { %p1514_p11 = por %p1513_p10, %p1512_p9 }
  0x1b   :  { %p1515_p12 = pnand %p1514_p11, %p1508_p8 }
  0x1d   :  { %1518 = shalt.err (!%p1515_p12)
}
  0x1e   :  { %s3157_s7 = smov 128   ;;  %s3158_s8 = smov 8  }
  0x1f   :  { %26 = dma.hbm_to_vmem [thread:$0]  %s3151_s0, 768, %s21_s24, [#allocation3], %s3157_s7, %s3157_s7, %s3158_s8  }
  0x20   :  { %s33_s13 = sshll.u32 %s3152_s1, 4  ;;  %s53_s16 = sshll.u32 %s3154_s3, 4  ;;  %s34_s13 = int_to_ptr.vmem [resolvable:$true] %s33_s13  ;;  %s54_s16 = int_to_ptr.vmem [resolvable:$true] %s53_s16 }
  0x21   :  { %s1519_s17 = scalar_lea.vmem %s34_s13, 16  ;;  %p1524_p0 = scmp.lt.s32.totalorder %s34_s13, %s34_s13 }
  0x22   :  { %p1520_p13 = scmp.ne.s32.totalorder %s34_s13, %s1519_s17  ;;  %p1525_p1 = scmp.lt.s32.totalorder %s1519_s17, %s1519_s17 }
  0x24   :  { %p1526_p2 = por %p1525_p1, %p1524_p0 }
  0x26   :  { %p1527_p3 = pnand %p1526_p2, %p1520_p13 }
  0x28   :  { %1530 = shalt.err (!%p1527_p3)
}
  0x29   :  { %s1591_s18 = smov [#allocation6]   ;;  %s1531_s0 = scalar_lea.vmem %s54_s16, 16 }
  0x2a   :  { %36 = dma.vmem_to_smem %s34_s13, 16, %s1591_s18, [#allocation5]  }
  0x2b   :  { %p1532_p4 = scmp.ne.s32.totalorder %s54_s16, %s1531_s0  ;;  %p1536_p5 = scmp.lt.s32.totalorder %s54_s16, %s54_s16 }
  0x2c   :  { %p1537_p6 = scmp.lt.s32.totalorder %s1531_s0, %s1531_s0 }
  0x2e   :  { %p1538_p7 = por %p1537_p6, %p1536_p5 }
  0x30   :  { %p1539_p8 = pnand %p1538_p7, %p1532_p4 }
  0x32   :  { %1542 = shalt.err (!%p1539_p8)
}
  0x33   :  { %s1592_s1 = smov [#allocation9]   ;;  %s63_s20 = sshll.u32 %s3155_s4, 4  ;;  %s64_s20 = int_to_ptr.vmem [resolvable:$true] %s63_s20 }
  0x34   :  { %56 = dma.vmem_to_smem %s54_s16, 16, %s1592_s1, [#allocation8]  }
  0x35   :  { %s1543_s21 = scalar_lea.vmem %s64_s20, 16  ;;  %p1548_p10 = scmp.lt.s32.totalorder %s64_s20, %s64_s20 }
  0x36   :  { %p1544_p9 = scmp.ne.s32.totalorder %s64_s20, %s1543_s21  ;;  %p1549_p11 = scmp.lt.s32.totalorder %s1543_s21, %s1543_s21 }
  0x38   :  { %p1550_p12 = por %p1549_p11, %p1548_p10 }
  0x3a   :  { %p1551_p13 = pnand %p1550_p12, %p1544_p9 }
  0x3c   :  { %1554 = shalt.err (!%p1551_p13)
}
  0x3d   :  { %s1593_s22 = smov [#allocation10]  }
  0x3e   :  { %66 = dma.vmem_to_smem %s64_s20, 16, %s1593_s22, [#allocation11]  }
  0x3f   :  { %1577 = dma.done.wait [#allocation3], 768  }
  0x40   :  { %1578 = vsyncadd [#allocation3], 4294966528 }
  0x41   :  { %1579 = dma.done.wait [#allocation5], 16  }
  0x42   :  { %1580 = vsyncadd [#allocation5], 4294967280 }
  0x43   :  { %1581 = dma.done.wait [#allocation8], 32  }
  0x44   :  { %1582 = vsyncadd [#allocation8], 4294967264 }
  0x45   :  { %1583 = dma.done.wait [#allocation11], 16  }
  0x46   :  { %1584 = vsyncadd [#allocation11], 4294967280 }
  0x47   :  { %82 = sfence }
  0x48   :  { %v83_v0 = vlaneseq  ;;  %v1654_v1 = vld [vmem:[#allocation2] sm:$0xff]  ;;  %v1656_v2 = vld [vmem:[#allocation2 + $0x8] sm:$0xff]  ;;  %v1658_v3 = vld [vmem:[#allocation2 + $0x10] sm:$0xff]  ;;  %s1660_s4 = sld [smem:[#allocation6 + $0x2]]  ;;  %s1677_s23 = sld [smem:[#allocation6 + $0x5]] }
  0x49   :  { %v1662_v4 = vld [vmem:[#allocation2 + $0x18] sm:$0xff]  ;;  %v1664_v5 = vld [vmem:[#allocation2 + $0x20] sm:$0xff]  ;;  %v1666_v6 = vld [vmem:[#allocation2 + $0x28] sm:$0xff]  ;;  %v114_v7 = vrot.slane %v1654_v1, 7  ;;  %v115_v8 = vrot.slane %v1656_v2, 7  ;;  %v125_v9 = vrot.slane %v1654_v1, 1 }
  0x4a   :  { %v1672_v10 = vshrl.u32 %v83_v0, 7  ;;  %v126_v11 = vrot.slane %v1656_v2, 1  ;;  %v136_v12 = vrot.slane %v1658_v3, 7  ;;  %v137_v13 = vrot.slane %v1662_v4, 7  ;;  %s1683_s24 = sld [smem:[#allocation6 + $0x8]]  ;;  %s1688_s25 = sld [smem:[#allocation6 + $0xb]] }
  0x4b   :  { %v142_v14 = vrot.slane %v1658_v3, 1  ;;  %v143_v15 = vrot.slane %v1662_v4, 1  ;;  %v148_v16 = vrot.slane %v1664_v5, 7  ;;  %v149_v17 = vrot.slane %v1666_v6, 7  ;;  %s1693_s26 = sld [smem:[#allocation6 + $0xe]]  ;;  %s1695_s27 = sld [smem:[#allocation6 + $0x11]] }
  0x4c   :  { %vm102_vm0 = vcmp.ne.s32.totalorder %v1672_v10, 0  ;;  %vm116_vm1 = vcmp.lt.s32.totalorder %v1672_v10, 1  ;;  %vm127_vm2 = vcmp.lt.s32.totalorder %v1672_v10, 7  ;;  %v154_v19 = vrot.slane %v1664_v5, 1  ;;  %s1711_s28 = sld [smem:[#allocation6 + $0x14]]  ;;  %s1713_s2 = sld [smem:[#allocation6 + $0x17]] }
  0x4d   :  { %v118_v18 = vsel %vm116_vm1, %v115_v8, %v114_v7  ;;  %v1699_v20 = vsel %vm116_vm1, %v114_v7, %v115_v8  ;;  %v1707_v22 = vsel %vm127_vm2, %v125_v9, %v126_v11  ;;  %v139_v23 = vsel %vm116_vm1, %v137_v13, %v136_v12  ;;  %s1727_s29 = sld [smem:[#allocation6 + $0x1a]]  ;;  %s1729_s30 = sld [smem:[#allocation6]] }
  0x4e   :  { %v1703_v21 = vsel %vm102_vm0, %v118_v18, 0.0  ;;  %v129_v24 = vsel %vm127_vm2, %v126_v11, %v125_v9  ;;  %v1719_v25 = vsel %vm116_vm1, %v136_v12, %v137_v13  ;;  %v1723_v26 = vsel %vm127_vm2, %v142_v14, %v143_v15  ;;  %s1738_s6 = sld [smem:[#allocation6 + $0x3]]  ;;  %s1757_s9 = sld [smem:[#allocation6 + $0x6]] }
  0x4f   :  { %v151_v27 = vsel %vm116_vm1, %v149_v17, %v148_v16  ;;  %v1733_v28 = vsel %vm102_vm0, %v139_v23, 0.0  ;;  %v155_v29 = vrot.slane %v1666_v6, 1  ;;  %v169_v30 = vstv %s1660_s4  ;;  %s1771_s10 = sld [smem:[#allocation6 + $0x9]]  ;;  %s1773_s11 = sld [smem:[#allocation6 + $0xc]] }
  0x50   :  { %v185_v31 = vstv %s1677_s23  ;;  %v145_v32 = vsel %vm127_vm2, %v143_v15, %v142_v14  ;;  %v1744_v33 = vsel %vm116_vm1, %v148_v16, %v149_v17  ;;  %v170_v34 = vmul.f32 %v169_v30, %v1703_v21  ;;  %s1787_s12 = sld [smem:[#allocation6 + $0xf]]  ;;  %s1789_s13 = sld [smem:[#allocation6 + $0x12]] }
  0x51   :  { %v186_v35 = vmul.f32 %v185_v31, %v1654_v1  ;;  %v1750_v36 = vsel %vm102_vm0, %v151_v27, 0.0  ;;  %v1753_v37 = vmul.f32 %v169_v30, %v1699_v20  ;;  %v203_v38 = vstv %s1683_s24  ;;  %s1802_s14 = sld [smem:[#allocation6 + $0x15]]  ;;  %s1804_s15 = sld [smem:[#allocation6 + $0x18]] }
  0x52   :  { %v221_v39 = vstv %s1688_s25  ;;  %v1760_v40 = vmul.f32 %v185_v31, %v1656_v2  ;;  %v204_v42 = vmul.f32 %v203_v38, %v1707_v22  ;;  %v1766_v44 = vsel %vm127_vm2, %v154_v19, %v155_v29  ;;  %s1821_s16 = sld [smem:[#allocation6 + $0x1b]]  ;;  %s1829_s17 = sld [smem:[#allocation6 + $0x1e]] }
  0x53   :  { %v188_v41 = vadd.f32 %v186_v35, %v170_v34  ;;  %v222_v43 = vmul.f32 %v221_v39, %v1733_v28  ;;  %v239_v45 = vstv %s1693_s26  ;;  %v257_v46 = vstv %s1695_s27  ;;  %s1831_s18 = sld [smem:[#allocation6 + $0x21]]  ;;  %s1839_s0 = sld [smem:[#allocation6 + $0x24]] }
  0x54   :  { %v275_v47 = vstv %s1711_s28  ;;  %v157_v48 = vsel %vm127_vm2, %v155_v29, %v154_v19  ;;  %v240_v50 = vmul.f32 %v239_v45, %v1658_v3  ;;  %v293_v51 = vstv %s1713_s2  ;;  %s1841_s1 = sld [smem:[#allocation6 + $0x27]]  ;;  %s1851_s3 = sld [smem:[#allocation6 + $0x2a]] }
  0x55   :  { %v206_v49 = vadd.f32 %v204_v42, %v188_v41  ;;  %v1780_v52 = vmul.f32 %v221_v39, %v1719_v25  ;;  %v1783_v53 = vmul.f32 %v239_v45, %v1662_v4  ;;  %v258_v54 = vmul.f32 %v257_v46, %v1723_v26  ;;  %s1859_s19 = sld [smem:[#allocation6 + $0x2d]]  ;;  %s1865_s20 = sld [smem:[#allocation6 + $0x30]] }
  0x56   :  { %v276_v55 = vmul.f32 %v275_v47, %v1750_v36  ;;  %v311_v57 = vstv %s1727_s29  ;;  %v1793_v58 = vadd.s32 8, %v1672_v10  ;;  %v161_v59 = vstv %s1729_s30  ;;  %s3159_s21 = smov 127   ;;  %s1871_s22 = sld [smem:[#allocation6 + $0x33]] }
  0x57   :  { %v224_v56 = vadd.f32 %v222_v43, %v206_v49  ;;  %v1797_v60 = vmul.f32 %v275_v47, %v1744_v33  ;;  %v294_v61 = vmul.f32 %v293_v51, %v1664_v5  ;;  %v162_v62 = vmul.f32 %v161_v59, %v1703_v21  ;;  %s1883_s4 = sld [smem:[#allocation6 + $0x1d]]  ;;  %s1887_s23 = sld [smem:[#allocation6 + $0x20]] }
  0x58   :  { %v173_v63 = vstv %s1738_s6  ;;  %v1807_v8 = vmul.f32 %v293_v51, %v1666_v6  ;;  %vm105_vm3 = vcmp.ne.s32.totalorder %v1793_v58, 15  ;;  %v312_v11 = vmul.f32 %v311_v57, %v1766_v44  ;;  %s1892_s24 = sld [smem:[#allocation6 + $0x23]]  ;;  %s1895_s25 = sld [smem:[#allocation6 + $0x26]] }
  0x59   :  { %v242_v7 = vadd.f32 %v240_v50, %v224_v56  ;;  %v174_v9 = vmul.f32 %v173_v63, %v1654_v1  ;;  %v1814_v12 = vsel %vm105_vm3, %v129_v24, 0.0  ;;  %v1818_v13 = vsel %vm105_vm3, %v145_v32, 0.0  ;;  %s1897_s26 = sld [smem:[#allocation6 + $0x29]]  ;;  %s3161_s27 = smov 1  }
  0x5a   :  { %v191_v14 = vstv %s1757_s9  ;;  %v1825_v16 = vsel %vm105_vm3, %v157_v48, 0.0  ;;  %v163_v17 = vmul.f32 %v161_v59, %v1699_v20  ;;  %v175_v18 = vmul.f32 %v173_v63, %v1656_v2  ;;  %s1906_s28 = sld [smem:[#allocation6 + $0x2c]]  ;;  %s1910_s2 = sld [smem:[#allocation6 + $0x2f]] }
  0x5b   :  { %v260_v15 = vadd.f32 %v258_v54, %v242_v7  ;;  %v176_v19 = vadd.f32 %v174_v9, %v162_v62  ;;  %v192_v23 = vmul.f32 %v191_v14, %v1707_v22  ;;  %v209_v24 = vstv %s1771_s10  ;;  %s1912_s29 = sld [smem:[#allocation6 + $0x32]]  ;;  %s1917_s30 = sld [smem:[#allocation6 + $0x35]] }
  0x5c   :  { %v227_v27 = vstv %s1773_s11  ;;  %v205_v30 = vmul.f32 %v203_v38, %v1814_v12  ;;  %v259_v31 = vmul.f32 %v257_v46, %v1818_v13  ;;  %v210_v32 = vmul.f32 %v209_v24, %v1733_v28  ;;  %s1930_s6 = sld [smem:[#allocation6 + $0x36]]  ;;  %s1932_s9 = sld [smem:[#allocation6 + $0x39]] }
  0x5d   :  { %v278_v29 = vadd.f32 %v276_v55, %v260_v15  ;;  %v194_v34 = vadd.f32 %v192_v23, %v176_v19  ;;  %v228_v35 = vmul.f32 %v227_v27, %v1658_v3  ;;  %v245_v39 = vstv %s1787_s12  ;;  %s1937_s10 = sld [smem:[#allocation6 + $0x3c]]  ;;  %s1942_s11 = sld [smem:[#allocation6 + $0x3f]] }
  0x5e   :  { %v263_v41 = vstv %s1789_s13  ;;  %v1847_v43 = vmul.f32 %v311_v57, %v1825_v16  ;;  %v211_v38 = vmul.f32 %v209_v24, %v1719_v25  ;;  %v229_v45 = vmul.f32 %v227_v27, %v1662_v4  ;;  %s1944_s12 = sld [smem:[#allocation6 + $0x42]]  ;;  %s1953_s13 = sld [smem:[#allocation6 + $0x45]] }
  0x5f   :  { %v296_v42 = vadd.f32 %v294_v61, %v278_v29  ;;  %v212_v46 = vadd.f32 %v210_v32, %v194_v34  ;;  %v246_v47 = vmul.f32 %v245_v39, %v1723_v26  ;;  %v281_v48 = vstv %s1802_s14  ;;  %s1957_s14 = sld [smem:[#allocation6 + $0x48]]  ;;  %s2182_s8 = sld [smem:[#allocation9 + $0xf]] }
  0x60   :  { %v299_v49 = vstv %s1804_s15  ;;  %v264_v51 = vmul.f32 %v263_v41, %v1750_v36  ;;  %v265_v54 = vmul.f32 %v263_v41, %v1744_v33  ;;  %v193_v55 = vmul.f32 %v191_v14, %v1814_v12  ;;  %s1962_s15 = sld [smem:[#allocation6 + $0x4b]]  ;;  %s2176_s7 = sld [smem:[#allocation9 + $0x8]] }
  0x61   :  { %v314_v50 = vadd.f32 %v312_v11, %v296_v42  ;;  %v230_v56 = vadd.f32 %v228_v35, %v212_v46  ;;  %v282_v57 = vmul.f32 %v281_v48, %v1664_v5  ;;  %v300_v59 = vmul.f32 %v299_v49, %v1766_v44  ;;  %s2194_s5 = sld [smem:[#allocation9 + $0x45]] }
  0x62   :  { %v189_v61 = vadd.f32 %v1760_v40, %v1753_v37  ;;  %v177_v62 = vadd.f32 %v175_v18, %v163_v17  ;;  %v343_v63 = vstv %s1821_s16  ;;  %v355_v7 = vstv %s1829_s17  ;;  %s1964_s16 = sld [smem:[#allocation6 + $0x4e]]  ;;  %s1976_s17 = sld [smem:[#allocation6 + $0x38]] }
  0x63   :  { %326 = vrot.lane.b32.xlu1 %v314_v50, %s3159_s21  ;;  %v373_v9 = vstv %s1831_s18  ;;  %v248_v11 = vadd.f32 %v246_v47, %v230_v56  ;;  %v345_v15 = vmul.f32 %v343_v63, %v1699_v20  ;;  %v357_v19 = vmul.f32 %v355_v7, %v1656_v2  ;;  %s1981_s18 = sld [smem:[#allocation6 + $0x3b]] }
  0x64   :  { %v207_v14 = vadd.f32 %v205_v30, %v189_v61  ;;  %v195_v37 = vadd.f32 %v193_v55, %v177_v62  ;;  %v375_v40 = vmul.f32 %v373_v9, %v1814_v12  ;;  %v391_v23 = vstv %s1839_s0  ;;  %s1983_s0 = sld [smem:[#allocation6 + $0x3e]] }
  0x65   :  { %v409_v24 = vstv %s1841_s1  ;;  %v266_v27 = vadd.f32 %v264_v51, %v248_v11  ;;  %v359_v18 = vadd.f32 %v357_v19, %v345_v15  ;;  %v393_v29 = vmul.f32 %v391_v23, %v1719_v25  ;;  %s1990_s1 = sld [smem:[#allocation6 + $0x41]]  ;;  %3307 = sst [smem:[#allocation37_spill]] %s2182_s8 }
  0x66   :  { %v225_v17 = vadd.f32 %v1780_v52, %v207_v14  ;;  %v283_v32 = vmul.f32 %v281_v48, %v1666_v6  ;;  %v247_v30 = vmul.f32 %v245_v39, %v1818_v13  ;;  %v213_v34 = vadd.f32 %v211_v38, %v195_v37  ;;  %3305 = sst [smem:[#allocation35_spill]] %s2176_s7  ;;  %s2201_s7 = sld [smem:[#allocation9 + $0x1d]] }
  0x67   :  { %v427_v35 = vstv %s1851_s3  ;;  %v284_v41 = vadd.f32 %v282_v57, %v266_v27  ;;  %v377_v46 = vadd.f32 %v375_v40, %v359_v18  ;;  %v411_v52 = vmul.f32 %v409_v24, %v1662_v4  ;;  %s1992_s3 = sld [smem:[#allocation6 + $0x44]]  ;;  %3311 = sst [smem:[#allocation41_spill]] %s2194_s5 }
  0x68   :  { %v243_v42 = vadd.f32 %v1783_v53, %v225_v17  ;;  %v301_v47 = vmul.f32 %v299_v49, %v1825_v16  ;;  %v231_v50 = vadd.f32 %v229_v45, %v213_v34  ;;  %v429_v48 = vmul.f32 %v427_v35, %v1818_v13  ;;  %s2245_s5 = sld [smem:[#allocation9 + $0x17]] }
  0x69   :  { %v445_v39 = vstv %s1859_s19  ;;  %v302_v38 = vadd.f32 %v300_v59, %v284_v41  ;;  %v395_v55 = vadd.f32 %v393_v29, %v377_v46  ;;  %v463_v56 = vstv %s1865_s20  ;;  %s1998_s19 = sld [smem:[#allocation6 + $0x47]]  ;;  %s2003_s20 = sld [smem:[#allocation6 + $0x4a]] }
  0x6a   :  { %v261_v51 = vadd.f32 %v259_v31, %v243_v42  ;;  %v249_v53 = vadd.f32 %v247_v30, %v231_v50  ;;  %v481_v57 = vstv %s1871_s22  ;;  %v344_v61 = vmul.f32 %v343_v63, %v1703_v21  ;;  %s2009_s22 = sld [smem:[#allocation6 + $0x4d]] }
  0x6b   :  { %v356_v49 = vmul.f32 %v355_v7, %v1654_v1  ;;  %316 = vrot.lane.b32.xlu0 %v302_v38, %s3161_s27  ;;  %v413_v62 = vadd.f32 %v411_v52, %v395_v55  ;;  %v447_v31 = vmul.f32 %v445_v39, %v1744_v33  ;;  %v374_v59 = vmul.f32 %v373_v9, %v1707_v22 }
  0x6c   :  { %v279_v45 = vadd.f32 %v1797_v60, %v261_v51  ;;  %v267_v11 = vadd.f32 %v265_v54, %v249_v53  ;;  %v465_v14 = vmul.f32 %v463_v56, %v1666_v6  ;;  %v392_v63 = vmul.f32 %v391_v23, %v1733_v28  ;;  %3313 = sst [smem:[#allocation43_spill]] %s2201_s7  ;;  %s2217_s7 = sld [smem:[#allocation9 + $0x30]] }
  0x6d   :  { %v358_v15 = vadd.f32 %v356_v49, %v344_v61  ;;  %v431_v7 = vadd.f32 %v429_v48, %v413_v62  ;;  %v483_v9 = vmul.f32 %v481_v57, %v1825_v16  ;;  %v410_v19 = vmul.f32 %v409_v24, %v1658_v3 }
  0x6e   :  { %v297_v60 = vadd.f32 %v1807_v8, %v279_v45  ;;  %v285_v54 = vadd.f32 %v283_v32, %v267_v11  ;;  %v428_v40 = vmul.f32 %v427_v35, %v1723_v26  ;;  %v351_v23 = vstv %s1883_s4  ;;  %s2016_s4 = sld [smem:[#allocation6 + $0x50]] }
  0x6f   :  { %v376_v37 = vadd.f32 %v374_v59, %v358_v15  ;;  %v449_v17 = vadd.f32 %v447_v31, %v431_v7  ;;  %v353_v8 = vmul.f32 %v351_v23, %v1699_v20  ;;  %v367_v18 = vstv %s1887_s23  ;;  %s1302_s23 = sld [smem:[#allocation6 + $0x1]]  ;;  %3328 = sst [smem:[#allocation58_spill]] %s2245_s5 }
  0x70   :  { %v315_v27 = vadd.f32 %v1847_v43, %v297_v60  ;;  %v303_v29 = vadd.f32 %v301_v47, %v285_v54  ;;  %v369_v34 = vmul.f32 %v367_v18, %v1656_v2  ;;  %v385_v24 = vstv %s1892_s24  ;;  %s1305_s24 = sld [smem:[#allocation6 + $0x4]]  ;;  %s2415_s5 = sld [smem:[#allocation9 + $0x46]] }
  0x71   :  { %v394_v30 = vadd.f32 %v392_v63, %v376_v37  ;;  %v467_v32 = vadd.f32 %v465_v14, %v449_v17  ;;  %v387_v41 = vmul.f32 %v385_v24, %v1814_v12  ;;  %v403_v42 = vstv %s1895_s25  ;;  %s1329_s25 = sld [smem:[#allocation6 + $0x1c]] }
  0x72   :  { %328 = vrot.lane.b32.xlu1 %v315_v27, %s3159_s21  ;;  %v421_v35 = vstv %s1897_s26  ;;  %318 = vrot.lane.b32.xlu0 %v303_v29, %s3161_s27  ;;  %v446_v46 = vmul.f32 %v445_v39, %v1750_v36  ;;  %v371_v52 = vadd.f32 %v369_v34, %v353_v8  ;;  %v405_v47 = vmul.f32 %v403_v42, %v1719_v25  ;;  %s1332_s26 = sld [smem:[#allocation6 + $0x1f]]  ;;  %3318 = sst [smem:[#allocation48_spill]] %s2217_s7 }
  0x73   :  { %v412_v43 = vadd.f32 %v410_v19, %v394_v30  ;;  %v485_v50 = vadd.f32 %v483_v9, %v467_v32  ;;  %v464_v48 = vmul.f32 %v463_v56, %v1664_v5  ;;  %v423_v38 = vmul.f32 %v421_v35, %v1662_v4 }
  0x74   :  { %v439_v51 = vstv %s1906_s28  ;;  %v389_v53 = vadd.f32 %v387_v41, %v371_v52  ;;  %v457_v61 = vstv %s1910_s2  ;;  %v475_v39 = vstv %s1912_s29  ;;  %s1308_s28 = sld [smem:[#allocation6 + $0x7]]  ;;  %s2051_s2 = sld [smem:[#allocation6 + $0x22]] }
  0x75   :  { %v430_v55 = vadd.f32 %v428_v40, %v412_v43  ;;  %v482_v49 = vmul.f32 %v481_v57, %v1766_v44  ;;  %v493_v45 = vstv %s1917_s30  ;;  %v352_v62 = vmul.f32 %v351_v23, %v1703_v21  ;;  %s2053_s29 = sld [smem:[#allocation6 + $0xa]]  ;;  %s2055_s30 = sld [smem:[#allocation6 + $0x37]] }
  0x76   :  { %500 = vrot.lane.b32.xlu1 %v485_v50, %s3161_s27  ;;  %v368_v56 = vmul.f32 %v367_v18, %v1654_v1  ;;  %v407_v59 = vadd.f32 %v405_v47, %v389_v53  ;;  %v441_v11 = vmul.f32 %v439_v51, %v1818_v13  ;;  %v386_v14 = vmul.f32 %v385_v24, %v1707_v22 }
  0x77   :  { %v448_v31 = vadd.f32 %v446_v46, %v430_v55  ;;  %v459_v15 = vmul.f32 %v457_v61, %v1744_v33  ;;  %v477_v57 = vmul.f32 %v475_v39, %v1666_v6  ;;  %v404_v60 = vmul.f32 %v403_v42, %v1733_v28 }
  0x78   :  { %v370_v63 = vadd.f32 %v368_v56, %v352_v62  ;;  %v425_v9 = vadd.f32 %v423_v38, %v407_v59  ;;  %v495_v19 = vmul.f32 %v493_v45, %v1825_v16  ;;  %v422_v54 = vmul.f32 %v421_v35, %v1658_v3 }
  0x79   :  { %v466_v7 = vadd.f32 %v464_v48, %v448_v31  ;;  %v440_v40 = vmul.f32 %v439_v51, %v1723_v26  ;;  %v521_v23 = vstv %s1930_s6  ;;  %v533_v27 = vstv %s1932_s9  ;;  %s2057_s6 = sld [smem:[#allocation6 + $0x3a]]  ;;  %s2059_s9 = sld [smem:[#allocation6 + $0x25]] }
  0x7a   :  { %v388_v37 = vadd.f32 %v386_v14, %v370_v63  ;;  %v443_v8 = vadd.f32 %v441_v11, %v425_v9  ;;  %v523_v18 = vmul.f32 %v521_v23, %v1699_v20  ;;  %v535_v29 = vmul.f32 %v533_v27, %v1656_v2 }
  0x7b   :  { %v484_v17 = vadd.f32 %v482_v49, %v466_v7  ;;  %v551_v34 = vstv %s1937_s10  ;;  %v569_v24 = vstv %s1942_s11  ;;  %v587_v32 = vstv %s1944_s12  ;;  %s2061_s10 = sld [smem:[#allocation6 + $0xd]]  ;;  %s2072_s12 = sld [smem:[#allocation6 + $0x28]] }
  0x7c   :  { %v406_v30 = vadd.f32 %v404_v60, %v388_v37  ;;  %v461_v41 = vadd.f32 %v459_v15, %v443_v8  ;;  %v537_v42 = vadd.f32 %v535_v29, %v523_v18  ;;  %v553_v35 = vmul.f32 %v551_v34, %v1814_v12  ;;  %s2069_s11 = sld [smem:[#allocation6 + $0x3d]] }
  0x7d   :  { %498 = vrot.lane.b32.xlu0 %v484_v17, %s3161_s27  ;;  %v571_v43 = vmul.f32 %v569_v24, %v1719_v25  ;;  %v458_v52 = vmul.f32 %v457_v61, %v1750_v36  ;;  %v476_v47 = vmul.f32 %v475_v39, %v1664_v5  ;;  %v605_v50 = vstv %s1953_s13  ;;  %s2075_s13 = sld [smem:[#allocation6 + $0x10]] }
  0x7e   :  { %v424_v46 = vadd.f32 %v422_v54, %v406_v30  ;;  %v479_v48 = vadd.f32 %v477_v57, %v461_v41  ;;  %v555_v38 = vadd.f32 %v553_v35, %v537_v42  ;;  %v589_v51 = vmul.f32 %v587_v32, %v1662_v4 }
  0x7f   :  { %v623_v55 = vstv %s1957_s14  ;;  %v641_v49 = vstv %s1962_s15  ;;  %v659_v62 = vstv %s1964_s16  ;;  %v522_v56 = vmul.f32 %v521_v23, %v1703_v21  ;;  %s2080_s14 = sld [smem:[#allocation6 + $0x13]]  ;;  %s2083_s15 = sld [smem:[#allocation6 + $0x16]] }
  0x80   :  { %v442_v53 = vadd.f32 %v440_v40, %v424_v46  ;;  %v497_v31 = vadd.f32 %v495_v19, %v479_v48  ;;  %v573_v59 = vadd.f32 %v571_v43, %v555_v38  ;;  %v607_v61 = vmul.f32 %v605_v50, %v1818_v13  ;;  %s2088_s16 = sld [smem:[#allocation6 + $0x40]] }
  0x81   :  { %v494_v11 = vmul.f32 %v493_v45, %v1766_v44  ;;  %v534_v14 = vmul.f32 %v533_v27, %v1654_v1  ;;  %v552_v15 = vmul.f32 %v551_v34, %v1707_v22  ;;  %v625_v63 = vmul.f32 %v623_v55, %v1744_v33 }
  0x82   :  { %v460_v39 = vadd.f32 %v458_v52, %v442_v53  ;;  %508 = vrot.lane.b32.xlu1 %v497_v31, %s3159_s21  ;;  %v591_v57 = vadd.f32 %v589_v51, %v573_v59  ;;  %v643_v60 = vmul.f32 %v641_v49, %v1666_v6  ;;  %v661_v7 = vmul.f32 %v659_v62, %v1825_v16 }
  0x83   :  { %v536_v9 = vadd.f32 %v534_v14, %v522_v56  ;;  %v570_v19 = vmul.f32 %v569_v24, %v1733_v28  ;;  %v588_v54 = vmul.f32 %v587_v32, %v1658_v3  ;;  %v529_v40 = vstv %s1976_s17  ;;  %s2090_s17 = sld [smem:[#allocation6 + $0x19]] }
  0x84   :  { %v478_v45 = vadd.f32 %v476_v47, %v460_v39  ;;  %v609_v37 = vadd.f32 %v607_v61, %v591_v57  ;;  %v545_v23 = vstv %s1981_s18  ;;  %v563_v27 = vstv %s1983_s0  ;;  %s2093_s18 = sld [smem:[#allocation6 + $0x2b]]  ;;  %s2097_s0 = sld [smem:[#allocation7]] }
  0x85   :  { %v554_v8 = vadd.f32 %v552_v15, %v536_v9  ;;  %v531_v18 = vmul.f32 %v529_v40, %v1699_v20  ;;  %v547_v29 = vmul.f32 %v545_v23, %v1656_v2  ;;  %v565_v34 = vmul.f32 %v563_v27, %v1814_v12 }
  0x86   :  { %v496_v17 = vadd.f32 %v494_v11, %v478_v45  ;;  %v627_v30 = vadd.f32 %v625_v63, %v609_v37  ;;  %v581_v24 = vstv %s1990_s1  ;;  %v599_v32 = vstv %s1992_s3  ;;  %s2099_s1 = sld [smem:[#allocation6 + $0x2e]]  ;;  %s2103_s3 = sld [smem:[#allocation6 + $0x31]] }
  0x87   :  { %v572_v41 = vadd.f32 %v570_v19, %v554_v8  ;;  %v606_v42 = vmul.f32 %v605_v50, %v1723_v26  ;;  %v549_v35 = vadd.f32 %v547_v29, %v531_v18  ;;  %v583_v43 = vmul.f32 %v581_v24, %v1719_v25 }
  0x88   :  { %506 = vrot.lane.b32.xlu0 %v496_v17, %s3159_s21  ;;  %v645_v46 = vadd.f32 %v643_v60, %v627_v30  ;;  %v624_v52 = vmul.f32 %v623_v55, %v1750_v36  ;;  %v617_v47 = vstv %s1998_s19  ;;  %v601_v51 = vmul.f32 %v599_v32, %v1662_v4  ;;  %s2105_s19 = sld [smem:[#allocation6 + $0x34]] }
  0x89   :  { %v590_v48 = vadd.f32 %v588_v54, %v572_v41  ;;  %v567_v38 = vadd.f32 %v565_v34, %v549_v35  ;;  %v635_v53 = vstv %s2003_s20  ;;  %v642_v31 = vmul.f32 %v641_v49, %v1664_v5  ;;  %s2110_s20 = sld [smem:[#allocation7 + $0x1]] }
  0x8a   :  { %v663_v56 = vadd.f32 %v661_v7, %v645_v46  ;;  %v653_v59 = vstv %s2009_s22  ;;  %v530_v61 = vmul.f32 %v529_v40, %v1703_v21  ;;  %v619_v11 = vmul.f32 %v617_v47, %v1818_v13  ;;  %3288 = sst [smem:[#allocation18_spill]] %s2097_s0  ;;  %s2113_s22 = sld [smem:[#allocation6 + $0x43]] }
  0x8b   :  { %v608_v50 = vadd.f32 %v606_v42, %v590_v48  ;;  %v585_v39 = vadd.f32 %v583_v43, %v567_v38  ;;  %v546_v14 = vmul.f32 %v545_v23, %v1654_v1  ;;  %v660_v55 = vmul.f32 %v659_v62, %v1766_v44 }
  0x8c   :  { %678 = vrot.lane.b32.xlu1 %v663_v56, %s3161_s27  ;;  %v637_v15 = vmul.f32 %v635_v53, %v1744_v33  ;;  %v671_v57 = vstv %s2016_s4  ;;  %v564_v63 = vmul.f32 %v563_v27, %v1707_v22  ;;  %v582_v45 = vmul.f32 %v581_v24, %v1733_v28  ;;  %s2116_s4 = sld [smem:[#allocation6 + $0x46]] }
  0x8d   :  { %v626_v60 = vadd.f32 %v624_v52, %v608_v50  ;;  %v603_v49 = vadd.f32 %v601_v51, %v585_v39  ;;  %v548_v7 = vadd.f32 %v546_v14, %v530_v61  ;;  %v655_v9 = vmul.f32 %v653_v59, %v1666_v6 }
  0x8e   :  { %v600_v40 = vmul.f32 %v599_v32, %v1658_v3  ;;  %v673_v23 = vmul.f32 %v671_v57, %v1825_v16  ;;  %v618_v18 = vmul.f32 %v617_v47, %v1723_v26  ;;  %v636_v30 = vmul.f32 %v635_v53, %v1750_v36 }
  0x8f   :  { %v644_v19 = vadd.f32 %v642_v31, %v626_v60  ;;  %v621_v54 = vadd.f32 %v619_v11, %v603_v49  ;;  %v566_v37 = vadd.f32 %v564_v63, %v548_v7  ;;  %v654_v41 = vmul.f32 %v653_v59, %v1664_v5  ;;  %3289 = sst [smem:[#allocation19_spill]] %s2110_s20 }
  0x90   :  { %v672_v42 = vmul.f32 %v671_v57, %v1766_v44  ;;  %v165_v46 = vstv %s1302_s23  ;;  %v179_v52 = vstv %s1305_s24  ;;  %v347_v47 = vstv %s1329_s25  ;;  %s2118_s23 = sld [smem:[#allocation6 + $0x49]]  ;;  %s2123_s24 = sld [smem:[#allocation6 + $0x4c]] }
  0x91   :  { %v662_v62 = vadd.f32 %v660_v55, %v644_v19  ;;  %v639_v17 = vadd.f32 %v637_v15, %v621_v54  ;;  %v584_v8 = vadd.f32 %v582_v45, %v566_v37  ;;  %v361_v48 = vstv %s1332_s26  ;;  %s2125_s25 = sld [smem:[#allocation9 + $0x3]]  ;;  %s2129_s26 = sld [smem:[#allocation6 + $0x4f]] }
  0x92   :  { %v166_v38 = vmul.f32 %v165_v46, %v1703_v21  ;;  %v180_v51 = vmul.f32 %v179_v52, %v1654_v1  ;;  %v167_v53 = vmul.f32 %v165_v46, %v1699_v20  ;;  %v181_v56 = vmul.f32 %v179_v52, %v1656_v2 }
  0x93   :  { %676 = vrot.lane.b32.xlu0 %v662_v62, %s3161_s27  ;;  %v657_v27 = vadd.f32 %v655_v9, %v639_v17  ;;  %v602_v29 = vadd.f32 %v600_v40, %v584_v8  ;;  %v197_v31 = vstv %s1308_s28  ;;  %v349_v59 = vmul.f32 %v347_v47, %v1699_v20  ;;  %s2131_s28 = sld [smem:[#allocation9 + $0x1e]]  ;;  %s2192_s27 = sld [smem:[#allocation9 + $0x3f]] }
  0x94   :  { %v363_v61 = vmul.f32 %v361_v48, %v1656_v2  ;;  %v379_v50 = vstv %s2051_s2  ;;  %v215_v39 = vstv %s2053_s29  ;;  %v348_v11 = vmul.f32 %v347_v47, %v1703_v21  ;;  %s2135_s2 = sld [smem:[#allocation9 + $0x39]]  ;;  %s2137_s29 = sld [smem:[#allocation9 + $0x5]] }
  0x95   :  { %v675_v34 = vadd.f32 %v673_v23, %v657_v27  ;;  %v620_v24 = vadd.f32 %v618_v18, %v602_v29  ;;  %v362_v14 = vmul.f32 %v361_v48, %v1654_v1  ;;  %v182_v55 = vadd.f32 %v180_v51, %v166_v38 }
  0x96   :  { %v198_v15 = vmul.f32 %v197_v31, %v1707_v22  ;;  %v183_v57 = vadd.f32 %v181_v56, %v167_v53  ;;  %v199_v63 = vmul.f32 %v197_v31, %v1814_v12  ;;  %v365_v60 = vadd.f32 %v363_v61, %v349_v59 }
  0x97   :  { %686 = vrot.lane.b32.xlu1 %v675_v34, %s3159_s21  ;;  %v638_v32 = vadd.f32 %v636_v30, %v620_v24  ;;  %v381_v49 = vmul.f32 %v379_v50, %v1814_v12  ;;  %v525_v7 = vstv %s2055_s30  ;;  %v539_v45 = vstv %s2057_s6  ;;  %3290 = sst [smem:[#allocation20_spill]] %s2125_s25  ;;  %s2142_s30 = sld [smem:[#allocation9]] }
  0x98   :  { %v397_v9 = vstv %s2059_s9  ;;  %v216_v19 = vmul.f32 %v215_v39, %v1733_v28  ;;  %v233_v54 = vstv %s2061_s10  ;;  %v364_v37 = vadd.f32 %v362_v14, %v348_v11  ;;  %s2144_s6 = sld [smem:[#allocation9 + $0x6]]  ;;  %s2149_s9 = sld [smem:[#allocation9 + $0x1b]] }
  0x99   :  { %v656_v35 = vadd.f32 %v654_v41, %v638_v32  ;;  %v380_v40 = vmul.f32 %v379_v50, %v1707_v22  ;;  %v200_v23 = vadd.f32 %v198_v15, %v182_v55  ;;  %v217_v62 = vmul.f32 %v215_v39, %v1719_v25  ;;  %3291 = sst [smem:[#allocation21_spill]] %s2131_s28  ;;  %s2151_s10 = sld [smem:[#allocation9 + $0x21]] }
  0x9a   :  { %v527_v17 = vmul.f32 %v525_v7, %v1699_v20  ;;  %v541_v8 = vmul.f32 %v539_v45, %v1656_v2  ;;  %v201_v18 = vadd.f32 %v199_v63, %v183_v57  ;;  %v383_v27 = vadd.f32 %v381_v49, %v365_v60  ;;  %3292 = sst [smem:[#allocation22_spill]] %s2135_s2 }
  0x9b   :  { %v674_v43 = vadd.f32 %v672_v42, %v656_v35  ;;  %v399_v29 = vmul.f32 %v397_v9, %v1719_v25  ;;  %v557_v30 = vstv %s2069_s11  ;;  %v415_v34 = vstv %s2072_s12  ;;  %3293 = sst [smem:[#allocation23_spill]] %s2137_s29  ;;  %s2155_s11 = sld [smem:[#allocation7 + $0x2]] }
  0x9c   :  { %v234_v24 = vmul.f32 %v233_v54, %v1658_v3  ;;  %v251_v20 = vstv %s2075_s13  ;;  %v382_v41 = vadd.f32 %v380_v40, %v364_v37  ;;  %v398_v2 = vmul.f32 %v397_v9, %v1733_v28  ;;  %s2157_s12 = sld [smem:[#allocation9 + $0x36]]  ;;  %s2161_s13 = sld [smem:[#allocation9 + $0xc]] }
  0x9d   :  { %684 = vrot.lane.b32.xlu0 %v674_v43, %s3159_s21  ;;  %v218_v32 = vadd.f32 %v216_v19, %v200_v23  ;;  %v235_v42 = vmul.f32 %v233_v54, %v1662_v4  ;;  %v543_v35 = vadd.f32 %v541_v8, %v527_v17  ;;  %v559_v43 = vmul.f32 %v557_v30, %v1814_v12  ;;  %3294 = sst [smem:[#allocation24_spill]] %s2142_s30  ;;  %s2188_s21 = sld [smem:[#allocation9 + $0x2a]] }
  0x9e   :  { %v219_v46 = vadd.f32 %v217_v62, %v201_v18  ;;  %v401_v52 = vadd.f32 %v399_v29, %v383_v27  ;;  %v417_v47 = vmul.f32 %v415_v34, %v1662_v4  ;;  %v575_v48 = vstv %s2088_s16  ;;  %3295 = sst [smem:[#allocation25_spill]] %s2144_s6  ;;  %s2167_s16 = sld [smem:[#allocation9 + $0x3c]] }
  0x9f   :  { %v433_v38 = vstv %s2093_s18  ;;  %v526_v51 = vmul.f32 %v525_v7, %v1703_v21  ;;  %v540_v53 = vmul.f32 %v539_v45, %v1654_v1  ;;  %v252_v12 = vmul.f32 %v251_v20, %v1723_v26  ;;  %3296 = sst [smem:[#allocation26_spill]] %s2149_s9  ;;  %s2169_s18 = sld [smem:[#allocation9 + $0x2]] }
  0xa0   :  { %v269_v56 = vstv %s2080_s14  ;;  %v400_v31 = vadd.f32 %v398_v2, %v382_v41  ;;  %v416_v59 = vmul.f32 %v415_v34, %v1658_v3  ;;  %3297 = sst [smem:[#allocation27_spill]] %s2151_s10  ;;  %v236_v61 = vadd.f32 %v234_v24, %v218_v32  ;;  %s2163_s14 = sld [smem:[#allocation9 + $0x27]] }
  0xa1   :  { %v253_v21 = vmul.f32 %v251_v20, %v1818_v13  ;;  %v561_v1 = vadd.f32 %v559_v43, %v543_v35  ;;  %v577_v50 = vmul.f32 %v575_v48, %v1719_v25  ;;  %3298 = sst [smem:[#allocation28_spill]] %s2155_s11  ;;  %v237_v39 = vadd.f32 %v235_v42, %v219_v46  ;;  %s2207_s29 = sld [smem:[#allocation9 + $0x11]]  ;;  %v1476_v35 = vld [vmem:[#allocation2 + $0x10] sm:$0xff] }
  0xa2   :  { %3299 = sst [smem:[#allocation29_spill]] %s2157_s12  ;;  %v419_v11 = vadd.f32 %v417_v47, %v401_v52  ;;  %v435_v14 = vmul.f32 %v433_v38, %v1818_v13  ;;  %v593_v3 = vstv %s2113_s22  ;;  %v451_v55 = vstv %s2099_s1  ;;  %s2174_s22 = sld [smem:[#allocation9 + $0x42]] }
  0xa3   :  { %3300 = sst [smem:[#allocation30_spill]] %s2161_s13  ;;  %v542_v15 = vadd.f32 %v540_v53, %v526_v51  ;;  %v558_v57 = vmul.f32 %v557_v30, %v1707_v22  ;;  %v270_v25 = vmul.f32 %v269_v56, %v1750_v36  ;;  %v287_v63 = vstv %s2083_s15  ;;  %s2180_s1 = sld [smem:[#allocation9 + $0x9]] }
  0xa4   :  { %3302 = sst [smem:[#allocation32_spill]] %s2167_s16  ;;  %v418_v60 = vadd.f32 %v416_v59, %v400_v31  ;;  %v434_v49 = vmul.f32 %v433_v38, %v1723_v26  ;;  %v254_v7 = vadd.f32 %v252_v12, %v236_v61  ;;  %v271_v45 = vmul.f32 %v269_v56, %v1744_v33  ;;  %s2186_s15 = sld [smem:[#allocation9 + $0x24]] }
  0xa5   :  { %3303 = sst [smem:[#allocation33_spill]] %s2169_s18  ;;  %v579_v22 = vadd.f32 %v577_v50, %v561_v1  ;;  %v595_v9 = vmul.f32 %v593_v3, %v1662_v4  ;;  %v255_v19 = vadd.f32 %v253_v21, %v237_v39  ;;  %v437_v54 = vadd.f32 %v435_v14, %v419_v11  ;;  %s2239_s18 = sld [smem:[#allocation9 + $0x48]]  ;;  %v1478_v11 = vld [vmem:[#allocation2 + $0x28] sm:$0xff] }
  0xa6   :  { %3301 = sst [smem:[#allocation31_spill]] %s2163_s14  ;;  %v453_v37 = vmul.f32 %v451_v55, %v1744_v33  ;;  %v611_v40 = vstv %s2116_s4  ;;  %v469_v23 = vstv %s2103_s3  ;;  %v560_v62 = vadd.f32 %v558_v57, %v542_v15  ;;  %s2199_s4 = sld [smem:[#allocation9 + $0xe]] }
  0xa7   :  { %3309 = sst [smem:[#allocation39_spill]] %s2188_s21  ;;  %v576_v17 = vmul.f32 %v575_v48, %v1733_v28  ;;  %v288_v4 = vmul.f32 %v287_v63, %v1664_v5  ;;  %v305_v8 = vstv %s2090_s17  ;;  %v436_v18 = vadd.f32 %v434_v49, %v418_v60  ;;  %s2205_s3 = sld [smem:[#allocation9 + $0xb]] }
  0xa8   :  { %3304 = sst [smem:[#allocation34_spill]] %s2174_s22  ;;  %v452_v27 = vmul.f32 %v451_v55, %v1750_v36  ;;  %v272_v29 = vadd.f32 %v270_v25, %v254_v7  ;;  %v289_v30 = vmul.f32 %v287_v63, %v1666_v6  ;;  %v597_v28 = vadd.f32 %v595_v9, %v579_v22  ;;  %s2211_s17 = sld [smem:[#allocation9 + $0x15]] }
  0xa9   :  { %3306 = sst [smem:[#allocation36_spill]] %s2180_s1  ;;  %v613_v34 = vmul.f32 %v611_v40, %v1818_v13  ;;  %v273_v5 = vadd.f32 %v271_v45, %v255_v19  ;;  %v455_v24 = vadd.f32 %v453_v37, %v437_v54  ;;  %v471_v20 = vmul.f32 %v469_v23, %v1666_v6  ;;  %v1477_v6 = vld [vmem:[#allocation2 + $0x20] sm:$0xff]  ;;  %s2250_s22 = sld [smem:[#allocation9 + $0x14]] }
  0xaa   :  { %3308 = sst [smem:[#allocation38_spill]] %s2186_s15  ;;  %v629_v41 = vstv %s2118_s23  ;;  %v84_v2 = vand.u32 127, %v83_v0  ;;  %v487_v32 = vstv %s2105_s19  ;;  %v578_v42 = vadd.f32 %v576_v17, %v560_v62  ;;  %s2222_s23 = sld [smem:[#allocation9 + $0x4b]] }
  0xab   :  { %3310 = sst [smem:[#allocation40_spill]] %s2192_s27  ;;  %v594_v43 = vmul.f32 %v1476_v35, %v593_v3  ;;  %v306_v13 = vmul.f32 %v305_v8, %v1766_v44  ;;  %v454_v46 = vadd.f32 %v452_v27, %v436_v18  ;;  %v470_v52 = vmul.f32 %v1477_v6, %v469_v23  ;;  %s2228_s19 = sld [smem:[#allocation9 + $0x12]] }
  0xac   :  { %3312 = sst [smem:[#allocation42_spill]] %s2199_s4  ;;  %v290_v47 = vadd.f32 %v288_v4, %v272_v29  ;;  %v307_v0 = vmul.f32 %v305_v8, %v1825_v16  ;;  %v615_v48 = vadd.f32 %v613_v34, %v597_v28  ;;  %v631_v38 = vmul.f32 %v629_v41, %v1744_v33  ;;  %s2252_s27 = sld [smem:[#allocation9 + $0x2c]] }
  0xad   :  { %3314 = sst [smem:[#allocation44_spill]] %s2205_s3  ;;  %s2213_s4 = sld [smem:[#allocation9 + $0x20]]  ;;  %v291_v51 = vadd.f32 %v289_v30, %v273_v5  ;;  %v473_v53 = vadd.f32 %v471_v20, %v455_v24  ;;  %v489_v12 = vmul.f32 %v487_v32, %v1825_v16  ;;  %v647_v56 = vstv %s2123_s24 }
  0xae   :  { %3315 = sst [smem:[#allocation45_spill]] %s2207_s29  ;;  %s2224_s29 = sld [smem:[#allocation9 + $0x29]]  ;;  %v89_v31 = vand.u32 15, %v84_v2  ;;  %v596_v59 = vadd.f32 %v594_v43, %v578_v42  ;;  %v612_v61 = vmul.f32 %v611_v40, %v1723_v26  ;;  %v472_v33 = vadd.f32 %v470_v52, %v454_v46 }
  0xaf   :  { %3316 = sst [smem:[#allocation46_spill]] %s2211_s17  ;;  %s2219_s3 = sld [smem:[#allocation9 + $0x23]]  ;;  %v488_v21 = vmul.f32 %v487_v32, %v1766_v44  ;;  %v665_v1 = vstv %s2129_s26  ;;  %v337_v50 = vstv %s2097_s0  ;;  %v633_v39 = vadd.f32 %v631_v38, %v615_v48 }
  0xb0   :  { %3320 = sst [smem:[#allocation50_spill]] %s2222_s23  ;;  %s2241_s23 = sld [smem:[#allocation9 + $0x4e]]  ;;  %v649_v14 = vmul.f32 %v1478_v11, %v647_v56  ;;  %v2254_v26 = vadd.f32 %v306_v13, %v290_v47  ;;  %v2256_v3 = vadd.f32 %v307_v0, %v291_v51  ;;  %v2258_v55 = vadd.f32 %v489_v12, %v473_v53 }
  0xb1   :  { %3322 = sst [smem:[#allocation52_spill]] %s2228_s19  ;;  %s2247_s24 = sld [smem:[#allocation9 + $0x26]]  ;;  %v515_v15 = vstv %s2110_s20  ;;  %vm2265_vm4 = vcmp.ne.s32.totalorder %v89_v31, 0  ;;  %v3334_v57 = vmov 0  ;;  %v667_v25 = vmul.f32 %v665_v1, %v1825_v16 }
  0xb2   :  { %3326 = sst [smem:[#allocation56_spill]] %s2239_s18  ;;  %s2261_s26 = sld [smem:[#allocation9 + $0x1a]]  ;;  %v3335_v57 = vsel %vm2265_vm4, 4294967295, %v3334_v57  ;;  %v614_v63 = vadd.f32 %v612_v61, %v596_v59  ;;  %v630_v60 = vmul.f32 %v629_v41, %v1750_v36  ;;  %v648_v49 = vmul.f32 %v1477_v6, %v647_v56 }
  0xb3   :  { %3317 = sst [smem:[#allocation47_spill]] %s2213_s4  ;;  %3336 = vst [vmem:[#allocation64_spill] sm:$0xff] %v3335_v57  ;;  %s2271_s0 = sld [smem:[#allocation9 + $0x32]]  ;;  %v2275_v7 = vadd.f32 %v488_v21, %v472_v33  ;;  %v2278_v45 = vmul.f32 %v665_v1, %v1766_v44  ;;  %v735_v16 = vstv %s2142_s30  ;;  %vm2286_vm5 = vcmp.ne.s32.totalorder %v89_v31, 15 }
  0xb4   :  { %3321 = sst [smem:[#allocation51_spill]] %s2224_s29  ;;  %s2234_s4 = sld [smem:[#allocation9 + $0x2d]]  ;;  %v3340_v36 = vmov 0  ;;  %v651_v9 = vadd.f32 %v649_v14, %v633_v39  ;;  %v747_v19 = vstv %s2125_s25  ;;  %v765_v54 = vstv %s2144_s6 }
  0xb5   :  { %3319 = sst [smem:[#allocation49_spill]] %s2219_s3  ;;  %s2230_s3 = sld [smem:[#allocation9 + $0x18]]  ;;  %v3341_v36 = vsel %vm2286_vm5, 4294967295, %v3340_v36  ;;  %v783_v37 = vstv %s2180_s1  ;;  %v801_v44 = vstv %s2161_s13  ;;  %v819_v40 = vstv %s2182_s8 }
  0xb6   :  { %s2236_s29 = sld [smem:[#allocation9 + $0x33]]  ;;  %3327 = sst [smem:[#allocation57_spill]] %s2241_s23  ;;  %3342 = vst [vmem:[#allocation68_spill] sm:$0xff] %v3341_v36  ;;  %v632_v17 = vadd.f32 %v630_v60, %v614_v63  ;;  %v913_v8 = vstv %s2149_s9  ;;  %v925_v18 = vstv %s2131_s28  ;;  %v943_v27 = vstv %s2151_s10 }
  0xb7   :  { %3329 = sst [smem:[#allocation59_spill]] %s2247_s24  ;;  %s2263_s24 = sld [smem:[#allocation9 + $0x38]]  ;;  %v961_v29 = vstv %s2186_s15  ;;  %v979_v30 = vstv %s2163_s14  ;;  %v2320_v34 = vadd.f32 %v667_v25, %v651_v9  ;;  %v1091_v41 = vstv %s2157_s12 }
  0xb8   :  { %3330 = sst [smem:[#allocation60_spill]] %s2250_s22  ;;  %s2273_s20 = sld [smem:[#allocation9 + $0x3b]]  ;;  %v1103_v2 = vstv %s2135_s2  ;;  %v1121_v32 = vstv %s2167_s16  ;;  %v650_v35 = vadd.f32 %v648_v49, %v632_v17 }
  0xb9   :  { %3331 = sst [smem:[#allocation61_spill]] %s2252_s27  ;;  %s2284_s27 = sld [smem:[#allocation9 + $0x41]] }
  0xba   :  { %3324 = sst [smem:[#allocation54_spill]] %s2234_s4  ;;  %s2301_s30 = sld [smem:[#allocation9 + $0x35]]  ;;  %v2371_v1 = vadd.f32 %v2278_v45, %v650_v35 }
  0xbb   :  { %3323 = sst [smem:[#allocation53_spill]] %s2230_s3  ;;  %s2295_s11 = sld [smem:[#allocation9 + $0x44]] }
  0xbc   :  { %3325 = sst [smem:[#allocation55_spill]] %s2236_s29  ;;  %s2308_s1 = sld [smem:[#allocation9 + $0x1]] }
  0xbd   :  { %3332 = sst [smem:[#allocation62_spill]] %s2261_s26  ;;  %s3348_s19 = sld [smem:[#allocation40_spill]] }
  0xbe   :  { %3333 = sst [smem:[#allocation63_spill]] %s2263_s24  ;;  %s2282_s24 = sld [smem:[#allocation9 + $0x3e]] }
  0xbf   :  { %3337 = sst [smem:[#allocation65_spill]] %s2271_s0  ;;  %s2310_s13 = sld [smem:[#allocation9 + $0x4]] }
  0xc0   :  { %3338 = sst [smem:[#allocation66_spill]] %s2273_s20  ;;  %s3349_s17 = sld [smem:[#allocation34_spill]] }
  0xc1   :  { %3339 = sst [smem:[#allocation67_spill]] %s2284_s27  ;;  %s2293_s20 = sld [smem:[#allocation9 + $0x2f]] }
  0xc2   :  { %3344 = sst [smem:[#allocation70_spill]] %s2301_s30  ;;  %s2303_s27 = sld [smem:[#allocation9 + $0x47]] }
  0xc3   :  { %3346 = sst [smem:[#allocation72_spill]] %s2308_s1  ;;  %s2316_s8 = sld [smem:[#allocation9 + $0x4a]]  ;;  %v1139_v42 = vstv %s3348_s19 }
  0xc4   :  { %s2318_s25 = sld [smem:[#allocation9 + $0x4d]]  ;;  %s2325_s9 = sld [smem:[#allocation9 + $0x50]] }
  0xc5   :  { %3347 = sst [smem:[#allocation73_spill]] %s2310_s13  ;;  %s3354_s10 = sld [smem:[#allocation33_spill]] }
  0xc6   :  { %s2327_s15 = sld [smem:[#allocation9 + $0x1f]]  ;;  %s3356_s21 = sld [smem:[#allocation23_spill]]  ;;  %v1157_v43 = vstv %s3349_s17 }
  0xc7   :  { %3343 = sst [smem:[#allocation69_spill]] %s2293_s20  ;;  %s2333_s14 = sld [smem:[#allocation9 + $0x7]] }
  0xc8   :  { %3345 = sst [smem:[#allocation71_spill]] %s2303_s27  ;;  %s3357_s28 = sld [smem:[#allocation35_spill]] }
  0xc9   :  { %3350 = sst [smem:[#allocation74_spill]] %s2316_s8  ;;  %s2335_s13 = sld [smem:[#allocation9 + $0x1c]] }
  0xca   :  { %3353 = sst [smem:[#allocation75_spill]] %s2325_s9  ;;  %s3360_s7 = sld [smem:[#allocation42_spill]] }
  0xcb   :  { %s2340_s1 = sld [smem:[#allocation9 + $0xd]]  ;;  %v743_v47 = vstv %s3354_s10  ;;  %s2348_s19 = sld [smem:[#allocation9 + $0xa]] }
  0xcc   :  { %3355 = sst [smem:[#allocation76_spill]] %s2327_s15  ;;  %s2342_s15 = sld [smem:[#allocation9 + $0x3a]]  ;;  %v759_v0 = vstv %s3356_s21 }
  0xcd   :  { %s2350_s16 = sld [smem:[#allocation9 + $0x10]]  ;;  %s3363_s17 = sld [smem:[#allocation43_spill]] }
  0xce   :  { %s3364_s6 = sld [smem:[#allocation47_spill]]  ;;  %v777_v51 = vstv %s3357_s28  ;;  %s3365_s18 = sld [smem:[#allocation49_spill]] }
  0xcf   :  { %3358 = sst [smem:[#allocation77_spill]] %s2335_s13  ;;  %s2356_s12 = sld [smem:[#allocation9 + $0x22]] }
  0xd0   :  { %v813_v12 = vstv %s3360_s7  ;;  %s2358_s23 = sld [smem:[#allocation9 + $0x37]]  ;;  %s3368_s10 = sld [smem:[#allocation51_spill]] }
  0xd1   :  { %s3369_s21 = sld [smem:[#allocation61_spill]]  ;;  %s2367_s4 = sld [smem:[#allocation9 + $0x28]] }
  0xd2   :  { %3362 = sst [smem:[#allocation78_spill]] %s2342_s15  ;;  %s2365_s2 = sld [smem:[#allocation9 + $0x13]] }
  0xd3   :  { %v921_v39 = vstv %s3363_s17  ;;  %s3371_s29 = sld [smem:[#allocation63_spill]]  ;;  %s2375_s7 = sld [smem:[#allocation9 + $0x16]] }
  0xd4   :  { %v937_v11 = vstv %s3364_s6  ;;  %s3373_s22 = sld [smem:[#allocation66_spill]]  ;;  %s2377_s26 = sld [smem:[#allocation9 + $0x19]]  ;;  %v955_v25 = vstv %s3365_s18 }
  0xd5   :  { %v327_v48 = vpop.permute.xlu1 %326  ;;  %s2384_s28 = sld [smem:[#allocation9 + $0x25]]  ;;  %s2386_s17 = sld [smem:[#allocation9 + $0x2b]] }
  0xd6   :  { %3367 = sst [smem:[#allocation79_spill]] %s2358_s23  ;;  %v332_v14 = vsel %vm2286_vm5, %v327_v48, 0.0  ;;  %v991_v60 = vstv %s3368_s10  ;;  %s2391_s6 = sld [smem:[#allocation9 + $0x2e]] }
  0xd7   :  { %s2393_s15 = sld [smem:[#allocation9 + $0x3d]]  ;;  %s2399_s18 = sld [smem:[#allocation9 + $0x31]] }
  0xd8   :  { %3370 = sst [smem:[#allocation61_spill]] %s2365_s2  ;;  %s3379_s10 = sld [smem:[#allocation73_spill]] }
  0xd9   :  { %3372 = sst [smem:[#allocation63_spill]] %s2375_s7  ;;  %v3282_v35 = vstv %s3371_s29  ;;  %s2407_s30 = sld [smem:[#allocation9 + $0x40]] }
  0xda   :  { %3374 = sst [smem:[#allocation66_spill]] %s2377_s26  ;;  %v1115_v48 = vstv %s3373_s22  ;;  %s2409_s20 = sld [smem:[#allocation9 + $0x43]] }
  0xdb   :  { %3376 = sst [smem:[#allocation80_spill]] %s2384_s28  ;;  %s3383_s0 = sld [smem:[#allocation76_spill]] }
  0xdc   :  { %3377 = sst [smem:[#allocation81_spill]] %s2386_s17  ;;  %s2401_s17 = sld [smem:[#allocation9 + $0x34]] }
  0xdd   :  { %v317_v38 = vpop.permute.xlu0 %316  ;;  %3384 = sst [smem:[#allocation76_spill]] %s2415_s5  ;;  %s2417_s27 = sld [smem:[#allocation9 + $0x49]] }
  0xde   :  { %v322_v31 = vsel %vm2265_vm4, %v317_v38, 0.0  ;;  %v3281_v38 = vstv %s2282_s24  ;;  %v3273_v4 = vstv %s3379_s10  ;;  %s3386_s9 = sld [smem:[#allocation81_spill]]  ;;  %s3387_s3 = sld [smem:[#allocation79_spill]] }
  0xdf   :  { %v324_v21 = vadd.f32 %v322_v31, %v2254_v26  ;;  %s3388_s8 = sld [smem:[#allocation78_spill]]  ;;  %s3414_s28 = sld [smem:[#allocation39_spill]] }
  0xe0   :  { %3382 = sst [smem:[#allocation18_spill]] %s2409_s20  ;;  %s3415_s5 = sld [smem:[#allocation41_spill]] }
  0xe1   :  { %v334_v26 = vadd.f32 %v332_v14, %v324_v21  ;;  %v3280_v14 = vstv %s2295_s11  ;;  %s3416_s20 = sld [smem:[#allocation44_spill]]  ;;  %s3426_s26 = sld [smem:[#allocation45_spill]] }
  0xe2   :  { %3381 = sst [smem:[#allocation73_spill]] %s2401_s17  ;;  %s3417_s13 = sld [smem:[#allocation28_spill]] }
  0xe3   :  { %3385 = sst [smem:[#allocation82_spill]] %s2417_s27  ;;  %v338_v45 = vadd.f32 %v337_v50, %v334_v26  ;;  %s3419_s17 = sld [smem:[#allocation59_spill]] }
  0xe4   :  { %v329_v31 = vpop.permute.xlu1 %328  ;;  %v319_v17 = vpop.permute.xlu0 %318  ;;  %s3429_s2 = sld [smem:[#allocation67_spill]]  ;;  %s3431_s7 = sld [smem:[#allocation46_spill]] }
  0xe5   :  { %v323_v46 = vsel %vm2265_vm4, %v319_v17, 0.0  ;;  %v333_v9 = vsel %vm2286_vm5, %v329_v31, 0.0  ;;  %v340_v52 = vmax.f32 %v338_v45, 0.0  ;;  %s3433_s23 = sld [smem:[#allocation48_spill]]  ;;  %s3434_s27 = sld [smem:[#allocation50_spill]] }
  0xe6   :  { %v325_v20 = vadd.f32 %v323_v46, %v2256_v3  ;;  %v3276_v3 = vstv %s3383_s0  ;;  %s3436_s22 = sld [smem:[#allocation58_spill]] }
  0xe7   :  { %v748_v24 = vmul.f32 %v747_v19, %v340_v52  ;;  %v926_v17 = vmul.f32 %v925_v18, %v340_v52  ;;  %v2468_v6 = vmul.f32 %v937_v11, %v340_v52  ;;  %v2472_v5 = vmul.f32 %v1115_v48, %v340_v52 }
  0xe8   :  { %v335_v23 = vadd.f32 %v333_v9, %v325_v20  ;;  %v501_v33 = vpop.permute.xlu1 %500  ;;  %v3279_v20 = vstv %s3388_s8  ;;  %v1104_v9 = vmul.f32 %v1103_v2, %v340_v52  ;;  %v2476_v62 = vmul.f32 %v3273_v4, %v340_v52 }
  0xe9   :  { %v503_v31 = vsel %vm2265_vm4, %v501_v33, 0.0  ;;  %v760_v33 = vmul.f32 %v759_v0, %v340_v52  ;;  %v2501_v22 = vmul.f32 %v3279_v20, %v340_v52 }
  0xea   :  { %v339_v26 = vadd.f32 %v337_v50, %v335_v23  ;;  %v698_v50 = vrot.slane %v340_v52, 7  ;;  %v704_v23 = vrot.slane %v340_v52, 1  ;;  %v505_v61 = vadd.f32 %v503_v31, %v2258_v55 }
  0xeb   :  { %v2488_v31 = vmul.f32 %v3276_v3, %v340_v52 }
  0xec   :  { %v2449_v45 = vmax.f32 %v339_v26, 0.0 }
  0xee   :  { %v699_v59 = vrot.slane %v2449_v45, 7  ;;  %v705_v26 = vrot.slane %v2449_v45, 1  ;;  %v927_v3 = vmul.f32 %v925_v18, %v2449_v45  ;;  %v939_v20 = vmul.f32 %v937_v11, %v2449_v45 }
  0xef   :  { %v499_v46 = vpop.permute.xlu0 %498 }
  0xf0   :  { %v2480_v21 = vsel %vm116_vm1, %v698_v50, %v699_v59  ;;  %v707_v49 = vsel %vm127_vm2, %v705_v26, %v704_v23  ;;  %v701_v55 = vsel %vm116_vm1, %v699_v59, %v698_v50  ;;  %v502_v4 = vsel %vm2265_vm4, %v499_v46, 0.0 }
  0xf1   :  { %v737_v56 = vmul.f32 %v735_v16, %v2480_v21  ;;  %v2497_v63 = vsel %vm102_vm0, %v701_v55, 0.0  ;;  %v2505_v59 = vsel %vm105_vm3, %v707_v49, 0.0  ;;  %v749_v46 = vmul.f32 %v747_v19, %v2449_v45 }
  0xf2   :  { %v736_v50 = vmul.f32 %v735_v16, %v2497_v63  ;;  %v2518_v52 = vsel %vm127_vm2, %v704_v23, %v705_v26  ;;  %v915_v49 = vmul.f32 %v913_v8, %v2480_v21  ;;  %v914_v55 = vmul.f32 %v913_v8, %v2497_v63 }
  0xf3   :  { %v1105_v19 = vmul.f32 %v1103_v2, %v2449_v45  ;;  %v504_v16 = vadd.f32 %v502_v4, %v2275_v7  ;;  %v1093_v23 = vmul.f32 %v1091_v41, %v2480_v21  ;;  %v761_v26 = vmul.f32 %v759_v0, %v2449_v45 }
  0xf4   :  { %v509_v18 = vpop.permute.xlu1 %508  ;;  %v751_v2 = vadd.f32 %v749_v46, %v737_v56  ;;  %v767_v7 = vmul.f32 %v765_v54, %v2505_v59  ;;  %v1092_v4 = vmul.f32 %v1091_v41, %v2497_v63  ;;  %v750_v13 = vadd.f32 %v748_v24, %v736_v50 }
  0xf5   :  { %v511_v8 = vsel %vm2286_vm5, %v509_v18, 0.0  ;;  %v766_v0 = vmul.f32 %v765_v54, %v2518_v52  ;;  %v945_v11 = vmul.f32 %v943_v27, %v2505_v59  ;;  %v929_v28 = vadd.f32 %v927_v3, %v915_v49 }
  0xf6   :  { %v513_v53 = vadd.f32 %v511_v8, %v505_v61  ;;  %v928_v56 = vadd.f32 %v926_v17, %v914_v55  ;;  %v1123_v46 = vmul.f32 %v1121_v32, %v2505_v59  ;;  %v745_v18 = vmul.f32 %v743_v47, %v2480_v21 }
  0xf7   :  { %v1107_v61 = vadd.f32 %v1105_v19, %v1093_v23  ;;  %v1106_v24 = vadd.f32 %v1104_v9, %v1092_v4  ;;  %v744_v54 = vmul.f32 %v743_v47, %v2497_v63  ;;  %v769_v8 = vadd.f32 %v767_v7, %v751_v2 }
  0xf8   :  { %v517_v41 = vadd.f32 %v515_v15, %v513_v53  ;;  %v944_v17 = vmul.f32 %v943_v27, %v2518_v52  ;;  %v1122_v3 = vmul.f32 %v1121_v32, %v2518_v52  ;;  %v923_v49 = vmul.f32 %v921_v39, %v2480_v21 }
  0xf9   :  { %v763_v47 = vadd.f32 %v761_v26, %v745_v18  ;;  %v779_v55 = vmul.f32 %v777_v51, %v2505_v59  ;;  %v768_v23 = vadd.f32 %v766_v0, %v750_v13  ;;  %v947_v27 = vadd.f32 %v945_v11, %v929_v28 }
  0xfa   :  { %v507_v50 = vpop.permute.xlu0 %506  ;;  %v2573_v53 = vmax.f32 %v517_v41, 0.0  ;;  %v922_v2 = vmul.f32 %v921_v39, %v2497_v63  ;;  %v946_v32 = vadd.f32 %v944_v17, %v928_v56  ;;  %v1125_v7 = vadd.f32 %v1123_v46, %v1107_v61 }
  0xfb   :  { %v510_v9 = vsel %vm2286_vm5, %v507_v50, 0.0  ;;  %v1124_v4 = vadd.f32 %v1122_v3, %v1106_v24  ;;  %v762_v41 = vadd.f32 %v760_v33, %v744_v54  ;;  %v778_v26 = vmul.f32 %v777_v51, %v2518_v52 }
  0xfc   :  { %v512_v19 = vadd.f32 %v510_v9, %v504_v16  ;;  %v941_v16 = vadd.f32 %v939_v20, %v923_v49  ;;  %v957_v28 = vmul.f32 %v955_v25, %v2505_v59  ;;  %v711_v39 = vrot.slane %v2573_v53, 7 }
  0xfd   :  { %v717_v0 = vrot.slane %v2573_v53, 1  ;;  %v2593_v11 = vadd.f32 %v779_v55, %v763_v47  ;;  %v940_v33 = vadd.f32 %v2468_v6, %v922_v2  ;;  %v803_v20 = vmul.f32 %v801_v44, %v2573_v53 }
  0xfe   :  { %v516_v50 = vadd.f32 %v515_v15, %v512_v19  ;;  %v679_v13 = vpop.permute.xlu1 %678  ;;  %v981_v56 = vmul.f32 %v979_v30, %v2573_v53  ;;  %v1159_v46 = vmul.f32 %v1157_v43, %v2573_v53  ;;  %v2612_v6 = vmul.f32 %v813_v12, %v2573_v53 }
  0xff   :  { %v681_v51 = vsel %vm2265_vm4, %v679_v13, 0.0  ;;  %v2614_v18 = vadd.f32 %v778_v26, %v762_v41  ;;  %v956_v61 = vmul.f32 %v955_v25, %v2518_v52  ;;  %v2621_v17 = vadd.f32 %v957_v28, %v941_v16 }
 0x100   :  { %v2596_v15 = vmax.f32 %v516_v50, 0.0  ;;  %v2626_v3 = vmul.f32 %v991_v60, %v2573_v53  ;;  %v683_v49 = vadd.f32 %v681_v51, %v2320_v34  ;;  %v1101_v25 = vmul.f32 %v3282_v35, %v2480_v21 }
 0x101   :  { %v2629_v9 = vadd.f32 %v956_v61, %v940_v33  ;;  %v1117_v47 = vmul.f32 %v1115_v48, %v2449_v45  ;;  %v2648_v34 = vmul.f32 %v3281_v38, %v2505_v59  ;;  %v2663_v26 = vmul.f32 %v3280_v14, %v2573_v53 }
 0x102   :  { %v710_v24 = vrot.slane %v2596_v15, 7  ;;  %v716_v54 = vrot.slane %v2596_v15, 1  ;;  %v802_v50 = vmul.f32 %v801_v44, %v2596_v15  ;;  %v980_v13 = vmul.f32 %v979_v30, %v2596_v15 }
 0x104   :  { %v2639_v55 = vsel %vm116_vm1, %v710_v24, %v711_v39  ;;  %v719_v19 = vsel %vm127_vm2, %v717_v0, %v716_v54  ;;  %v713_v2 = vsel %vm116_vm1, %v711_v39, %v710_v24  ;;  %v1158_v39 = vmul.f32 %v1157_v43, %v2596_v15 }
 0x105   :  { %v785_v41 = vmul.f32 %v783_v37, %v2639_v55  ;;  %v2655_v48 = vsel %vm102_vm0, %v713_v2, 0.0  ;;  %v963_v28 = vmul.f32 %v961_v29, %v2639_v55  ;;  %v677_v44 = vpop.permute.xlu0 %676  ;;  %v2679_v33 = vsel %vm105_vm3, %v719_v19, 0.0 }
 0x106   :  { %v784_v16 = vmul.f32 %v783_v37, %v2655_v48  ;;  %v2683_v37 = vsel %vm127_vm2, %v716_v54, %v717_v0  ;;  %v962_v61 = vmul.f32 %v961_v29, %v2655_v48  ;;  %v1141_v43 = vmul.f32 %v1139_v42, %v2639_v55 }
 0x107   :  { %v787_v51 = vadd.f32 %v785_v41, %v769_v8  ;;  %v965_v24 = vadd.f32 %v963_v28, %v947_v27  ;;  %v814_v2 = vmul.f32 %v813_v12, %v2596_v15  ;;  %v1140_v8 = vmul.f32 %v1139_v42, %v2655_v48 }
 0x108   :  { %v786_v30 = vadd.f32 %v784_v16, %v768_v23  ;;  %v964_v14 = vadd.f32 %v962_v61, %v946_v32  ;;  %v2700_v0 = vmul.f32 %v991_v60, %v2596_v15  ;;  %v1119_v54 = vadd.f32 %v1117_v47, %v1101_v25 }
 0x109   :  { %v680_v29 = vsel %vm2265_vm4, %v677_v44, 0.0  ;;  %v687_v23 = vpop.permute.xlu1 %686  ;;  %v821_v12 = vmul.f32 %v819_v40, %v2679_v33  ;;  %v820_v27 = vmul.f32 %v819_v40, %v2683_v37  ;;  %v1143_v42 = vadd.f32 %v1141_v43, %v1125_v7 }
 0x10a   :  { %v689_v60 = vsel %vm2286_vm5, %v687_v23, 0.0  ;;  %v805_v32 = vadd.f32 %v803_v20, %v787_v51  ;;  %v3418_v25 = vstv %s3414_s28  ;;  %v1142_v19 = vadd.f32 %v1140_v8, %v1124_v4  ;;  %s3438_s28 = sld [smem:[#allocation65_spill]] }
 0x10b   :  { %v999_v47 = vmul.f32 %v3418_v25, %v2679_v33  ;;  %v691_v41 = vadd.f32 %v689_v60, %v683_v49  ;;  %v804_v16 = vadd.f32 %v802_v50, %v786_v30  ;;  %v983_v28 = vadd.f32 %v981_v56, %v965_v24 }
 0x10c   :  { %v3420_v44 = vmov %v3418_v25  ;;  %v682_v40 = vadd.f32 %v680_v29, %v2371_v1  ;;  %v982_v38 = vadd.f32 %v980_v13, %v964_v14  ;;  %v3421_v7 = vstv %s3415_s5  ;;  %s3440_s5 = sld [smem:[#allocation71_spill]] }
 0x10d   :  { %v998_v61 = vmul.f32 %v3420_v44, %v2683_v37  ;;  %v1177_v43 = vmul.f32 %v3421_v7, %v2679_v33  ;;  %v3422_v23 = vstv %s3416_s20  ;;  %v3423_v51 = vstv %s3417_s13  ;;  %s3450_s20 = sld [smem:[#allocation54_spill]]  ;;  %s3452_s13 = sld [smem:[#allocation56_spill]] }
 0x10e   :  { %v797_v20 = vmul.f32 %v3422_v23, %v2639_v55  ;;  %v695_v35 = vadd.f32 %v3423_v51, %v691_v41  ;;  %v1161_v4 = vadd.f32 %v1159_v46, %v1143_v42  ;;  %v3424_v49 = vmov %v3421_v7 }
 0x10f   :  { %v1176_v50 = vmul.f32 %v3424_v49, %v2683_v37  ;;  %v3425_v56 = vmov %v3422_v23  ;;  %v823_v24 = vadd.f32 %v821_v12, %v805_v32  ;;  %v1160_v1 = vadd.f32 %v1158_v39, %v1142_v19  ;;  %v685_v46 = vpop.permute.xlu0 %684 }
 0x110   :  { %v796_v30 = vmul.f32 %v3425_v56, %v2655_v48  ;;  %v799_v14 = vadd.f32 %v797_v20, %v2593_v11  ;;  %v3427_v13 = vstv %s3419_s17  ;;  %v2737_v29 = vmax.f32 %v695_v35, 0.0  ;;  %s3468_s17 = sld [smem:[#allocation55_spill]] }
 0x111   :  { %v975_v8 = vmul.f32 %v3427_v13, %v2639_v55  ;;  %v822_v42 = vadd.f32 %v820_v27, %v804_v16  ;;  %v1001_v60 = vadd.f32 %v999_v47, %v983_v28  ;;  %v688_v12 = vsel %vm2286_vm5, %v685_v46, 0.0 }
 0x112   :  { %v798_v25 = vadd.f32 %v796_v30, %v2614_v18  ;;  %v1000_v32 = vadd.f32 %v998_v61, %v982_v38  ;;  %v3428_v11 = vmov %v3427_v13  ;;  %v690_v41 = vadd.f32 %v688_v12, %v682_v40 }
 0x113   :  { %v977_v39 = vadd.f32 %v975_v8, %v2621_v17  ;;  %v974_v19 = vmul.f32 %v3428_v11, %v2655_v48  ;;  %v1179_v35 = vadd.f32 %v1177_v43, %v1161_v4  ;;  %v3430_v44 = vstv %s3426_s26  ;;  %s3469_s26 = sld [smem:[#allocation57_spill]] }
 0x114   :  { %v833_v7 = vmul.f32 %v3430_v44, %v2679_v33  ;;  %v3432_v27 = vmov %v3430_v44  ;;  %v1178_v47 = vadd.f32 %v1176_v50, %v1160_v1  ;;  %v817_v38 = vadd.f32 %v2612_v6, %v799_v14 }
 0x115   :  { %v832_v18 = vmul.f32 %v3432_v27, %v2683_v37  ;;  %v3435_v17 = vstv %s3369_s21  ;;  %v3439_v40 = vmov %v3423_v51  ;;  %v723_v23 = vrot.slane %v2737_v29, 7  ;;  %s3446_s21 = sld [smem:[#allocation52_spill]] }
 0x116   :  { %v1011_v16 = vmul.f32 %v3435_v17, %v2679_v33  ;;  %v3437_v28 = vmov %v3435_v17  ;;  %v694_v43 = vadd.f32 %v3439_v40, %v690_v41  ;;  %v816_v20 = vadd.f32 %v814_v2, %v798_v25 }
 0x117   :  { %v1010_v61 = vmul.f32 %v3437_v28, %v2683_v37  ;;  %v1137_v51 = vadd.f32 %v2648_v34, %v1119_v54  ;;  %v729_v4 = vrot.slane %v2737_v29, 1  ;;  %v995_v6 = vadd.f32 %v2626_v3, %v977_v39 }
 0x118   :  { %v976_v49 = vadd.f32 %v974_v19, %v2629_v9  ;;  %v3441_v50 = vstv %s3429_s2  ;;  %v2769_v30 = vmax.f32 %v694_v43, 0.0  ;;  %v3442_v1 = vstv %s3431_s7  ;;  %s3474_s7 = smov 1  }
 0x119   :  { %v1153_v56 = vmul.f32 %v3441_v50, %v2639_v55  ;;  %v857_v14 = vmul.f32 %v3442_v1, %v2737_v29  ;;  %v3443_v2 = vstv %s3433_s23  ;;  %v3444_v34 = vstv %s3434_s27 }
 0x11a   :  { %v1035_v13 = vmul.f32 %v3443_v2, %v2737_v29  ;;  %v1213_v54 = vmul.f32 %v3444_v34, %v2737_v29  ;;  %v835_v8 = vadd.f32 %v833_v7, %v817_v38  ;;  %v3445_v3 = vstv %s3436_s22 }
 0x11b   :  { %v869_v9 = vmul.f32 %v3445_v3, %v2737_v29  ;;  %v3447_v46 = vstv %s3438_s28  ;;  %v3448_v12 = vstv %s3440_s5  ;;  %v722_v11 = vrot.slane %v2769_v30, 7 }
 0x11c   :  { %v2786_v25 = vmul.f32 %v3447_v46, %v2737_v29  ;;  %v2791_v39 = vmul.f32 %v3448_v12, %v2679_v33  ;;  %v728_v19 = vrot.slane %v2769_v30, 1  ;;  %v834_v41 = vadd.f32 %v832_v18, %v816_v20 }
 0x11d   :  { %v3449_v44 = vstv %s2318_s25  ;;  %v1013_v27 = vadd.f32 %v1011_v16, %v995_v6  ;;  %v994_v38 = vadd.f32 %v2700_v0, %v976_v49  ;;  %v1155_v17 = vadd.f32 %v1153_v56, %v1137_v51 }
 0x11e   :  { %v2798_v7 = vmul.f32 %v3449_v44, %v2737_v29  ;;  %v3451_v28 = vstv %s3371_s29  ;;  %v2806_v43 = vsel %vm116_vm1, %v722_v11, %v723_v23  ;;  %v731_v18 = vsel %vm127_vm2, %v729_v4, %v728_v19  ;;  %s3456_s29 = sld [smem:[#allocation53_spill]] }
 0x11f   :  { %v1100_v40 = vmul.f32 %v3451_v28, %v2497_v63  ;;  %v725_v20 = vsel %vm116_vm1, %v723_v23, %v722_v11  ;;  %v3453_v16 = vstv %s2282_s24  ;;  %v3454_v51 = vstv %s3446_s21  ;;  %s3460_s24 = sld [smem:[#allocation60_spill]]  ;;  %s3488_s21 = sld [smem:[#allocation72_spill]] }
 0x120   :  { %v2815_v0 = vmul.f32 %v3453_v16, %v2518_v52  ;;  %v839_v6 = vmul.f32 %v3454_v51, %v2806_v43  ;;  %v2822_v49 = vsel %vm102_vm0, %v725_v20, 0.0  ;;  %v3455_v50 = vmov %v3442_v1 }
 0x121   :  { %v856_v56 = vmul.f32 %v3455_v50, %v2769_v30  ;;  %v3457_v1 = vstv %s3429_s2  ;;  %v2834_v2 = vsel %vm105_vm3, %v731_v18, 0.0  ;;  %v2838_v34 = vsel %vm127_vm2, %v728_v19, %v729_v4  ;;  %s3472_s2 = sld [smem:[#allocation69_spill]] }
 0x122   :  { %v2830_v23 = vmul.f32 %v3457_v1, %v2655_v48  ;;  %v3458_v3 = vmov %v3454_v51  ;;  %v3459_v12 = vstv %s3450_s20  ;;  %v841_v44 = vadd.f32 %v839_v6, %v823_v24  ;;  %s3509_s20 = sld [smem:[#allocation66_spill]] }
 0x123   :  { %v838_v46 = vmul.f32 %v3458_v3, %v2822_v49  ;;  %v1017_v11 = vmul.f32 %v3459_v12, %v2806_v43  ;;  %v3461_v28 = vmov %v3459_v12  ;;  %v3462_v16 = vstv %s3433_s23  ;;  %s3477_s23 = sld [smem:[#allocation74_spill]] }
 0x124   :  { %v1016_v20 = vmul.f32 %v3461_v28, %v2822_v49  ;;  %v1034_v58 = vmul.f32 %v3462_v16, %v2769_v30  ;;  %v3463_v18 = vstv %s3452_s13  ;;  %v3465_v1 = vstv %s3434_s27  ;;  %s3480_s27 = sld [smem:[#allocation62_spill]] }
 0x125   :  { %v1195_v10 = vmul.f32 %v3463_v18, %v2806_v43  ;;  %v840_v4 = vadd.f32 %v838_v46, %v822_v42  ;;  %v1019_v19 = vadd.f32 %v1017_v11, %v1001_v60  ;;  %v3464_v51 = vmov %v3463_v18  ;;  %s3512_s13 = sld [smem:[#allocation80_spill]] }
 0x126   :  { %v1194_v50 = vmul.f32 %v3464_v51, %v2822_v49  ;;  %v1212_v3 = vmul.f32 %v3465_v1, %v2769_v30  ;;  %v859_v24 = vadd.f32 %v857_v14, %v841_v44  ;;  %v3466_v6 = vstv %s3456_s29 }
 0x127   :  { %v875_v12 = vmul.f32 %v3466_v6, %v2834_v2  ;;  %v3467_v28 = vmov %v3466_v6  ;;  %v1018_v36 = vadd.f32 %v1016_v20, %v1000_v32  ;;  %v858_v42 = vadd.f32 %v856_v56, %v840_v4 }
 0x128   :  { %v874_v16 = vmul.f32 %v3467_v28, %v2838_v34  ;;  %v1197_v60 = vadd.f32 %v1195_v10, %v1179_v35  ;;  %v1196_v46 = vadd.f32 %v1194_v50, %v1178_v47  ;;  %v3470_v11 = vstv %s3460_s24 }
 0x129   :  { %v851_v18 = vmul.f32 %v3470_v11, %v2806_v43  ;;  %v877_v51 = vadd.f32 %v875_v12, %v859_v24  ;;  %v1037_v14 = vadd.f32 %v1035_v13, %v1019_v19  ;;  %v3471_v44 = vstv %s3436_s22  ;;  %s3484_s22 = sld [smem:[#allocation70_spill]] }
 0x12a   :  { %v868_v1 = vmul.f32 %v3471_v44, %v2769_v30  ;;  %v1012_v6 = vadd.f32 %v1010_v61, %v994_v38  ;;  %v876_v57 = vadd.f32 %v874_v16, %v858_v42  ;;  %v1036_v28 = vadd.f32 %v1034_v58, %v1018_v36 }
 0x12b   :  { %v853_v32 = vadd.f32 %v851_v18, %v835_v8  ;;  %v3473_v56 = vstv %s3438_s28  ;;  %892 = vrot.lane.b32.xlu1 %v877_v51, %s3474_s7  ;;  %v3475_v35 = vstv %s3468_s17  ;;  %v3478_v4 = vstv %s3469_s26  ;;  %s3487_s28 = sld [smem:[#allocation75_spill]] }
 0x12c   :  { %v1046_v20 = vmul.f32 %v3473_v56, %v2769_v30  ;;  %v1053_v47 = vmul.f32 %v3475_v35, %v2834_v2  ;;  %v3476_v10 = vmov %v3475_v35  ;;  %v1231_v19 = vmul.f32 %v3478_v4, %v2834_v2  ;;  %890 = vrot.lane.b32.xlu0 %v876_v57, %s3474_s7 }
 0x12d   :  { %v1052_v13 = vmul.f32 %v3476_v10, %v2838_v34  ;;  %v3479_v61 = vmov %v3470_v11  ;;  %v1215_v8 = vadd.f32 %v1213_v54, %v1197_v60  ;;  %v1214_v38 = vadd.f32 %v1212_v3, %v1196_v46 }
 0x12e   :  { %v850_v36 = vmul.f32 %v3479_v61, %v2822_v49  ;;  %v3481_v58 = vmov %v3478_v4  ;;  %v3482_v24 = vstv %s3472_s2  ;;  %v1055_v16 = vadd.f32 %v1053_v47, %v1037_v14 }
 0x12f   :  { %v1230_v50 = vmul.f32 %v3481_v58, %v2838_v34  ;;  %v1029_v12 = vmul.f32 %v3482_v24, %v2806_v43  ;;  %v3483_v11 = vmov %v3482_v24  ;;  %v1173_v51 = vadd.f32 %v2663_v26, %v1155_v17 }
 0x130   :  { %v852_v42 = vadd.f32 %v850_v36, %v834_v41  ;;  %v1028_v18 = vmul.f32 %v3483_v11, %v2822_v49  ;;  %v1054_v44 = vadd.f32 %v1052_v13, %v1036_v28  ;;  %v871_v57 = vadd.f32 %v869_v9, %v853_v32  ;;  %1070 = vrot.lane.b32.xlu1 %v1055_v16, %s3474_s7 }
 0x131   :  { %v1031_v54 = vadd.f32 %v1029_v12, %v1013_v27  ;;  %v3485_v3 = vstv %s3477_s23  ;;  %v3486_v46 = vstv %s3480_s27  ;;  %v1191_v56 = vadd.f32 %v2791_v39, %v1173_v51 }
 0x132   :  { %v1207_v60 = vmul.f32 %v3485_v3, %v2806_v43  ;;  %v887_v41 = vmul.f32 %v3486_v46, %v2834_v2  ;;  %v1030_v14 = vadd.f32 %v1028_v18, %v1012_v6  ;;  %v1118_v35 = vadd.f32 %v2472_v5, %v1100_v40  ;;  %1068 = vrot.lane.b32.xlu0 %v1054_v44, %s3474_s7 }
 0x133   :  { %v1233_v26 = vadd.f32 %v1231_v19, %v1215_v8  ;;  %v1232_v9 = vadd.f32 %v1230_v50, %v1214_v38  ;;  %v870_v27 = vadd.f32 %v868_v1, %v852_v42  ;;  %v3489_v17 = vmov %v3486_v46 }
 0x134   :  { %v886_v28 = vmul.f32 %v3489_v17, %v2838_v34  ;;  %v3490_v32 = vstv %s3484_s22  ;;  %v1209_v5 = vadd.f32 %v1207_v60, %v1191_v56  ;;  %v1136_v40 = vadd.f32 %v2815_v0, %v1118_v35 }
 0x135   :  { %v1065_v47 = vmul.f32 %v3490_v32, %v2834_v2  ;;  %v3491_v6 = vmov %v3490_v32  ;;  %v889_v10 = vadd.f32 %v887_v41, %v871_v57  ;;  %v1049_v13 = vadd.f32 %v2786_v25, %v1031_v54  ;;  %1248 = vrot.lane.b32.xlu1 %v1233_v26, %s3474_s7 }
 0x136   :  { %v1064_v39 = vmul.f32 %v3491_v6, %v2838_v34  ;;  %v3492_v1 = vstv %s3487_s28  ;;  %v3493_v19 = vstv %s3488_s21  ;;  %v1048_v36 = vadd.f32 %v1046_v20, %v1030_v14  ;;  %1246 = vrot.lane.b32.xlu0 %v1232_v9, %s3474_s7 }
 0x137   :  { %v1243_v4 = vmul.f32 %v3492_v1, %v2834_v2  ;;  %v741_v61 = vmul.f32 %v3493_v19, %v2480_v21  ;;  %v1154_v8 = vadd.f32 %v2830_v23, %v1136_v40  ;;  %v3494_v0 = vstv %s2295_s11  ;;  %s3504_s11 = sld [smem:[#allocation61_spill]] }
 0x138   :  { %v1170_v38 = vmul.f32 %v3494_v0, %v2596_v15  ;;  %v3495_v25 = vstv %s3379_s10  ;;  %v888_v50 = vadd.f32 %v886_v28, %v870_v27  ;;  %v3496_v24 = vstv %s3440_s5  ;;  %s3502_s10 = sld [smem:[#allocation77_spill]]  ;;  %s3505_s5 = smov 127  }
 0x139   :  { %v755_v58 = vmul.f32 %v3495_v25, %v2449_v45  ;;  %v1188_v12 = vmul.f32 %v3496_v24, %v2683_v37  ;;  %v3497_v16 = vmov %v3485_v3  ;;  %v3498_v20 = vstv %s2333_s14  ;;  %900 = vrot.lane.b32.xlu1 %v889_v10, %s3505_s5  ;;  %s3536_s14 = sld [smem:[#allocation18_spill]] }
 0x13a   :  { %v1206_v42 = vmul.f32 %v3497_v16, %v2822_v49  ;;  %v773_v23 = vmul.f32 %v3498_v20, %v2505_v59  ;;  %v1227_v11 = vadd.f32 %v2798_v7, %v1209_v5  ;;  %v1172_v18 = vadd.f32 %v1170_v38, %v1154_v8  ;;  %898 = vrot.lane.b32.xlu0 %v888_v50, %s3505_s5 }
 0x13b   :  { %v757_v51 = vadd.f32 %v755_v58, %v741_v61  ;;  %v3499_v44 = vstv %s2348_s19  ;;  %v1067_v54 = vadd.f32 %v1065_v47, %v1049_v13  ;;  %v3500_v3 = vstv %s2318_s25  ;;  %s3508_s25 = sld [smem:[#allocation63_spill]] }
 0x13c   :  { %v791_v57 = vmul.f32 %v3499_v44, %v2639_v55  ;;  %v1224_v60 = vmul.f32 %v3500_v3, %v2769_v30  ;;  %v3501_v46 = vmov %v3492_v1  ;;  %v3503_v14 = vmov %v3493_v19 }
 0x13d   :  { %v1242_v41 = vmul.f32 %v3501_v46, %v2838_v34  ;;  %v740_v56 = vmul.f32 %v3503_v14, %v2497_v63  ;;  %v1066_v7 = vadd.f32 %v1064_v39, %v1048_v36  ;;  %v1190_v35 = vadd.f32 %v1188_v12, %v1172_v18  ;;  %1078 = vrot.lane.b32.xlu1 %v1067_v54, %s3505_s5 }
 0x13e   :  { %v775_v26 = vadd.f32 %v773_v23, %v757_v51  ;;  %v3506_v9 = vstv %s2340_s1  ;;  %v3507_v17 = vstv %s2350_s16  ;;  %v3510_v47 = vmov %v3498_v20  ;;  %s3060_s16 = sld [smem:[#allocation9 + $0x4f]]  ;;  %s3543_s1 = sld [smem:[#allocation82_spill]] }
 0x13f   :  { %v809_v27 = vmul.f32 %v3506_v9, %v2573_v53  ;;  %v827_v28 = vmul.f32 %v3507_v17, %v2679_v33  ;;  %v756_v32 = vadd.f32 %v2476_v62, %v740_v56  ;;  %v772_v6 = vmul.f32 %v3510_v47, %v2518_v52  ;;  %1076 = vrot.lane.b32.xlu0 %v1066_v7, %s3505_s5 }
 0x140   :  { %v3511_v39 = vmov %v3499_v44  ;;  %v1245_v40 = vadd.f32 %v1243_v4, %v1227_v11  ;;  %v1208_v10 = vadd.f32 %v1206_v42, %v1190_v35  ;;  %v793_v13 = vadd.f32 %v791_v57, %v775_v26 }
 0x141   :  { %v790_v5 = vmul.f32 %v3511_v39, %v2655_v48  ;;  %v3513_v1 = vstv %s3502_s10  ;;  %v3514_v61 = vstv %s3504_s11  ;;  %v774_v62 = vadd.f32 %v772_v6, %v756_v32 }
 0x142   :  { %v919_v19 = vmul.f32 %v3513_v1, %v2480_v21  ;;  %v845_v36 = vmul.f32 %v3514_v61, %v2806_v43  ;;  %v3515_v8 = vstv %s3383_s0  ;;  %v3516_v38 = vstv %s2356_s12  ;;  %1256 = vrot.lane.b32.xlu1 %v1245_v40, %s3505_s5  ;;  %s3032_s0 = sld [smem:[#allocation9 + $0x4c]]  ;;  %s3534_s12 = sld [smem:[#allocation73_spill]] }
 0x143   :  { %v933_v0 = vmul.f32 %v3515_v8, %v2449_v45  ;;  %v951_v25 = vmul.f32 %v3516_v38, %v2505_v59  ;;  %v1226_v4 = vadd.f32 %v1224_v60, %v1208_v10  ;;  %v811_v58 = vadd.f32 %v809_v27, %v793_v13 }
 0x144   :  { %v3517_v50 = vstv %s3508_s25  ;;  %v3518_v12 = vstv %s3509_s20  ;;  %v792_v42 = vadd.f32 %v790_v5, %v774_v62  ;;  %v3519_v20 = vmov %v3506_v9 }
 0x145   :  { %v863_v24 = vmul.f32 %v3517_v50, %v2737_v29  ;;  %v881_v16 = vmul.f32 %v3518_v12, %v2834_v2  ;;  %v808_v23 = vmul.f32 %v3519_v20, %v2596_v15  ;;  %v935_v11 = vadd.f32 %v933_v0, %v919_v19 }
 0x146   :  { %v3520_v18 = vstv %s3512_s13  ;;  %v829_v44 = vadd.f32 %v827_v28, %v811_v58  ;;  %v3521_v57 = vmov %v3507_v17  ;;  %v3522_v3 = vmov %v3514_v61 }
 0x147   :  { %v969_v51 = vmul.f32 %v3520_v18, %v2639_v55  ;;  %v826_v54 = vmul.f32 %v3521_v57, %v2683_v37  ;;  %v844_v60 = vmul.f32 %v3522_v3, %v2822_v49  ;;  %v3523_v46 = vmov %v3513_v1 }
 0x148   :  { %v918_v14 = vmul.f32 %v3523_v46, %v2497_v63  ;;  %v1244_v56 = vadd.f32 %v1242_v41, %v1226_v4  ;;  %v810_v7 = vadd.f32 %v808_v23, %v792_v42  ;;  %v3524_v35 = vmov %v3517_v50 }
 0x149   :  { %v862_v26 = vmul.f32 %v3524_v35, %v2769_v30  ;;  %v953_v9 = vadd.f32 %v951_v25, %v935_v11  ;;  %v847_v27 = vadd.f32 %v845_v36, %v829_v44  ;;  %v3525_v28 = vmov %v3516_v38 }
 0x14a   :  { %v934_v17 = vadd.f32 %v2488_v31, %v918_v14  ;;  %v950_v32 = vmul.f32 %v3525_v28, %v2518_v52  ;;  %v3526_v47 = vmov %v3520_v18  ;;  %1254 = vrot.lane.b32.xlu0 %v1244_v56, %s3505_s5  ;;  %v828_v41 = vadd.f32 %v826_v54, %v810_v7 }
 0x14b   :  { %v968_v6 = vmul.f32 %v3526_v47, %v2655_v48  ;;  %v971_v39 = vadd.f32 %v969_v51, %v953_v9  ;;  %v3527_v5 = vstv %s2367_s4  ;;  %v3528_v10 = vstv %s3386_s9  ;;  %s3112_s9 = sld [smem:[#allocation10 + $0x2]] }
 0x14c   :  { %v987_v40 = vmul.f32 %v3527_v5, %v2573_v53  ;;  %v1005_v13 = vmul.f32 %v3528_v10, %v2679_v33  ;;  %v865_v31 = vadd.f32 %v863_v24, %v847_v27  ;;  %v3529_v1 = vstv %s2391_s6  ;;  %s3105_s6 = sld [smem:[#allocation10 + $0x1]] }
 0x14d   :  { %v1023_v19 = vmul.f32 %v3529_v1, %v2806_v43  ;;  %v952_v61 = vadd.f32 %v950_v32, %v934_v17  ;;  %v3530_v36 = vstv %s3387_s3  ;;  %v846_v8 = vadd.f32 %v844_v60, %v828_v41 }
 0x14e   :  { %v1097_v62 = vmul.f32 %v3530_v36, %v2480_v21  ;;  %v989_v0 = vadd.f32 %v987_v40, %v971_v39  ;;  %v3531_v38 = vstv %s3388_s8  ;;  %v3532_v4 = vstv %s2393_s15  ;;  %s3541_s8 = sld [smem:[#allocation76_spill]] }
 0x14f   :  { %v1111_v25 = vmul.f32 %v3531_v38, %v2449_v45  ;;  %v1129_v58 = vmul.f32 %v3532_v4, %v2505_v59  ;;  %v3040_v50 = vadd.f32 %v881_v16, %v865_v31  ;;  %v3533_v24 = vmov %v3518_v12 }
 0x150   :  { %v880_v12 = vmul.f32 %v3533_v24, %v2838_v34  ;;  %v970_v21 = vadd.f32 %v968_v6, %v952_v61  ;;  %v3535_v42 = vmov %v3527_v5  ;;  %v864_v23 = vadd.f32 %v862_v26, %v846_v8 }
 0x151   :  { %v986_v20 = vmul.f32 %v3535_v42, %v2596_v15  ;;  %v1007_v11 = vadd.f32 %v1005_v13, %v989_v0  ;;  %v1113_v18 = vadd.f32 %v1111_v25, %v1097_v62  ;;  %v3537_v45 = vstv %s2407_s30  ;;  %s906_s30 = sld [smem:[#allocation10]] }
 0x152   :  { %v1147_v51 = vmul.f32 %v3537_v45, %v2639_v55  ;;  %v3538_v59 = vstv %s2399_s18  ;;  %v3539_v57 = vmov %v3528_v10  ;;  %v3540_v3 = vmov %v3529_v1  ;;  %s1596_s18 = smov [#allocation12]  }
 0x153   :  { %v1041_v16 = vmul.f32 %v3538_v59, %v2737_v29  ;;  %v988_v44 = vadd.f32 %v986_v20, %v970_v21  ;;  %v1004_v54 = vmul.f32 %v3539_v57, %v2683_v37  ;;  %v1022_v60 = vmul.f32 %v3540_v3, %v2822_v49  ;;  %s1287_s15 = sshll.u32 %s1596_s18, 4  ;;  %s1288_s15 = int_to_ptr.vmem [resolvable:$true] %s1287_s15 }
 0x154   :  { %v882_v46 = vadd.f32 %v880_v12, %v864_v23  ;;  %v1025_v14 = vadd.f32 %v1023_v19, %v1007_v11  ;;  %v1131_v56 = vadd.f32 %v1129_v58, %v1113_v18  ;;  %v3542_v55 = vmov %v3530_v36  ;;  %s1555_s4 = scalar_lea.vmem %s1288_s15, 768  ;;  %p1560_p1 = scmp.lt.s32.totalorder %s1288_s15, %s1288_s15 }
 0x155   :  { %v1096_v7 = vmul.f32 %v3542_v55, %v2497_v63  ;;  %v3544_v35 = vstv %s3534_s12  ;;  %v1006_v9 = vadd.f32 %v1004_v54, %v988_v44  ;;  %v3545_v27 = vstv %s3536_s14  ;;  %p1556_p0 = scmp.ne.s32.totalorder %s1288_s15, %s1555_s4  ;;  %p1561_p2 = scmp.lt.s32.totalorder %s1555_s4, %s1555_s4 }
 0x156   :  { %v1059_v26 = vmul.f32 %v3544_v35, %v2834_v2  ;;  %v1165_v17 = vmul.f32 %v3545_v27, %v2573_v53  ;;  %v3546_v28 = vmov %v3532_v4  ;;  %v1043_v47 = vadd.f32 %v1041_v16, %v1025_v14 }
 0x157   :  { %v1128_v32 = vmul.f32 %v3546_v28, %v2518_v52  ;;  %v1149_v6 = vadd.f32 %v1147_v51, %v1131_v56  ;;  %v1112_v41 = vadd.f32 %v2501_v22, %v1096_v7  ;;  %v3547_v39 = vmov %v3537_v45  ;;  %p1562_p3 = por %p1561_p2, %p1560_p1 }
 0x158   :  { %v1146_v5 = vmul.f32 %v3547_v39, %v2655_v48  ;;  %v1024_v63 = vadd.f32 %v1022_v60, %v1006_v9  ;;  %v3548_v40 = vmov %v3538_v59  ;;  %v3549_v13 = vstv %s3541_s8 }
 0x159   :  { %v1040_v10 = vmul.f32 %v3548_v40, %v2769_v30  ;;  %v1183_v31 = vmul.f32 %v3549_v13, %v2679_v33  ;;  %v1217_v53 = vstv %s3032_s0  ;;  %v1061_v52 = vadd.f32 %v1059_v26, %v1043_v47  ;;  %p1563_p4 = pnand %p1562_p3, %p1556_p0 }
 0x15a   :  { %v1167_v1 = vadd.f32 %v1165_v17, %v1149_v6  ;;  %v3550_v19 = vstv %s3543_s1  ;;  %v1130_v22 = vadd.f32 %v1128_v32, %v1112_v41  ;;  %v3551_v48 = vmov %v3544_v35 }
 0x15b   :  { %v1201_v61 = vmul.f32 %v3550_v19, %v2806_v43  ;;  %v1042_v36 = vadd.f32 %v1040_v10, %v1024_v63  ;;  %v1058_v62 = vmul.f32 %v3551_v48, %v2838_v34  ;;  %v3552_v38 = vmov %v3545_v27 }
 0x15c   :  { %v1185_v8 = vadd.f32 %v1183_v31, %v1167_v1  ;;  %v1148_v0 = vadd.f32 %v1146_v5, %v1130_v22  ;;  %v1164_v25 = vmul.f32 %v3552_v38, %v2596_v15  ;;  %v1219_v33 = vmul.f32 %v1217_v53, %v2737_v29 }
 0x15d   :  { %v1060_v4 = vadd.f32 %v1058_v62, %v1042_v36  ;;  %v1235_v58 = vstv %s3060_s16  ;;  %v3553_v21 = vmov %v3549_v13  ;;  %v3554_v43 = vmov %v3550_v19 }
 0x15e   :  { %v1203_v24 = vadd.f32 %v1201_v61, %v1185_v8  ;;  %v1166_v12 = vadd.f32 %v1164_v25, %v1148_v0  ;;  %v1182_v42 = vmul.f32 %v3553_v21, %v2683_v37  ;;  %v1200_v20 = vmul.f32 %v3554_v43, %v2822_v49  ;;  %v1479_v61 = vld [vmem:[#allocation2 + $0x8] sm:$0xff]  ;;  %v1480_v0 = vld [vmem:[#allocation2] sm:$0xff]  ;;  %v1481_v43 = vld [vmem:[#allocation2 + $0x18] sm:$0xff] }
 0x15f   :  { %v1237_v11 = vmul.f32 %v1235_v58, %v2834_v2  ;;  %v1218_v15 = vmul.f32 %v1217_v53, %v2769_v30  ;;  %v1236_v29 = vmul.f32 %v1235_v58, %v2838_v34  ;;  %v907_v7 = vstv %s906_s30 }
 0x160   :  { %v1221_v23 = vadd.f32 %v1219_v33, %v1203_v24  ;;  %v1184_v18 = vadd.f32 %v1182_v42, %v1166_v12  ;;  %v1085_v6 = vstv %s3105_s6  ;;  %v1263_v48 = vstv %s3112_s9 }
 0x162   :  { %v1239_v45 = vadd.f32 %v1237_v11, %v1221_v23  ;;  %v1202_v51 = vadd.f32 %v1200_v20, %v1184_v18  ;;  %v1482_v11 = vld [vmem:[#allocation2 + $0x10] sm:$0xff] }
 0x164   :  { %v1220_v59 = vadd.f32 %v1218_v15, %v1202_v51 }
 0x166   :  { %v1238_v16 = vadd.f32 %v1236_v29, %v1220_v59  ;;  %v1483_v59 = vld [vmem:[#allocation2 + $0x28] sm:$0xff] }
 0x19d   :  { %v893_v44 = vpop.permute.xlu1 %892 }
 0x19e   :  { %v891_v57 = vpop.permute.xlu0 %890  ;;  %v895_v2 = vsel %vm2265_vm4, %v893_v44, 0.0 }
 0x19f   :  { %v894_v30 = vsel %vm2265_vm4, %v891_v57, 0.0  ;;  %v897_v14 = vadd.f32 %v895_v2, %v3040_v50 }
 0x1a0   :  { %v896_v56 = vadd.f32 %v894_v30, %v882_v46 }
 0x1a2   :  { %v1071_v54 = vpop.permute.xlu1 %1070 }
 0x1a3   :  { %v1073_v55 = vsel %vm2265_vm4, %v1071_v54, 0.0 }
 0x1a4   :  { %v1069_v3 = vpop.permute.xlu0 %1068  ;;  %v1075_v32 = vadd.f32 %v1073_v55, %v1061_v52 }
 0x1a5   :  { %v1072_v27 = vsel %vm2265_vm4, %v1069_v3, 0.0 }
 0x1a6   :  { %v1074_v41 = vadd.f32 %v1072_v27, %v1060_v4 }
 0x1a7   :  { %v1249_v37 = vpop.permute.xlu1 %1248 }
 0x1a8   :  { %v1247_v60 = vpop.permute.xlu0 %1246  ;;  %v1251_v39 = vsel %vm2265_vm4, %v1249_v37, 0.0 }
 0x1a9   :  { %v1250_v10 = vsel %vm2265_vm4, %v1247_v60, 0.0  ;;  %v1253_v19 = vadd.f32 %v1251_v39, %v1239_v45 }
 0x1aa   :  { %v1252_v8 = vadd.f32 %v1250_v10, %v1238_v16  ;;  %v1484_v16 = vld [vmem:[#allocation2 + $0x20] sm:$0xff] }
 0x1ab   :  { %v901_v34 = vpop.permute.xlu1 %900 }
 0x1ac   :  { %v903_v26 = vsel %vm2286_vm5, %v901_v34, 0.0  ;;  %v899_v9 = vpop.permute.xlu0 %898 }
 0x1ad   :  { %v905_v17 = vadd.f32 %v903_v26, %v897_v14  ;;  %v902_v28 = vsel %vm2286_vm5, %v899_v9, 0.0 }
 0x1ae   :  { %v904_v50 = vadd.f32 %v902_v28, %v896_v56 }
 0x1af   :  { %v909_v47 = vadd.f32 %v907_v7, %v905_v17  ;;  %v1079_v46 = vpop.permute.xlu1 %1078 }
 0x1b0   :  { %v908_v5 = vadd.f32 %v907_v7, %v904_v50  ;;  %v1081_v63 = vsel %vm2286_vm5, %v1079_v46, 0.0 }
 0x1b1   :  { %v1077_v40 = vpop.permute.xlu0 %1076  ;;  %v911_v13 = vmax.f32 %v909_v47, 0.0  ;;  %v1083_v31 = vadd.f32 %v1081_v63, %v1075_v32 }
 0x1b2   :  { %v1080_v53 = vsel %vm2286_vm5, %v1077_v40, 0.0  ;;  %v910_v52 = vmax.f32 %v908_v5, 0.0 }
 0x1b3   :  { %v1082_v1 = vadd.f32 %v1080_v53, %v1074_v41  ;;  %v1269_v22 = vadd.f32 %v1479_v61, %v911_v13  ;;  %v1087_v36 = vadd.f32 %v1085_v6, %v1083_v31 }
 0x1b4   :  { %v1257_v62 = vpop.permute.xlu1 %1256  ;;  %v1268_v38 = vadd.f32 %v1480_v0, %v910_v52 }
 0x1b5   :  { %v1086_v25 = vadd.f32 %v1085_v6, %v1082_v1  ;;  %v1259_v4 = vsel %vm2286_vm5, %v1257_v62, 0.0  ;;  %1271 = vst [vmem:[#allocation12 + $0x8] sm:$0xff] %v1269_v22  ;;  %v1089_v58 = vmax.f32 %v1087_v36, 0.0 }
 0x1b6   :  { %v1261_v24 = vadd.f32 %v1259_v4, %v1253_v19  ;;  %1270 = vst [vmem:[#allocation12] sm:$0xff] %v1268_v38 }
 0x1b7   :  { %v1088_v21 = vmax.f32 %v1086_v25, 0.0  ;;  %v1273_v20 = vadd.f32 %v1481_v43, %v1089_v58 }
 0x1b8   :  { %v1265_v23 = vadd.f32 %v1263_v48, %v1261_v24 }
 0x1b9   :  { %v1272_v18 = vadd.f32 %v1482_v11, %v1088_v21  ;;  %1276 = vst [vmem:[#allocation12 + $0x18] sm:$0xff] %v1273_v20 }
 0x1ba   :  { %v1267_v51 = vmax.f32 %v1265_v23, 0.0 }
 0x1bb   :  { %1275 = vst [vmem:[#allocation12 + $0x10] sm:$0xff] %v1272_v18 }
 0x1bc   :  { %v1255_v33 = vpop.permute.xlu0 %1254  ;;  %v1278_v29 = vadd.f32 %v1483_v59, %v1267_v51 }
 0x1bd   :  { %v1258_v12 = vsel %vm2286_vm5, %v1255_v33, 0.0 }
 0x1be   :  { %v1260_v42 = vadd.f32 %v1258_v12, %v1252_v8  ;;  %1281 = vst [vmem:[#allocation12 + $0x28] sm:$0xff] %v1278_v29 }
 0x1c0   :  { %v1264_v45 = vadd.f32 %v1263_v48, %v1260_v42 }
 0x1c2   :  { %v1266_v15 = vmax.f32 %v1264_v45, 0.0 }
 0x1c4   :  { %v1277_v44 = vadd.f32 %v1484_v16, %v1266_v15 }
 0x1c6   :  { %1280 = vst [vmem:[#allocation12 + $0x20] sm:$0xff] %v1277_v44 }
 0x1c7   :  { %1566 = shalt.err (!%p1563_p4)
}
 0x1c8   :  { %s3557_s29 = sld [smem:[#allocation83_spill]] }
 0x1ce   :  { %s1567_s24 = scalar_lea.hbm %s3557_s29, 768 }
 0x1cf   :  { %p1568_p5 = scmp.ne.s32.totalorder %s3557_s29, %s1567_s24  ;;  %p1571_p6 = scmp.lt.u32.totalorder %s1567_s24, %s3557_s29 }
 0x1d1   :  { %p1573_p7 = pnand %p1571_p6, %p1568_p5 }
 0x1d3   :  { %1576 = shalt.err (!%p1573_p7)
}
 0x1d4   :  { %s3558_s23 = smov 8   ;;  %s3559_s27 = smov 128  }
 0x1d5   :  { %1293 = dma.vmem_to_hbm [thread:$0]  %s1288_s15, 768, %s3557_s29, [#allocation4], %s3559_s27, %s3559_s27, %s3558_s23  }
 0x1d6   :  { %1585 = dma.done.wait [#allocation4], 768  }
 0x1d7   :  { %1586 = vsyncadd [#allocation4], 4294966528 }
 0x1d8   :  { %1297 = vsyncpa [#allocation3], 1 }
 0x1d9   :  { %1298 = vsyncpa [#allocation4], 1 }
 0x1da   :  { %1299 = vsyncpa [#allocation5], 1 }
 0x1db   :  { %1300 = vsyncpa [#allocation8], 1 }
 0x1dc   :  { %1301 = vsyncpa [#allocation11], 1 }

</bundles_post_ra>
